<compile_context>
chip_gen: v7x
topology: tpu7x:2x2x1
jax: 0.10.0
libtpu: 0.0.40
codegen_flags: <defaults>
</compile_context>

<pallas_src>
from functools import partial

import numpy as np
import jax
import jax.numpy as jnp
from jax import lax
from jax.experimental import pallas as pl
from jax.experimental.pallas import tpu as pltpu

EPS = 1e-5


# ---------------------------------------------------------------------------
# helpers
# ---------------------------------------------------------------------------
def _cdiv(a, b):
    return -(-a // b)


def _vmem_limit_bytes():
    """Scoped-VMEM request: 3/4 of physical per-core VMEM (v5e/v6e: 96MiB, v7x: 48MiB)."""
    try:
        info = pltpu.get_tpu_info()
        cap = int(getattr(info, "vmem_capacity_bytes", 0) or 0)
        if cap > 0:
            return min(100 * 1024 * 1024, (cap * 3) // 4)
    except Exception:
        pass
    return 64 * 1024 * 1024


def _pick_row_tile(R, bytes_per_row, target_bytes=4 << 20, max_rows=2048):
    """Row tile sized from channel widths so the double-buffered set stays modest."""
    if R <= 8:
        return R
    t = min(R, max_rows, max(8, target_bytes // max(1, bytes_per_row)))
    t = max(8, t - (t % 8))
    if t >= R:
        return R
    # prefer an exact divisor close to t (avoids the masked ragged tail)
    for cand in range(t, max(8, t // 2) - 1, -8):
        if R % cand == 0:
            return cand
    return t  # ragged last tile -> handled with masked stats + boundary-masked stores


def _stats(y):
    """Per-channel [sum; sum_of_squares] of an (rows, C) f32 tile -> (2, C)."""
    return jnp.concatenate([jnp.sum(y, axis=0, keepdims=True),
                            jnp.sum(y * y, axis=0, keepdims=True)], axis=0)


def _bn_scale_shift(stats_slots, count, gamma, beta):
    """Reduce per-step stat slots and fold BN into per-channel scale/shift."""
    s = jnp.sum(stats_slots, axis=0)                    # (2, C)
    mean = s[0] / count
    var = jnp.maximum(s[1] / count - mean * mean, 0.0)  # biased var (training-mode BN)
    scale = gamma * lax.rsqrt(var + EPS)
    shift = beta - mean * scale
    return scale.reshape(1, -1), shift.reshape(1, -1)


# ---------------------------------------------------------------------------
# Pass 1: conv1 (1x1 GEMM, bf16 MXU / f32 accum) + BN1 partial stats
# ---------------------------------------------------------------------------
def make_conv1_kernel(R, TR):
    ragged = (R % TR) != 0

    def kern(x_ref, w_ref, y_ref, s_ref):
        y = jnp.dot(x_ref[...].astype(jnp.bfloat16), w_ref[...],
                    preferred_element_type=jnp.float32)
        y_ref[...] = y.astype(y_ref.dtype)                       # bf16 store
        ys = y
        if ragged:
            row = pl.program_id(0) * TR + lax.broadcasted_iota(jnp.int32, (TR, 1), 0)
            ys = jnp.where(row < R, y, 0.0)
        s_ref[...] = _stats(ys)

    return kern


# ---------------------------------------------------------------------------
# Pass 2: BN1+ReLU (folded) + conv2 3x3 'same' (width-im2col, K=3*C0, 3 GEMMs)
#         + BN2 partial stats.  One image (H, W, C0) per grid step.
# ---------------------------------------------------------------------------
def make_conv2_kernel(H, W, C0, C1, use_roll):
    HW = H * W
    K3 = 3 * C0

    def kern(y1_ref, sc_ref, sh_ref, w2_ref, y2_ref, s_ref):
        sc = sc_ref[...].reshape(1, 1, C0)
        sh = sh_ref[...].reshape(1, 1, C0)
        # BN1 + ReLU in f32 (scale/shift folded from global batch stats).
        a32 = jnp.maximum(y1_ref[...].astype(jnp.float32) * sc + sh, 0.0)   # (H, W, C0)

        # Horizontal (width) taps: a[:, j-1, :] and a[:, j+1, :] with zero borders.
        if use_roll:
            col = lax.broadcasted_iota(jnp.int32, (H, W, 1), 1)
            wm1 = jnp.where(col >= 1, pltpu.roll(a32, 1, axis=1), 0.0)
            wp1 = jnp.where(col <= W - 2, pltpu.roll(a32, -1, axis=1), 0.0)
        else:  # fallback: sublane slice+concat (always lowers)
            zc = jnp.zeros((H, 1, C0), jnp.float32)
            wm1 = jnp.concatenate([zc, a32[:, :W - 1, :]], axis=1)
            wp1 = jnp.concatenate([a32[:, 1:, :], zc], axis=1)

        a = a32.astype(jnp.bfloat16)
        # width-im2col on the channel (lane) axis -> (H, W, 3*C0) bf16, K = 3*C0
        aw = jnp.concatenate(
            [wm1.astype(jnp.bfloat16), a, wp1.astype(jnp.bfloat16)], axis=2)

        # Vertical taps: shifts along the (major) H axis — no tile crossing.
        zrow = jnp.zeros((1, W, K3), jnp.bfloat16)
        up = jnp.concatenate([zrow, aw[:H - 1]], axis=0)     # input row i-1 (ki=0)
        down = jnp.concatenate([aw[1:], zrow], axis=0)       # input row i+1 (ki=2)

        acc = jnp.dot(aw.reshape(HW, K3), w2_ref[1], preferred_element_type=jnp.float32)
        acc += jnp.dot(up.reshape(HW, K3), w2_ref[0], preferred_element_type=jnp.float32)
        acc += jnp.dot(down.reshape(HW, K3), w2_ref[2], preferred_element_type=jnp.float32)

        y2_ref[...] = acc.reshape(H, W, C1).astype(y2_ref.dtype)  # bf16 store
        s_ref[...] = _stats(acc)

    return kern


# ---------------------------------------------------------------------------
# Pass 3: BN2+ReLU (folded) + conv3 (1x1 GEMM) + BN3 partial stats
# ---------------------------------------------------------------------------
def make_conv3_kernel(R, TR):
    ragged = (R % TR) != 0

    def kern(y2_ref, sc_ref, sh_ref, w_ref, y3_ref, s_ref):
        a = jnp.maximum(y2_ref[...].astype(jnp.float32) * sc_ref[...] + sh_ref[...], 0.0)
        z = jnp.dot(a.astype(jnp.bfloat16), w_ref[...],
                    preferred_element_type=jnp.float32)
        y3_ref[...] = z.astype(y3_ref.dtype)                     # bf16 store
        zs = z
        if ragged:
            row = pl.program_id(0) * TR + lax.broadcasted_iota(jnp.int32, (TR, 1), 0)
            zs = jnp.where(row < R, z, 0.0)
        s_ref[...] = _stats(zs)

    return kern


# ---------------------------------------------------------------------------
# Pass 4: BN3 (folded) + identity add + ReLU
# ---------------------------------------------------------------------------
def residual_kernel(y3_ref, sc_ref, sh_ref, x_ref, o_ref):
    z = y3_ref[...].astype(jnp.float32) * sc_ref[...] + sh_ref[...] + x_ref[...]
    o_ref[...] = jnp.maximum(z, 0.0)


# ---------------------------------------------------------------------------
# Parameters (Kaiming-normal fan_out/relu, matching the PyTorch module init)
# ---------------------------------------------------------------------------
def init_params(key, in_channels, out_channels):
    c0, c1, c2 = out_channels
    assert c2 == in_channels, "identity skip requires out_channels[2] == in_channels"
    k1, k2, k3 = jax.random.split(key, 3)

    w1 = jax.random.normal(k1, (c0, in_channels, 1, 1), jnp.float32) * np.sqrt(2.0 / (c0 * 1 * 1))
    w2 = jax.random.normal(k2, (c1, c0, 3, 3), jnp.float32) * np.sqrt(2.0 / (c1 * 3 * 3))
    w3 = jax.random.normal(k3, (c2, c1, 1, 1), jnp.float32) * np.sqrt(2.0 / (c2 * 1 * 1))

    w1_io = jnp.transpose(w1[:, :, 0, 0], (1, 0))        # (Cin, C0)
    w2_hwio = jnp.transpose(w2, (2, 3, 1, 0))            # (3, 3, C0, C1)
    w3_io = jnp.transpose(w3[:, :, 0, 0], (1, 0))        # (C1, C2)

    return {
        # f32 masters (pure-JAX reference)
        "w1_f32": w1_io, "w2_hwio": w2_hwio, "w3_f32": w3_io,
        # bf16 MXU layouts.  w2 is fused over the width taps: (kh, kw*C0, C1).
        "w1": w1_io.astype(jnp.bfloat16),
        "w2": w2_hwio.reshape(3, 3 * c0, c1).astype(jnp.bfloat16),
        "w3": w3_io.astype(jnp.bfloat16),
        # BatchNorm affine params (PyTorch defaults: gamma=1, beta=0)
        "g1": jnp.ones((c0,), jnp.float32), "be1": jnp.zeros((c0,), jnp.float32),
        "g2": jnp.ones((c1,), jnp.float32), "be2": jnp.zeros((c1,), jnp.float32),
        "g3": jnp.ones((c2,), jnp.float32), "be3": jnp.zeros((c2,), jnp.float32),
        # NOTE: conv biases intentionally omitted — cancelled exactly by the
        # training-mode BN mean subtraction that immediately follows each conv.
    }


# ---------------------------------------------------------------------------
# Forward pass (4 gridded pallas_calls + tiny JAX glue for BN finalization)
# ---------------------------------------------------------------------------
@partial(jax.jit, static_argnames=("use_roll",))
def bottleneck_identity_forward(x_nchw, params, use_roll=True):
    N, Cin, H, W = x_nchw.shape
    HW = H * W
    R = N * HW

    C0 = params["w1"].shape[1]
    C1 = params["w2"].shape[2]
    C2 = params["w3"].shape[1]
    count = float(R)

    vlim = _vmem_limit_bytes()
    cp = pltpu.CompilerParams(dimension_semantics=("parallel",), vmem_limit_bytes=vlim)

    xf = jnp.transpose(x_nchw, (0, 2, 3, 1)).reshape(R, Cin)   # NHWC flattened, f32

    # ---- Pass 1: conv1 + BN1 partial stats ----
    TR1 = _pick_row_tile(R, 4 * Cin + 2 * C0)
    G1 = _cdiv(R, TR1)
    y1, st1 = pl.pallas_call(
        make_conv1_kernel(R, TR1),
        grid=(G1,),
        in_specs=[pl.BlockSpec((TR1, Cin), lambda i: (i, 0)),
                  pl.BlockSpec((Cin, C0), lambda i: (0, 0))],
        out_specs=(pl.BlockSpec((TR1, C0), lambda i: (i, 0)),
                   pl.BlockSpec((None, 2, C0), lambda i: (i, 0, 0))),
        out_shape=(jax.ShapeDtypeStruct((R, C0), jnp.bfloat16),
                   jax.ShapeDtypeStruct((G1, 2, C0), jnp.float32)),
        compiler_params=cp,
    )(xf, params["w1"])
    sc1, sh1 = _bn_scale_shift(st1, count, params["g1"], params["be1"])

    # ---- Pass 2: BN1+ReLU + conv2 (3x3 'same', fused-K taps) + BN2 partial stats ----
    y2, st2 = pl.pallas_call(
        make_conv2_kernel(H, W, C0, C1, use_roll),
        grid=(N,),
        in_specs=[pl.BlockSpec((None, H, W, C0), lambda n: (n, 0, 0, 0)),
                  pl.BlockSpec((1, C0), lambda n: (0, 0)),
                  pl.BlockSpec((1, C0), lambda n: (0, 0)),
                  pl.BlockSpec((3, 3 * C0, C1), lambda n: (0, 0, 0))],
        out_specs=(pl.BlockSpec((None, H, W, C1), lambda n: (n, 0, 0, 0)),
                   pl.BlockSpec((None, 2, C1), lambda n: (n, 0, 0))),
        out_shape=(jax.ShapeDtypeStruct((N, H, W, C1), jnp.bfloat16),
                   jax.ShapeDtypeStruct((N, 2, C1), jnp.float32)),
        compiler_params=cp,
    )(y1.reshape(N, H, W, C0), sc1, sh1, params["w2"])
    sc2, sh2 = _bn_scale_shift(st2, count, params["g2"], params["be2"])

    # ---- Pass 3: BN2+ReLU + conv3 + BN3 partial stats ----
    TR3 = _pick_row_tile(R, 2 * C1 + 2 * C2)
    G3 = _cdiv(R, TR3)
    y3, st3 = pl.pallas_call(
        make_conv3_kernel(R, TR3),
        grid=(G3,),
        in_specs=[pl.BlockSpec((TR3, C1), lambda i: (i, 0)),
                  pl.BlockSpec((1, C1), lambda i: (0, 0)),
                  pl.BlockSpec((1, C1), lambda i: (0, 0)),
                  pl.BlockSpec((C1, C2), lambda i: (0, 0))],
        out_specs=(pl.BlockSpec((TR3, C2), lambda i: (i, 0)),
                   pl.BlockSpec((None, 2, C2), lambda i: (i, 0, 0))),
        out_shape=(jax.ShapeDtypeStruct((R, C2), jnp.bfloat16),
                   jax.ShapeDtypeStruct((G3, 2, C2), jnp.float32)),
        compiler_params=cp,
    )(y2.reshape(R, C1), sc2, sh2, params["w3"])
    sc3, sh3 = _bn_scale_shift(st3, count, params["g3"], params["be3"])

    # ---- Pass 4: BN3 + identity add + ReLU ----
    TR4 = _pick_row_tile(R, 10 * C2)
    G4 = _cdiv(R, TR4)
    out_flat = pl.pallas_call(
        residual_kernel,
        grid=(G4,),
        in_specs=[pl.BlockSpec((TR4, C2), lambda i: (i, 0)),
                  pl.BlockSpec((1, C2), lambda i: (0, 0)),
                  pl.BlockSpec((1, C2), lambda i: (0, 0)),
                  pl.BlockSpec((TR4, C2), lambda i: (i, 0))],
        out_specs=pl.BlockSpec((TR4, C2), lambda i: (i, 0)),
        out_shape=jax.ShapeDtypeStruct((R, C2), jnp.float32),
        compiler_params=cp,
    )(y3, sc3, sh3, xf)

    return jnp.transpose(out_flat.reshape(N, H, W, C2), (0, 3, 1, 2))


# ---------------------------------------------------------------------------
# Pure-JAX reference (same math & same bf16-at-MXU-boundary policy)
# ---------------------------------------------------------------------------
def reference_forward(x_nchw, params):
    x = jnp.transpose(x_nchw, (0, 2, 3, 1))  # NHWC f32

    def bn(y, g, b):
        m = jnp.mean(y, axis=(0, 1, 2), keepdims=True)
        v = jnp.mean((y - m) ** 2, axis=(0, 1, 2), keepdims=True)
        return (y - m) * lax.rsqrt(v + EPS) * g.reshape(1, 1, 1, -1) + b.reshape(1, 1, 1, -1)

    def dot1x1(a, w):
        return jnp.einsum("nhwc,cd->nhwd",
                          a.astype(jnp.bfloat16), w.astype(jnp.bfloat16),
                          preferred_element_type=jnp.float32)

    y = dot1x1(x, params["w1_f32"])
    y = jax.nn.relu(bn(y, params["g1"], params["be1"]))
    y = lax.conv_general_dilated(y.astype(jnp.bfloat16),
                                 params["w2_hwio"].astype(jnp.bfloat16),
                                 (1, 1), "SAME",
                                 dimension_numbers=("NHWC", "HWIO", "NHWC"),
                                 preferred_element_type=jnp.float32)
    y = jax.nn.relu(bn(y, params["g2"], params["be2"]))
    z = dot1x1(y, params["w3_f32"])
    z = bn(z, params["g3"], params["be3"]) + x
    return jnp.transpose(jax.nn.relu(z), (0, 3, 1, 2))


if __name__ == "__main__":
    key = jax.random.PRNGKey(0)
    N, Cin, H, W = 2, 4, 16, 16
    out_channels = (8, 8, 4)  # out_channels[2] must equal in_channels for identity add
    # NOTE: real ResNet101 stages have >=64 channels; these toy widths are only for
    # the correctness run (lane-sparse stores make them unrepresentative for perf).

    params = init_params(key, Cin, out_channels)
    x = jax.random.normal(jax.random.fold_in(key, 123), (N, Cin, H, W), jnp.float32)

    try:
        out = jax.block_until_ready(bottleneck_identity_forward(x, params, use_roll=True))
    except Exception:
        # Fallback if the sublane pltpu.roll does not lower on this toolchain:
        # identical math via slice+concat width shifts.
        out = jax.block_until_ready(bottleneck_identity_forward(x, params, use_roll=False))
    ref = reference_forward(x, params)

    assert out.shape == (N, Cin, H, W)
    # bf16 MXU operands + bf16 inter-pass activations + different accumulation order
    # vs XLA's conv => loose tolerance.
    np.testing.assert_allclose(np.asarray(out), np.asarray(ref), rtol=3e-2, atol=3e-2)

    print("KERNEL_OK")
</pallas_src>

<mosaic_0001>
module attributes {stable_mosaic.version = 11 : i64} {
  func.func @kern(%arg0: i32, %arg1: memref<512x4xf32, #tpu.memory_space<vmem>>, %arg2: memref<4x8xbf16, #tpu.memory_space<vmem>>, %arg3: memref<512x8xbf16, #tpu.memory_space<vmem>>, %arg4: memref<1x2x8xf32, #tpu.memory_space<vmem>>) attributes {dimension_semantics = [#tpu.dimension_semantics<parallel>], iteration_bounds = array<i64: 1>, scalar_prefetch = 0 : i64, scratch_operands = 0 : i64, tpu.core_type = #tpu.core_type<tc>, window_params = [{transform_indices = @transform_0, window_bounds = array<i64: 512, 4>}, {pipeline_mode = #tpu.pipeline_mode<synchronous>, transform_indices = @transform_1, window_bounds = array<i64: 4, 8>}, {transform_indices = @transform_2, window_bounds = array<i64: 512, 8>}, {transform_indices = @transform_3, window_bounds = array<i64: 1, 2, 8>}]} {
    %c0 = arith.constant 0 : index
    %c0_0 = arith.constant 0 : index
    %0 = vector.load %arg1[%c0, %c0_0] : memref<512x4xf32, #tpu.memory_space<vmem>>, vector<512x4xf32>
    %1 = arith.truncf %0 : vector<512x4xf32> to vector<512x4xbf16>
    %c0_1 = arith.constant 0 : index
    %c0_2 = arith.constant 0 : index
    %2 = vector.load %arg2[%c0_1, %c0_2] : memref<4x8xbf16, #tpu.memory_space<vmem>>, vector<4x8xbf16>
    %cst = arith.constant dense<0.000000e+00> : vector<512x8xf32>
    %3 = tpu.matmul %1, %2, %cst {dimension_numbers = #tpu.dot_dimension_numbers<[1], [0], [0], [1], [0, 0, 1, 1], [], []>} : vector<512x4xbf16>, vector<4x8xbf16>, vector<512x8xf32> -> vector<512x8xf32>
    %4 = arith.truncf %3 : vector<512x8xf32> to vector<512x8xbf16>
    %c0_3 = arith.constant 0 : index
    %c0_4 = arith.constant 0 : index
    %5 = vector.load %arg3[%c0_3, %c0_4] : memref<512x8xbf16, #tpu.memory_space<vmem>>, vector<512x8xbf16>
    tpu.vector_store %arg3[%c0_3, %c0_4], %4 {strides = array<i32>} : memref<512x8xbf16, #tpu.memory_space<vmem>>, vector<512x8xbf16>,
    %cst_5 = arith.constant dense<0.000000e+00> : vector<8xf32>
    %6 = vector.multi_reduction <add>, %3, %cst_5 [0] : vector<512x8xf32> to vector<8xf32>
    %7 = vector.shape_cast %6 : vector<8xf32> to vector<1x8xf32>
    %8 = arith.mulf %3, %3 : vector<512x8xf32>
    %cst_6 = arith.constant dense<0.000000e+00> : vector<8xf32>
    %9 = vector.multi_reduction <add>, %8, %cst_6 [0] : vector<512x8xf32> to vector<8xf32>
    %10 = vector.shape_cast %9 : vector<8xf32> to vector<1x8xf32>
    %11 = tpu.concatenate %7, %10 in 0 : vector<1x8xf32>, vector<1x8xf32> -> vector<2x8xf32>
    %c0_7 = arith.constant 0 : index
    %c0_8 = arith.constant 0 : index
    %c0_9 = arith.constant 0 : index
    %12 = vector.load %arg4[%c0_7, %c0_8, %c0_9] : memref<1x2x8xf32, #tpu.memory_space<vmem>>, vector<1x2x8xf32>
    %13 = vector.shape_cast %12 : vector<1x2x8xf32> to vector<2x8xf32>
    %14 = vector.shape_cast %11 : vector<2x8xf32> to vector<1x2x8xf32>
    tpu.vector_store %arg4[%c0_7, %c0_8, %c0_9], %14 {strides = array<i32>} : memref<1x2x8xf32, #tpu.memory_space<vmem>>, vector<1x2x8xf32>,
    return
  }
  func.func @transform_0(%arg0: i32) -> (i32, i32) {
    %c0_i32 = arith.constant 0 : i32
    %c0_i32_0 = arith.constant 0 : i32
    return %arg0, %c0_i32 : i32, i32
  }
  func.func @transform_1(%arg0: i32) -> (i32, i32) {
    %c0_i32 = arith.constant 0 : i32
    %c0_i32_0 = arith.constant 0 : i32
    %c0_i32_1 = arith.constant 0 : i32
    return %c0_i32, %c0_i32_0 : i32, i32
  }
  func.func @transform_2(%arg0: i32) -> (i32, i32) {
    %c0_i32 = arith.constant 0 : i32
    %c0_i32_0 = arith.constant 0 : i32
    return %arg0, %c0_i32 : i32, i32
  }
  func.func @transform_3(%arg0: i32) -> (i32, i32, i32) {
    %c0_i32 = arith.constant 0 : i32
    %c0_i32_0 = arith.constant 0 : i32
    %c0_i32_1 = arith.constant 0 : i32
    return %arg0, %c0_i32, %c0_i32_0 : i32, i32, i32
  }
}

module attributes {stable_mosaic.version = 11 : i64} {
  func.func @kern(%arg0: i32, %arg1: memref<1x16x16x8xbf16, #tpu.memory_space<vmem>>, %arg2: memref<1x8xf32, #tpu.memory_space<vmem>>, %arg3: memref<1x8xf32, #tpu.memory_space<vmem>>, %arg4: memref<3x24x8xbf16, #tpu.memory_space<vmem>>, %arg5: memref<1x16x16x8xbf16, #tpu.memory_space<vmem>>, %arg6: memref<1x2x8xf32, #tpu.memory_space<vmem>>) attributes {dimension_semantics = [#tpu.dimension_semantics<parallel>], iteration_bounds = array<i64: 2>, scalar_prefetch = 0 : i64, scratch_operands = 0 : i64, tpu.core_type = #tpu.core_type<tc>, window_params = [{transform_indices = @transform_0, window_bounds = array<i64: 1, 16, 16, 8>}, {pipeline_mode = #tpu.pipeline_mode<synchronous>, transform_indices = @transform_1, window_bounds = array<i64: 1, 8>}, {pipeline_mode = #tpu.pipeline_mode<synchronous>, transform_indices = @transform_2, window_bounds = array<i64: 1, 8>}, {pipeline_mode = #tpu.pipeline_mode<synchronous>, transform_indices = @transform_3, window_bounds = array<i64: 3, 24, 8>}, {transform_indices = @transform_4, window_bounds = array<i64: 1, 16, 16, 8>}, {transform_indices = @transform_5, window_bounds = array<i64: 1, 2, 8>}]} {
    %c0 = arith.constant 0 : index
    %c0_0 = arith.constant 0 : index
    %0 = vector.load %arg2[%c0, %c0_0] : memref<1x8xf32, #tpu.memory_space<vmem>>, vector<1x8xf32>
    %1 = vector.shape_cast %0 : vector<1x8xf32> to vector<1x1x8xf32>
    %c0_1 = arith.constant 0 : index
    %c0_2 = arith.constant 0 : index
    %2 = vector.load %arg3[%c0_1, %c0_2] : memref<1x8xf32, #tpu.memory_space<vmem>>, vector<1x8xf32>
    %3 = vector.shape_cast %2 : vector<1x8xf32> to vector<1x1x8xf32>
    %c0_3 = arith.constant 0 : index
    %c0_4 = arith.constant 0 : index
    %c0_5 = arith.constant 0 : index
    %c0_6 = arith.constant 0 : index
    %4 = vector.load %arg1[%c0_3, %c0_4, %c0_5, %c0_6] : memref<1x16x16x8xbf16, #tpu.memory_space<vmem>>, vector<1x16x16x8xbf16>
    %5 = vector.shape_cast %4 : vector<1x16x16x8xbf16> to vector<16x16x8xbf16>
    %6 = arith.extf %5 : vector<16x16x8xbf16> to vector<16x16x8xf32>
    %7 = vector.broadcast %1 : vector<1x1x8xf32> to vector<16x16x8xf32>
    %8 = arith.mulf %6, %7 : vector<16x16x8xf32>
    %9 = vector.broadcast %3 : vector<1x1x8xf32> to vector<16x16x8xf32>
    %10 = arith.addf %8, %9 : vector<16x16x8xf32>
    %cst = arith.constant 0.000000e+00 : f32
    %11 = vector.broadcast %cst : f32 to vector<16x16x8xf32>
    %12 = arith.maximumf %10, %11 : vector<16x16x8xf32>
    %cst_7 = arith.constant 0.000000e+00 : f32
    %13 = vector.broadcast %cst_7 : f32 to vector<16x1x8xf32>
    %14 = vector.extract_strided_slice %12 {offsets = [0, 0, 0], sizes = [16, 15, 8], strides = [1, 1, 1]} : vector<16x16x8xf32> to vector<16x15x8xf32>
    %15 = tpu.concatenate %13, %14 in 1 : vector<16x1x8xf32>, vector<16x15x8xf32> -> vector<16x16x8xf32>
    %16 = vector.extract_strided_slice %12 {offsets = [0, 1, 0], sizes = [16, 15, 8], strides = [1, 1, 1]} : vector<16x16x8xf32> to vector<16x15x8xf32>
    %17 = tpu.concatenate %16, %13 in 1 : vector<16x15x8xf32>, vector<16x1x8xf32> -> vector<16x16x8xf32>
    %18 = arith.truncf %12 : vector<16x16x8xf32> to vector<16x16x8xbf16>
    %19 = arith.truncf %15 : vector<16x16x8xf32> to vector<16x16x8xbf16>
    %20 = arith.truncf %17 : vector<16x16x8xf32> to vector<16x16x8xbf16>
    %21 = tpu.concatenate %19, %18, %20 in 2 : vector<16x16x8xbf16>, vector<16x16x8xbf16>, vector<16x16x8xbf16> -> vector<16x16x24xbf16>
    %cst_8 = arith.constant 0.000000e+00 : bf16
    %22 = vector.broadcast %cst_8 : bf16 to vector<1x16x24xbf16>
    %23 = vector.extract_strided_slice %21 {offsets = [0, 0, 0], sizes = [15, 16, 24], strides = [1, 1, 1]} : vector<16x16x24xbf16> to vector<15x16x24xbf16>
    %24 = tpu.concatenate %22, %23 in 0 : vector<1x16x24xbf16>, vector<15x16x24xbf16> -> vector<16x16x24xbf16>
    %25 = vector.extract_strided_slice %21 {offsets = [1, 0, 0], sizes = [15, 16, 24], strides = [1, 1, 1]} : vector<16x16x24xbf16> to vector<15x16x24xbf16>
    %26 = tpu.concatenate %25, %22 in 0 : vector<15x16x24xbf16>, vector<1x16x24xbf16> -> vector<16x16x24xbf16>
    %27 = vector.shape_cast %21 : vector<16x16x24xbf16> to vector<256x24xbf16>
    %c1 = arith.constant 1 : index
    %c0_9 = arith.constant 0 : index
    %c0_10 = arith.constant 0 : index
    %28 = vector.load %arg4[%c1, %c0_9, %c0_10] : memref<3x24x8xbf16, #tpu.memory_space<vmem>>, vector<1x24x8xbf16>
    %29 = vector.shape_cast %28 : vector<1x24x8xbf16> to vector<24x8xbf16>
    %cst_11 = arith.constant dense<0.000000e+00> : vector<256x8xf32>
    %30 = tpu.matmul %27, %29, %cst_11 {dimension_numbers = #tpu.dot_dimension_numbers<[1], [0], [0], [1], [0, 0, 1, 1], [], []>} : vector<256x24xbf16>, vector<24x8xbf16>, vector<256x8xf32> -> vector<256x8xf32>
    %31 = vector.shape_cast %24 : vector<16x16x24xbf16> to vector<256x24xbf16>
    %c0_12 = arith.constant 0 : index
    %c0_13 = arith.constant 0 : index
    %c0_14 = arith.constant 0 : index
    %32 = vector.load %arg4[%c0_12, %c0_13, %c0_14] : memref<3x24x8xbf16, #tpu.memory_space<vmem>>, vector<1x24x8xbf16>
    %33 = vector.shape_cast %32 : vector<1x24x8xbf16> to vector<24x8xbf16>
    %cst_15 = arith.constant dense<0.000000e+00> : vector<256x8xf32>
    %34 = tpu.matmul %31, %33, %cst_15 {dimension_numbers = #tpu.dot_dimension_numbers<[1], [0], [0], [1], [0, 0, 1, 1], [], []>} : vector<256x24xbf16>, vector<24x8xbf16>, vector<256x8xf32> -> vector<256x8xf32>
    %35 = arith.addf %30, %34 : vector<256x8xf32>
    %36 = vector.shape_cast %26 : vector<16x16x24xbf16> to vector<256x24xbf16>
    %c2 = arith.constant 2 : index
    %c0_16 = arith.constant 0 : index
    %c0_17 = arith.constant 0 : index
    %37 = vector.load %arg4[%c2, %c0_16, %c0_17] : memref<3x24x8xbf16, #tpu.memory_space<vmem>>, vector<1x24x8xbf16>
    %38 = vector.shape_cast %37 : vector<1x24x8xbf16> to vector<24x8xbf16>
    %cst_18 = arith.constant dense<0.000000e+00> : vector<256x8xf32>
    %39 = tpu.matmul %36, %38, %cst_18 {dimension_numbers = #tpu.dot_dimension_numbers<[1], [0], [0], [1], [0, 0, 1, 1], [], []>} : vector<256x24xbf16>, vector<24x8xbf16>, vector<256x8xf32> -> vector<256x8xf32>
    %40 = arith.addf %35, %39 : vector<256x8xf32>
    %41 = vector.shape_cast %40 : vector<256x8xf32> to vector<16x16x8xf32>
    %42 = arith.truncf %41 : vector<16x16x8xf32> to vector<16x16x8xbf16>
    %c0_19 = arith.constant 0 : index
    %c0_20 = arith.constant 0 : index
    %c0_21 = arith.constant 0 : index
    %c0_22 = arith.constant 0 : index
    %43 = vector.load %arg5[%c0_19, %c0_20, %c0_21, %c0_22] : memref<1x16x16x8xbf16, #tpu.memory_space<vmem>>, vector<1x16x16x8xbf16>
    %44 = vector.shape_cast %43 : vector<1x16x16x8xbf16> to vector<16x16x8xbf16>
    %45 = vector.shape_cast %42 : vector<16x16x8xbf16> to vector<1x16x16x8xbf16>
    tpu.vector_store %arg5[%c0_19, %c0_20, %c0_21, %c0_22], %45 {strides = array<i32>} : memref<1x16x16x8xbf16, #tpu.memory_space<vmem>>, vector<1x16x16x8xbf16>,
    %cst_23 = arith.constant dense<0.000000e+00> : vector<8xf32>
    %46 = vector.multi_reduction <add>, %40, %cst_23 [0] : vector<256x8xf32> to vector<8xf32>
    %47 = vector.shape_cast %46 : vector<8xf32> to vector<1x8xf32>
    %48 = arith.mulf %40, %40 : vector<256x8xf32>
    %cst_24 = arith.constant dense<0.000000e+00> : vector<8xf32>
    %49 = vector.multi_reduction <add>, %48, %cst_24 [0] : vector<256x8xf32> to vector<8xf32>
    %50 = vector.shape_cast %49 : vector<8xf32> to vector<1x8xf32>
    %51 = tpu.concatenate %47, %50 in 0 : vector<1x8xf32>, vector<1x8xf32> -> vector<2x8xf32>
    %c0_25 = arith.constant 0 : index
    %c0_26 = arith.constant 0 : index
    %c0_27 = arith.constant 0 : index
    %52 = vector.load %arg6[%c0_25, %c0_26, %c0_27] : memref<1x2x8xf32, #tpu.memory_space<vmem>>, vector<1x2x8xf32>
    %53 = vector.shape_cast %52 : vector<1x2x8xf32> to vector<2x8xf32>
    %54 = vector.shape_cast %51 : vector<2x8xf32> to vector<1x2x8xf32>
    tpu.vector_store %arg6[%c0_25, %c0_26, %c0_27], %54 {strides = array<i32>} : memref<1x2x8xf32, #tpu.memory_space<vmem>>, vector<1x2x8xf32>,
    return
  }
  func.func @transform_0(%arg0: i32) -> (i32, i32, i32, i32) {
    %c0_i32 = arith.constant 0 : i32
    %c0_i32_0 = arith.constant 0 : i32
    %c0_i32_1 = arith.constant 0 : i32
    %c0_i32_2 = arith.constant 0 : i32
    return %arg0, %c0_i32, %c0_i32_0, %c0_i32_1 : i32, i32, i32, i32
  }
  func.func @transform_1(%arg0: i32) -> (i32, i32) {
    %c0_i32 = arith.constant 0 : i32
    %c0_i32_0 = arith.constant 0 : i32
    %c0_i32_1 = arith.constant 0 : i32
    return %c0_i32, %c0_i32_0 : i32, i32
  }
  func.func @transform_2(%arg0: i32) -> (i32, i32) {
    %c0_i32 = arith.constant 0 : i32
    %c0_i32_0 = arith.constant 0 : i32
    %c0_i32_1 = arith.constant 0 : i32
    return %c0_i32, %c0_i32_0 : i32, i32
  }
  func.func @transform_3(%arg0: i32) -> (i32, i32, i32) {
    %c0_i32 = arith.constant 0 : i32
    %c0_i32_0 = arith.constant 0 : i32
    %c0_i32_1 = arith.constant 0 : i32
    %c0_i32_2 = arith.constant 0 : i32
    return %c0_i32, %c0_i32_0, %c0_i32_1 : i32, i32, i32
  }
  func.func @transform_4(%arg0: i32) -> (i32, i32, i32, i32) {
    %c0_i32 = arith.constant 0 : i32
    %c0_i32_0 = arith.constant 0 : i32
    %c0_i32_1 = arith.constant 0 : i32
    %c0_i32_2 = arith.constant 0 : i32
    return %arg0, %c0_i32, %c0_i32_0, %c0_i32_1 : i32, i32, i32, i32
  }
  func.func @transform_5(%arg0: i32) -> (i32, i32, i32) {
    %c0_i32 = arith.constant 0 : i32
    %c0_i32_0 = arith.constant 0 : i32
    %c0_i32_1 = arith.constant 0 : i32
    return %arg0, %c0_i32, %c0_i32_0 : i32, i32, i32
  }
}

module attributes {stable_mosaic.version = 11 : i64} {
  func.func @kern(%arg0: i32, %arg1: memref<512x8xbf16, #tpu.memory_space<vmem>>, %arg2: memref<1x8xf32, #tpu.memory_space<vmem>>, %arg3: memref<1x8xf32, #tpu.memory_space<vmem>>, %arg4: memref<8x4xbf16, #tpu.memory_space<vmem>>, %arg5: memref<512x4xbf16, #tpu.memory_space<vmem>>, %arg6: memref<1x2x4xf32, #tpu.memory_space<vmem>>) attributes {dimension_semantics = [#tpu.dimension_semantics<parallel>], iteration_bounds = array<i64: 1>, scalar_prefetch = 0 : i64, scratch_operands = 0 : i64, tpu.core_type = #tpu.core_type<tc>, window_params = [{transform_indices = @transform_0, window_bounds = array<i64: 512, 8>}, {pipeline_mode = #tpu.pipeline_mode<synchronous>, transform_indices = @transform_1, window_bounds = array<i64: 1, 8>}, {pipeline_mode = #tpu.pipeline_mode<synchronous>, transform_indices = @transform_2, window_bounds = array<i64: 1, 8>}, {pipeline_mode = #tpu.pipeline_mode<synchronous>, transform_indices = @transform_3, window_bounds = array<i64: 8, 4>}, {transform_indices = @transform_4, window_bounds = array<i64: 512, 4>}, {transform_indices = @transform_5, window_bounds = array<i64: 1, 2, 4>}]} {
    %c0 = arith.constant 0 : index
    %c0_0 = arith.constant 0 : index
    %0 = vector.load %arg1[%c0, %c0_0] : memref<512x8xbf16, #tpu.memory_space<vmem>>, vector<512x8xbf16>
    %1 = arith.extf %0 : vector<512x8xbf16> to vector<512x8xf32>
    %c0_1 = arith.constant 0 : index
    %c0_2 = arith.constant 0 : index
    %2 = vector.load %arg2[%c0_1, %c0_2] : memref<1x8xf32, #tpu.memory_space<vmem>>, vector<1x8xf32>
    %3 = vector.broadcast %2 : vector<1x8xf32> to vector<512x8xf32>
    %4 = arith.mulf %1, %3 : vector<512x8xf32>
    %c0_3 = arith.constant 0 : index
    %c0_4 = arith.constant 0 : index
    %5 = vector.load %arg3[%c0_3, %c0_4] : memref<1x8xf32, #tpu.memory_space<vmem>>, vector<1x8xf32>
    %6 = vector.broadcast %5 : vector<1x8xf32> to vector<512x8xf32>
    %7 = arith.addf %4, %6 : vector<512x8xf32>
    %cst = arith.constant 0.000000e+00 : f32
    %8 = vector.broadcast %cst : f32 to vector<512x8xf32>
    %9 = arith.maximumf %7, %8 : vector<512x8xf32>
    %10 = arith.truncf %9 : vector<512x8xf32> to vector<512x8xbf16>
    %c0_5 = arith.constant 0 : index
    %c0_6 = arith.constant 0 : index
    %11 = vector.load %arg4[%c0_5, %c0_6] : memref<8x4xbf16, #tpu.memory_space<vmem>>, vector<8x4xbf16>
    %cst_7 = arith.constant dense<0.000000e+00> : vector<512x4xf32>
    %12 = tpu.matmul %10, %11, %cst_7 {dimension_numbers = #tpu.dot_dimension_numbers<[1], [0], [0], [1], [0, 0, 1, 1], [], []>} : vector<512x8xbf16>, vector<8x4xbf16>, vector<512x4xf32> -> vector<512x4xf32>
    %13 = arith.truncf %12 : vector<512x4xf32> to vector<512x4xbf16>
    %c0_8 = arith.constant 0 : index
    %c0_9 = arith.constant 0 : index
    %14 = vector.load %arg5[%c0_8, %c0_9] : memref<512x4xbf16, #tpu.memory_space<vmem>>, vector<512x4xbf16>
    tpu.vector_store %arg5[%c0_8, %c0_9], %13 {strides = array<i32>} : memref<512x4xbf16, #tpu.memory_space<vmem>>, vector<512x4xbf16>,
    %cst_10 = arith.constant dense<0.000000e+00> : vector<4xf32>
    %15 = vector.multi_reduction <add>, %12, %cst_10 [0] : vector<512x4xf32> to vector<4xf32>
    %16 = vector.shape_cast %15 : vector<4xf32> to vector<1x4xf32>
    %17 = arith.mulf %12, %12 : vector<512x4xf32>
    %cst_11 = arith.constant dense<0.000000e+00> : vector<4xf32>
    %18 = vector.multi_reduction <add>, %17, %cst_11 [0] : vector<512x4xf32> to vector<4xf32>
    %19 = vector.shape_cast %18 : vector<4xf32> to vector<1x4xf32>
    %20 = tpu.concatenate %16, %19 in 0 : vector<1x4xf32>, vector<1x4xf32> -> vector<2x4xf32>
    %c0_12 = arith.constant 0 : index
    %c0_13 = arith.constant 0 : index
    %c0_14 = arith.constant 0 : index
    %21 = vector.load %arg6[%c0_12, %c0_13, %c0_14] : memref<1x2x4xf32, #tpu.memory_space<vmem>>, vector<1x2x4xf32>
    %22 = vector.shape_cast %21 : vector<1x2x4xf32> to vector<2x4xf32>
    %23 = vector.shape_cast %20 : vector<2x4xf32> to vector<1x2x4xf32>
    tpu.vector_store %arg6[%c0_12, %c0_13, %c0_14], %23 {strides = array<i32>} : memref<1x2x4xf32, #tpu.memory_space<vmem>>, vector<1x2x4xf32>,
    return
  }
  func.func @transform_0(%arg0: i32) -> (i32, i32) {
    %c0_i32 = arith.constant 0 : i32
    %c0_i32_0 = arith.constant 0 : i32
    return %arg0, %c0_i32 : i32, i32
  }
  func.func @transform_1(%arg0: i32) -> (i32, i32) {
    %c0_i32 = arith.constant 0 : i32
    %c0_i32_0 = arith.constant 0 : i32
    %c0_i32_1 = arith.constant 0 : i32
    return %c0_i32, %c0_i32_0 : i32, i32
  }
  func.func @transform_2(%arg0: i32) -> (i32, i32) {
    %c0_i32 = arith.constant 0 : i32
    %c0_i32_0 = arith.constant 0 : i32
    %c0_i32_1 = arith.constant 0 : i32
    return %c0_i32, %c0_i32_0 : i32, i32
  }
  func.func @transform_3(%arg0: i32) -> (i32, i32) {
    %c0_i32 = arith.constant 0 : i32
    %c0_i32_0 = arith.constant 0 : i32
    %c0_i32_1 = arith.constant 0 : i32
    return %c0_i32, %c0_i32_0 : i32, i32
  }
  func.func @transform_4(%arg0: i32) -> (i32, i32) {
    %c0_i32 = arith.constant 0 : i32
    %c0_i32_0 = arith.constant 0 : i32
    return %arg0, %c0_i32 : i32, i32
  }
  func.func @transform_5(%arg0: i32) -> (i32, i32, i32) {
    %c0_i32 = arith.constant 0 : i32
    %c0_i32_0 = arith.constant 0 : i32
    %c0_i32_1 = arith.constant 0 : i32
    return %arg0, %c0_i32, %c0_i32_0 : i32, i32, i32
  }
}

module attributes {stable_mosaic.version = 11 : i64} {
  func.func @residual_kernel(%arg0: i32, %arg1: memref<512x4xbf16, #tpu.memory_space<vmem>>, %arg2: memref<1x4xf32, #tpu.memory_space<vmem>>, %arg3: memref<1x4xf32, #tpu.memory_space<vmem>>, %arg4: memref<512x4xf32, #tpu.memory_space<vmem>>, %arg5: memref<512x4xf32, #tpu.memory_space<vmem>>) attributes {dimension_semantics = [#tpu.dimension_semantics<parallel>], iteration_bounds = array<i64: 1>, scalar_prefetch = 0 : i64, scratch_operands = 0 : i64, tpu.core_type = #tpu.core_type<tc>, window_params = [{transform_indices = @transform_0, window_bounds = array<i64: 512, 4>}, {pipeline_mode = #tpu.pipeline_mode<synchronous>, transform_indices = @transform_1, window_bounds = array<i64: 1, 4>}, {pipeline_mode = #tpu.pipeline_mode<synchronous>, transform_indices = @transform_2, window_bounds = array<i64: 1, 4>}, {transform_indices = @transform_3, window_bounds = array<i64: 512, 4>}, {transform_indices = @transform_4, window_bounds = array<i64: 512, 4>}]} {
    %c0 = arith.constant 0 : index
    %c0_0 = arith.constant 0 : index
    %0 = vector.load %arg1[%c0, %c0_0] : memref<512x4xbf16, #tpu.memory_space<vmem>>, vector<512x4xbf16>
    %1 = arith.extf %0 : vector<512x4xbf16> to vector<512x4xf32>
    %c0_1 = arith.constant 0 : index
    %c0_2 = arith.constant 0 : index
    %2 = vector.load %arg2[%c0_1, %c0_2] : memref<1x4xf32, #tpu.memory_space<vmem>>, vector<1x4xf32>
    %3 = vector.broadcast %2 : vector<1x4xf32> to vector<512x4xf32>
    %4 = arith.mulf %1, %3 : vector<512x4xf32>
    %c0_3 = arith.constant 0 : index
    %c0_4 = arith.constant 0 : index
    %5 = vector.load %arg3[%c0_3, %c0_4] : memref<1x4xf32, #tpu.memory_space<vmem>>, vector<1x4xf32>
    %6 = vector.broadcast %5 : vector<1x4xf32> to vector<512x4xf32>
    %7 = arith.addf %4, %6 : vector<512x4xf32>
    %c0_5 = arith.constant 0 : index
    %c0_6 = arith.constant 0 : index
    %8 = vector.load %arg4[%c0_5, %c0_6] : memref<512x4xf32, #tpu.memory_space<vmem>>, vector<512x4xf32>
    %9 = arith.addf %7, %8 : vector<512x4xf32>
    %cst = arith.constant 0.000000e+00 : f32
    %10 = vector.broadcast %cst : f32 to vector<512x4xf32>
    %11 = arith.maximumf %9, %10 : vector<512x4xf32>
    %c0_7 = arith.constant 0 : index
    %c0_8 = arith.constant 0 : index
    %12 = vector.load %arg5[%c0_7, %c0_8] : memref<512x4xf32, #tpu.memory_space<vmem>>, vector<512x4xf32>
    tpu.vector_store %arg5[%c0_7, %c0_8], %11 {strides = array<i32>} : memref<512x4xf32, #tpu.memory_space<vmem>>, vector<512x4xf32>,
    return
  }
  func.func @transform_0(%arg0: i32) -> (i32, i32) {
    %c0_i32 = arith.constant 0 : i32
    %c0_i32_0 = arith.constant 0 : i32
    return %arg0, %c0_i32 : i32, i32
  }
  func.func @transform_1(%arg0: i32) -> (i32, i32) {
    %c0_i32 = arith.constant 0 : i32
    %c0_i32_0 = arith.constant 0 : i32
    %c0_i32_1 = arith.constant 0 : i32
    return %c0_i32, %c0_i32_0 : i32, i32
  }
  func.func @transform_2(%arg0: i32) -> (i32, i32) {
    %c0_i32 = arith.constant 0 : i32
    %c0_i32_0 = arith.constant 0 : i32
    %c0_i32_1 = arith.constant 0 : i32
    return %c0_i32, %c0_i32_0 : i32, i32
  }
  func.func @transform_3(%arg0: i32) -> (i32, i32) {
    %c0_i32 = arith.constant 0 : i32
    %c0_i32_0 = arith.constant 0 : i32
    return %arg0, %c0_i32 : i32, i32
  }
  func.func @transform_4(%arg0: i32) -> (i32, i32) {
    %c0_i32 = arith.constant 0 : i32
    %c0_i32_0 = arith.constant 0 : i32
    return %arg0, %c0_i32 : i32, i32
  }
}

</mosaic_0001>

<bundles_post_ra>
// kernel: bottleneck_identity_forward.4
= control target key start
LH: loop header
LB: loop body
LE: loop exit
PB: predicated region body
PF: predicated region fallthrough
CT: control target
= control target key end

     0   :  { %9 = vsyncpa [#allocation3], 0  ;;  %s2108_s0 = inlined_call_operand.hbm [shape: f32[512,4], index: 0, kind: input, shape index: {}]   ;;  %s2109_s1 = inlined_call_operand.hbm [shape: bf16[4,8], index: 1, kind: input, shape index: {}]   ;;  %s2110_s2 = inlined_call_operand.hbm [shape: bf16[512,8], index: 2, kind: output, shape index: {0}]   ;;  %s2111_s3 = inlined_call_operand.hbm [shape: f32[1,2,8], index: 3, kind: output, shape index: {1}]  }
   0x1   :  { %10 = vsyncpa [#allocation6], 0 }
   0x2   :  { %11 = vsyncpa [#allocation4], 0 }
   0x3   :  { %12 = vsyncpa [#allocation9], 0  ;;  %s1584_s12 = smov [#allocation2]   ;;  %s1488_s16 = scalar_lea.hbm %s2108_s0, 8192 }
   0x4   :  { %s18_s13 = sshll.u32 %s1584_s12, 4  ;;  %p1489_p0 = scmp.ne.s32.totalorder %s2108_s0, %s1488_s16  ;;  %s19_s13 = int_to_ptr.vmem [resolvable:$true] %s18_s13 }
   0x5   :  { %p1492_p1 = scmp.lt.u32.totalorder %s1488_s16, %s2108_s0 }
   0x7   :  { %p1494_p2 = pnand %p1492_p1, %p1489_p0 }
   0x9   :  { %1497 = shalt.err (!%p1494_p2)
}
   0xa   :  { %s1498_s21 = scalar_lea.vmem %s19_s13, 8192  ;;  %p1503_p4 = scmp.lt.s32.totalorder %s19_s13, %s19_s13 }
   0xb   :  { %p1499_p3 = scmp.ne.s32.totalorder %s19_s13, %s1498_s21  ;;  %p1504_p5 = scmp.lt.s32.totalorder %s1498_s21, %s1498_s21 }
   0xd   :  { %p1505_p6 = por %p1504_p5, %p1503_p4 }
   0xf   :  { %p1506_p7 = pnand %p1505_p6, %p1499_p3 }
  0x11   :  { %1509 = shalt.err (!%p1506_p7)
}
  0x12   :  { %s1585_s22 = smov 128   ;;  %s1586_s23 = smov 8  }
  0x13   :  { %24 = dma.hbm_to_vmem [thread:$0]  %s2108_s0, 8192, %s19_s13, [#allocation3], %s1585_s22, %s1585_s22, %s1586_s23  }
  0x14   :  { %s1587_s26 = smov [#allocation5]   ;;  %s1510_s30 = scalar_lea.hbm %s2109_s1, 32 }
  0x15   :  { %s31_s27 = sshll.u32 %s1587_s26, 4  ;;  %p1511_p8 = scmp.ne.s32.totalorder %s2109_s1, %s1510_s30  ;;  %s32_s27 = int_to_ptr.vmem [resolvable:$true] %s31_s27 }
  0x16   :  { %p1514_p9 = scmp.lt.u32.totalorder %s1510_s30, %s2109_s1 }
  0x18   :  { %p1516_p10 = pnand %p1514_p9, %p1511_p8 }
  0x1a   :  { %1519 = shalt.err (!%p1516_p10)
}
  0x1b   :  { %s1520_s8 = scalar_lea.vmem %s32_s27, 32  ;;  %p1525_p12 = scmp.lt.s32.totalorder %s32_s27, %s32_s27 }
  0x1c   :  { %p1521_p11 = scmp.ne.s32.totalorder %s32_s27, %s1520_s8  ;;  %p1526_p13 = scmp.lt.s32.totalorder %s1520_s8, %s1520_s8 }
  0x1e   :  { %p1527_p0 = por %p1526_p13, %p1525_p12 }
  0x20   :  { %p1528_p1 = pnand %p1527_p0, %p1521_p11 }
  0x22   :  { %1531 = shalt.err (!%p1528_p1)
}
  0x23   :  { %34 = dma.hbm_to_vmem [thread:$0]  %s2109_s1, 32, %s32_s27, [#allocation6]  }
  0x24   :  { %1576 = dma.done.wait [#allocation3], 8192  }
  0x25   :  { %1577 = vsyncadd [#allocation3], 4294959104 }
  0x26   :  { %1578 = dma.done.wait [#allocation6], 32  }
  0x27   :  { %1579 = vsyncadd [#allocation6], 4294967264  ;;  %vm236_vm0 = vcmask 1041408   ;;  %v138_v0 = vld [vmem:[#allocation5] sm:$0x3]  ;;  %v43_v2 = vld [vmem:[#allocation2 + $0x8] sm:$0xff] }
  0x28   :  { %v42_v1 = vld [vmem:[#allocation2] sm:$0xff]  ;;  %vm139_vm1 = vcmask 31744   ;;  %1478 = vmatprep.subr.msk.bf16.mxu0 %vm236_vm0, %v138_v0  ;;  %v238_v3 = vsel %vm236_vm0, %v138_v0, 0  ;;  %v44_v5 = vld [vmem:[#allocation2 + $0x10] sm:$0xff]  ;;  %v45_v6 = vld [vmem:[#allocation2 + $0x18] sm:$0xff]  ;;  %1479 = vmatprep.subr.msk.bf16.mxu1 %vm236_vm0, %v138_v0  ;;  %vm785_vm2 = vcmask 60416  }
  0x29   :  { %v106_v4 = vpack.c.bf16 %v43_v2, %v42_v1  ;;  %v46_v7 = vld [vmem:[#allocation2 + $0x20] sm:$0xff]  ;;  %1411 = vmatpush3.bf16.msra.mxu0 %v238_v3  ;;  %v107_v8 = vpack.c.bf16 %v45_v6, %v44_v5  ;;  %v47_v9 = vld [vmem:[#allocation2 + $0x28] sm:$0xff]  ;;  %1477 = vmatpush3.bf16.msra.mxu1 %v238_v3  ;;  %v48_v11 = vld [vmem:[#allocation2 + $0x30] sm:$0xff]  ;;  %vm850_vm3 = vcmask 64512   ;;  %s1588_s1 = smov [#allocation7]  }
  0x2a   :  { %v108_v10 = vpack.c.bf16 %v47_v9, %v46_v7  ;;  %v49_v12 = vld [vmem:[#allocation2 + $0x38] sm:$0xff]  ;;  %v50_v13 = vld [vmem:[#allocation2 + $0x40] sm:$0xff]  ;;  %v51_v14 = vld [vmem:[#allocation2 + $0x48] sm:$0xff]  ;;  %s1190_s10 = sshll.u32 %s1588_s1, 4  ;;  %s1191_s10 = int_to_ptr.vmem [resolvable:$true] %s1190_s10 }
  0x2b   :  { %1412 = vmatprep.mubr.msk.bf16.mxu0 %vm139_vm1, %v106_v4  ;;  %v109_v15 = vpack.c.bf16 %v49_v12, %v48_v11  ;;  %v110_v16 = vpack.c.bf16 %v51_v14, %v50_v13  ;;  %v74_v17 = vld [vmem:[#allocation2 + $0x100] sm:$0xff]  ;;  %v75_v18 = vld [vmem:[#allocation2 + $0x108] sm:$0xff]  ;;  %v76_v19 = vld [vmem:[#allocation2 + $0x110] sm:$0xff]  ;;  %s1532_s11 = scalar_lea.vmem %s1191_s10, 4096  ;;  %p1537_p3 = scmp.lt.s32.totalorder %s1191_s10, %s1191_s10 }
  0x2c   :  { %1413 = vmatmul.mubr.msk.bf16.vlgmr.msra.gmra.mrb[0].mxu0 %vm139_vm1, %v107_v8  ;;  %v122_v20 = vpack.c.bf16 %v75_v18, %v74_v17  ;;  %v77_v21 = vld [vmem:[#allocation2 + $0x118] sm:$0xff]  ;;  %v78_v22 = vld [vmem:[#allocation2 + $0x120] sm:$0xff]  ;;  %v79_v23 = vld [vmem:[#allocation2 + $0x128] sm:$0xff]  ;;  %p1533_p2 = scmp.ne.s32.totalorder %s1191_s10, %s1532_s11  ;;  %p1538_p4 = scmp.lt.s32.totalorder %s1532_s11, %s1532_s11 }
  0x2d   :  { %1416 = vmatprep.mubr.msk.bf16.mxu0 %vm139_vm1, %v108_v10  ;;  %v123_v24 = vpack.c.bf16 %v77_v21, %v76_v19  ;;  %v124_v25 = vpack.c.bf16 %v79_v23, %v78_v22  ;;  %v52_v26 = vld [vmem:[#allocation2 + $0x50] sm:$0xff]  ;;  %v53_v27 = vld [vmem:[#allocation2 + $0x58] sm:$0xff]  ;;  %v54_v28 = vld [vmem:[#allocation2 + $0x60] sm:$0xff] }
  0x2e   :  { %1444 = vmatprep.mubr.msk.bf16.mxu1 %vm139_vm1, %v122_v20  ;;  %v55_v29 = vld [vmem:[#allocation2 + $0x68] sm:$0xff]  ;;  %v80_v30 = vld [vmem:[#allocation2 + $0x130] sm:$0xff]  ;;  %v81_v31 = vld [vmem:[#allocation2 + $0x138] sm:$0xff]  ;;  %v111_v32 = vpack.c.bf16 %v53_v27, %v52_v26  ;;  %p1539_p5 = por %p1538_p4, %p1537_p3 }
  0x2f   :  { %1445 = vmatmul.mubr.msk.bf16.vlgmr.msra.gmra.mrb[0].mxu1 %vm139_vm1, %v123_v24  ;;  %v82_v33 = vld [vmem:[#allocation2 + $0x140] sm:$0xff]  ;;  %v83_v34 = vld [vmem:[#allocation2 + $0x148] sm:$0xff]  ;;  %v112_v35 = vpack.c.bf16 %v55_v29, %v54_v28  ;;  %v125_v36 = vpack.c.bf16 %v81_v31, %v80_v30  ;;  %v56_v38 = vld [vmem:[#allocation2 + $0x70] sm:$0xff] }
  0x30   :  { %1448 = vmatprep.mubr.msk.bf16.mxu1 %vm139_vm1, %v124_v25  ;;  %v126_v37 = vpack.c.bf16 %v83_v34, %v82_v33  ;;  %v57_v39 = vld [vmem:[#allocation2 + $0x78] sm:$0xff]  ;;  %v58_v40 = vld [vmem:[#allocation2 + $0x80] sm:$0xff]  ;;  %v59_v41 = vld [vmem:[#allocation2 + $0x88] sm:$0xff]  ;;  %p1540_p6 = pnand %p1539_p5, %p1533_p2 }
  0x31   :  { %v84_v42 = vld [vmem:[#allocation2 + $0x150] sm:$0xff]  ;;  %v85_v43 = vld [vmem:[#allocation2 + $0x158] sm:$0xff]  ;;  %v113_v44 = vpack.c.bf16 %v57_v39, %v56_v38  ;;  %v86_v45 = vld [vmem:[#allocation2 + $0x160] sm:$0xff]  ;;  %v114_v47 = vpack.c.bf16 %v59_v41, %v58_v40 }
  0x32   :  { %v87_v46 = vld [vmem:[#allocation2 + $0x168] sm:$0xff]  ;;  %v127_v48 = vpack.c.bf16 %v85_v43, %v84_v42  ;;  %v60_v50 = vld [vmem:[#allocation2 + $0x90] sm:$0xff]  ;;  %v61_v51 = vld [vmem:[#allocation2 + $0x98] sm:$0xff] }
  0x33   :  { %v128_v49 = vpack.c.bf16 %v87_v46, %v86_v45  ;;  %v62_v52 = vld [vmem:[#allocation2 + $0xa0] sm:$0xff]  ;;  %v63_v53 = vld [vmem:[#allocation2 + $0xa8] sm:$0xff]  ;;  %v88_v54 = vld [vmem:[#allocation2 + $0x170] sm:$0xff]  ;;  %v115_v56 = vpack.c.bf16 %v61_v51, %v60_v50 }
  0x34   :  { %1417 = vmatmul.mubr.msk.bf16.gmra.mrb[4].mxu0 %vm139_vm1, %v109_v15  ;;  %v89_v55 = vld [vmem:[#allocation2 + $0x178] sm:$0xff]  ;;  %v90_v57 = vld [vmem:[#allocation2 + $0x180] sm:$0xff]  ;;  %v91_v58 = vld [vmem:[#allocation2 + $0x188] sm:$0xff]  ;;  %v116_v59 = vpack.c.bf16 %v63_v53, %v62_v52 }
  0x35   :  { %1420 = vmatprep.mubr.msk.bf16.mxu0 %vm139_vm1, %v110_v16  ;;  %v129_v60 = vpack.c.bf16 %v89_v55, %v88_v54  ;;  %v130_v61 = vpack.c.bf16 %v91_v58, %v90_v57  ;;  %v64_v62 = vld [vmem:[#allocation2 + $0xb0] sm:$0xff]  ;;  %v65_v63 = vld [vmem:[#allocation2 + $0xb8] sm:$0xff]  ;;  %v66_v0 = vld [vmem:[#allocation2 + $0xc0] sm:$0xff] }
  0x36   :  { %v67_v1 = vld [vmem:[#allocation2 + $0xc8] sm:$0xff]  ;;  %v92_v2 = vld [vmem:[#allocation2 + $0x190] sm:$0xff]  ;;  %v93_v3 = vld [vmem:[#allocation2 + $0x198] sm:$0xff]  ;;  %v117_v4 = vpack.c.bf16 %v65_v63, %v64_v62 }
  0x37   :  { %1449 = vmatmul.mubr.msk.bf16.gmra.mrb[4].mxu1 %vm139_vm1, %v125_v36  ;;  %v94_v5 = vld [vmem:[#allocation2 + $0x1a0] sm:$0xff]  ;;  %v95_v6 = vld [vmem:[#allocation2 + $0x1a8] sm:$0xff]  ;;  %v118_v7 = vpack.c.bf16 %v67_v1, %v66_v0  ;;  %v131_v8 = vpack.c.bf16 %v93_v3, %v92_v2  ;;  %v68_v10 = vld [vmem:[#allocation2 + $0xd0] sm:$0xff] }
  0x38   :  { %1452 = vmatprep.mubr.msk.bf16.mxu1 %vm139_vm1, %v126_v37  ;;  %v132_v9 = vpack.c.bf16 %v95_v6, %v94_v5  ;;  %v69_v11 = vld [vmem:[#allocation2 + $0xd8] sm:$0xff]  ;;  %v70_v12 = vld [vmem:[#allocation2 + $0xe0] sm:$0xff]  ;;  %v71_v13 = vld [vmem:[#allocation2 + $0xe8] sm:$0xff] }
  0x39   :  { %v96_v14 = vld [vmem:[#allocation2 + $0x1b0] sm:$0xff]  ;;  %v97_v15 = vld [vmem:[#allocation2 + $0x1b8] sm:$0xff]  ;;  %v119_v16 = vpack.c.bf16 %v69_v11, %v68_v10  ;;  %v98_v17 = vld [vmem:[#allocation2 + $0x1c0] sm:$0xff]  ;;  %v120_v19 = vpack.c.bf16 %v71_v13, %v70_v12 }
  0x3a   :  { %v99_v18 = vld [vmem:[#allocation2 + $0x1c8] sm:$0xff]  ;;  %v133_v20 = vpack.c.bf16 %v97_v15, %v96_v14  ;;  %v72_v22 = vld [vmem:[#allocation2 + $0xf0] sm:$0xff]  ;;  %v73_v23 = vld [vmem:[#allocation2 + $0xf8] sm:$0xff] }
  0x3b   :  { %v134_v21 = vpack.c.bf16 %v99_v18, %v98_v17  ;;  %v100_v24 = vld [vmem:[#allocation2 + $0x1d0] sm:$0xff]  ;;  %v101_v25 = vld [vmem:[#allocation2 + $0x1d8] sm:$0xff]  ;;  %v121_v26 = vpack.c.bf16 %v73_v23, %v72_v22  ;;  %v102_v27 = vld [vmem:[#allocation2 + $0x1e0] sm:$0xff] }
  0x3c   :  { %1421 = vmatmul.mubr.msk.bf16.gmra.mrb[8].mxu0 %vm139_vm1, %v111_v32  ;;  %v103_v28 = vld [vmem:[#allocation2 + $0x1e8] sm:$0xff]  ;;  %v135_v29 = vpack.c.bf16 %v101_v25, %v100_v24  ;;  %v104_v31 = vld [vmem:[#allocation2 + $0x1f0] sm:$0xff]  ;;  %v105_v32 = vld [vmem:[#allocation2 + $0x1f8] sm:$0xff] }
  0x3d   :  { %1424 = vmatprep.mubr.msk.bf16.mxu0 %vm139_vm1, %v112_v35  ;;  %v136_v30 = vpack.c.bf16 %v103_v28, %v102_v27  ;;  %v137_v33 = vpack.c.bf16 %v105_v32, %v104_v31 }
  0x3f   :  { %1453 = vmatmul.mubr.msk.bf16.gmra.mrb[8].mxu1 %vm139_vm1, %v127_v48 }
  0x40   :  { %1456 = vmatprep.mubr.msk.bf16.mxu1 %vm139_vm1, %v128_v49 }
  0x44   :  { %1425 = vmatmul.mubr.msk.bf16.gmra.mrb[12].mxu0 %vm139_vm1, %v113_v44 }
  0x45   :  { %1428 = vmatprep.mubr.msk.bf16.mxu0 %vm139_vm1, %v114_v47 }
  0x47   :  { %1457 = vmatmul.mubr.msk.bf16.gmra.mrb[12].mxu1 %vm139_vm1, %v129_v60 }
  0x48   :  { %1460 = vmatprep.mubr.msk.bf16.mxu1 %vm139_vm1, %v130_v61 }
  0x4c   :  { %1429 = vmatmul.mubr.msk.bf16.gmra.mrb[16].mxu0 %vm139_vm1, %v115_v56 }
  0x4d   :  { %1432 = vmatprep.mubr.msk.bf16.mxu0 %vm139_vm1, %v116_v59 }
  0x4f   :  { %1461 = vmatmul.mubr.msk.bf16.gmra.mrb[16].mxu1 %vm139_vm1, %v131_v8 }
  0x50   :  { %1464 = vmatprep.mubr.msk.bf16.mxu1 %vm139_vm1, %v132_v9 }
  0x54   :  { %1433 = vmatmul.mubr.msk.bf16.gmra.mrb[20].mxu0 %vm139_vm1, %v117_v4 }
  0x55   :  { %1436 = vmatprep.mubr.msk.bf16.mxu0 %vm139_vm1, %v118_v7 }
  0x57   :  { %1465 = vmatmul.mubr.msk.bf16.gmra.mrb[20].mxu1 %vm139_vm1, %v133_v20 }
  0x58   :  { %1468 = vmatprep.mubr.msk.bf16.mxu1 %vm139_vm1, %v134_v21 }
  0x5c   :  { %1437 = vmatmul.mubr.msk.bf16.gmra.mrb[24].mxu0 %vm139_vm1, %v119_v16 }
  0x5d   :  { %1440 = vmatprep.mubr.msk.bf16.mxu0 %vm139_vm1, %v120_v19 }
  0x5f   :  { %1469 = vmatmul.mubr.msk.bf16.gmra.mrb[24].mxu1 %vm139_vm1, %v135_v29 }
  0x60   :  { %1472 = vmatprep.mubr.msk.bf16.mxu1 %vm139_vm1, %v136_v30 }
  0x64   :  { %1441 = vmatmul.mubr.msk.bf16.gmra.mrb[28].mxu0 %vm139_vm1, %v121_v26 }
  0x67   :  { %1473 = vmatmul.mubr.msk.bf16.gmra.mrb[28].mxu1 %vm139_vm1, %v137_v33 }
  0xff   :  { %v1414_v34 = vpop.f32.mrb[0].mxu0 }
 0x100   :  { %v1315_v35 = vpack.c.bf16 %v1414_v34, %v1414_v34  ;;  %v274_v36 = vpop.f32.mrb[1].mxu0  ;;  %v986_v40 = vmul.f32 %v1414_v34, %v1414_v34  ;;  %v854_v49 = vsel %vm850_vm3, %v1414_v34, 0.0 }
 0x101   :  { %v1313_v37 = vpack.c.bf16 %v274_v36, %v274_v36  ;;  %v984_v38 = vmul.f32 %v274_v36, %v274_v36  ;;  %v1415_v39 = vpop.f32.mrb[2].mxu0  ;;  %v851_v43 = vsel %vm850_vm3, %v274_v36, 0.0 }
 0x102   :  { %788 = vst.msk [vmem:[#allocation7 + $0x8] sm:$0xf] %vm785_vm2, %v1315_v35  ;;  %v1316_v41 = vpack.c.bf16 %v1415_v39, %v1415_v39  ;;  %v277_v42 = vpop.f32.mrb[3].mxu0  ;;  %v987_v47 = vmul.f32 %v1415_v39, %v1415_v39  ;;  %v1051_v54 = vsel %vm850_vm3, %v986_v40, 0.0  ;;  %v856_v56 = vsel %vm850_vm3, %v1415_v39, 0.0  ;;  %v1681_v2 = vpop.f32.mrb[0].mxu1 }
 0x103   :  { %786 = vst.msk [vmem:[#allocation7] sm:$0xf] %vm785_vm2, %v1313_v37  ;;  %v1314_v44 = vpack.c.bf16 %v277_v42, %v277_v42  ;;  %v852_v45 = vsel %vm850_vm3, %v277_v42, 0.0  ;;  %v985_v46 = vmul.f32 %v277_v42, %v277_v42  ;;  %v1048_v50 = vsel %vm850_vm3, %v984_v38, 0.0  ;;  %v1684_v6 = vpop.f32.mrb[1].mxu1 }
 0x104   :  { %789 = vst.msk [vmem:[#allocation7 + $0xc] sm:$0xf] %vm785_vm2, %v1316_v41  ;;  %v853_v48 = vadd.f32 %v852_v45, %v851_v43  ;;  %v1053_v57 = vsel %vm850_vm3, %v987_v47, 0.0  ;;  %v1688_v11 = vpop.f32.mrb[2].mxu1  ;;  %v1347_v15 = vpack.c.bf16 %v1681_v2, %v1681_v2  ;;  %v1345_v21 = vpack.c.bf16 %v1684_v6, %v1684_v6 }
 0x105   :  { %787 = vst.msk [vmem:[#allocation7 + $0x4] sm:$0xf] %vm785_vm2, %v1314_v44  ;;  %v1049_v51 = vsel %vm850_vm3, %v985_v46, 0.0  ;;  %v1694_v16 = vpop.f32.mrb[3].mxu1  ;;  %v1348_v25 = vpack.c.bf16 %v1688_v11, %v1688_v11 }
 0x106   :  { %v855_v52 = vadd.f32 %v854_v49, %v853_v48  ;;  %v1050_v53 = vadd.f32 %v1049_v51, %v1048_v50  ;;  %820 = vst.msk [vmem:[#allocation7 + $0x88] sm:$0xf] %vm785_vm2, %v1347_v15  ;;  %818 = vst.msk [vmem:[#allocation7 + $0x80] sm:$0xf] %vm785_vm2, %v1345_v21 }
 0x107   :  { %v1418_v55 = vpop.f32.mrb[4].mxu0  ;;  %821 = vst.msk [vmem:[#allocation7 + $0x8c] sm:$0xf] %vm785_vm2, %v1348_v25 }
 0x108   :  { %v1052_v58 = vadd.f32 %v1051_v54, %v1050_v53  ;;  %v1319_v59 = vpack.c.bf16 %v1418_v55, %v1418_v55  ;;  %v290_v60 = vpop.f32.mrb[5].mxu0  ;;  %v857_v62 = vadd.f32 %v856_v56, %v855_v52  ;;  %v990_v7 = vmul.f32 %v1418_v55, %v1418_v55 }
 0x109   :  { %v1317_v61 = vpack.c.bf16 %v290_v60, %v290_v60  ;;  %v858_v63 = vsel %vm850_vm3, %v290_v60, 0.0  ;;  %v988_v0 = vmul.f32 %v290_v60, %v290_v60  ;;  %v1419_v1 = vpop.f32.mrb[6].mxu0  ;;  %v862_v18 = vsel %vm850_vm3, %v1418_v55, 0.0 }
 0x10a   :  { %792 = vst.msk [vmem:[#allocation7 + $0x18] sm:$0xf] %vm785_vm2, %v1319_v59  ;;  %v1054_v3 = vadd.f32 %v1053_v57, %v1052_v58  ;;  %v1320_v4 = vpack.c.bf16 %v1419_v1, %v1419_v1  ;;  %v293_v5 = vpop.f32.mrb[7].mxu0  ;;  %v859_v8 = vadd.f32 %v858_v63, %v857_v62  ;;  %v991_v19 = vmul.f32 %v1419_v1, %v1419_v1  ;;  %v1709_v35 = vpop.f32.mrb[4].mxu1 }
 0x10b   :  { %790 = vst.msk [vmem:[#allocation7 + $0x10] sm:$0xf] %vm785_vm2, %v1317_v61  ;;  %v1055_v9 = vsel %vm850_vm3, %v988_v0, 0.0  ;;  %v1318_v10 = vpack.c.bf16 %v293_v5, %v293_v5  ;;  %v860_v13 = vsel %vm850_vm3, %v293_v5, 0.0  ;;  %v989_v14 = vmul.f32 %v293_v5, %v293_v5  ;;  %v1713_v40 = vpop.f32.mrb[5].mxu1 }
 0x10c   :  { %v1056_v12 = vadd.f32 %v1055_v9, %v1054_v3  ;;  %793 = vst.msk [vmem:[#allocation7 + $0x1c] sm:$0xf] %vm785_vm2, %v1320_v4  ;;  %v861_v17 = vadd.f32 %v860_v13, %v859_v8  ;;  %v1059_v26 = vsel %vm850_vm3, %v990_v7, 0.0  ;;  %v864_v27 = vsel %vm850_vm3, %v1419_v1, 0.0  ;;  %v1716_v44 = vpop.f32.mrb[6].mxu1 }
 0x10d   :  { %791 = vst.msk [vmem:[#allocation7 + $0x14] sm:$0xf] %vm785_vm2, %v1318_v10  ;;  %v1057_v20 = vsel %vm850_vm3, %v989_v14, 0.0  ;;  %v1061_v36 = vsel %vm850_vm3, %v991_v19, 0.0  ;;  %v1721_v49 = vpop.f32.mrb[7].mxu1  ;;  %v1346_v55 = vpack.c.bf16 %v1694_v16, %v1694_v16  ;;  %v1351_v59 = vpack.c.bf16 %v1709_v35, %v1709_v35 }
 0x10e   :  { %v863_v22 = vadd.f32 %v862_v18, %v861_v17  ;;  %v1058_v23 = vadd.f32 %v1057_v20, %v1056_v12 }
 0x10f   :  { %v1422_v24 = vpop.f32.mrb[8].mxu0  ;;  %819 = vst.msk [vmem:[#allocation7 + $0x84] sm:$0xf] %vm785_vm2, %v1346_v55  ;;  %824 = vst.msk [vmem:[#allocation7 + $0x98] sm:$0xf] %vm785_vm2, %v1351_v59 }
 0x110   :  { %v1323_v28 = vpack.c.bf16 %v1422_v24, %v1422_v24  ;;  %v306_v29 = vpop.f32.mrb[9].mxu0  ;;  %v1060_v30 = vadd.f32 %v1059_v26, %v1058_v23  ;;  %v865_v32 = vadd.f32 %v864_v27, %v863_v22  ;;  %v994_v45 = vmul.f32 %v1422_v24, %v1422_v24 }
 0x111   :  { %v1321_v31 = vpack.c.bf16 %v306_v29, %v306_v29  ;;  %v866_v33 = vsel %vm850_vm3, %v306_v29, 0.0  ;;  %v1423_v34 = vpop.f32.mrb[10].mxu0  ;;  %v992_v37 = vmul.f32 %v306_v29, %v306_v29  ;;  %v870_v52 = vsel %vm850_vm3, %v1422_v24, 0.0 }
 0x112   :  { %796 = vst.msk [vmem:[#allocation7 + $0x28] sm:$0xf] %vm785_vm2, %v1323_v28  ;;  %v1324_v38 = vpack.c.bf16 %v1423_v34, %v1423_v34  ;;  %v309_v39 = vpop.f32.mrb[11].mxu0  ;;  %v867_v41 = vadd.f32 %v866_v33, %v865_v32  ;;  %v1062_v42 = vadd.f32 %v1061_v36, %v1060_v30  ;;  %v995_v53 = vmul.f32 %v1423_v34, %v1423_v34  ;;  %v1735_v7 = vpop.f32.mrb[8].mxu1 }
 0x113   :  { %794 = vst.msk [vmem:[#allocation7 + $0x20] sm:$0xf] %vm785_vm2, %v1321_v31  ;;  %v1322_v43 = vpack.c.bf16 %v309_v39, %v309_v39  ;;  %v1063_v46 = vsel %vm850_vm3, %v992_v37, 0.0  ;;  %v868_v47 = vsel %vm850_vm3, %v309_v39, 0.0  ;;  %v993_v48 = vmul.f32 %v309_v39, %v309_v39  ;;  %v1739_v13 = vpop.f32.mrb[9].mxu1 }
 0x114   :  { %797 = vst.msk [vmem:[#allocation7 + $0x2c] sm:$0xf] %vm785_vm2, %v1324_v38  ;;  %v1064_v50 = vadd.f32 %v1063_v46, %v1062_v42  ;;  %v869_v51 = vadd.f32 %v868_v47, %v867_v41  ;;  %v1067_v60 = vsel %vm850_vm3, %v994_v45, 0.0  ;;  %v872_v61 = vsel %vm850_vm3, %v1423_v34, 0.0  ;;  %v1742_v18 = vpop.f32.mrb[10].mxu1 }
 0x115   :  { %795 = vst.msk [vmem:[#allocation7 + $0x24] sm:$0xf] %vm785_vm2, %v1322_v43  ;;  %v1065_v54 = vsel %vm850_vm3, %v993_v48, 0.0  ;;  %v1069_v8 = vsel %vm850_vm3, %v995_v53, 0.0  ;;  %v1747_v23 = vpop.f32.mrb[11].mxu1  ;;  %v1349_v29 = vpack.c.bf16 %v1713_v40, %v1713_v40  ;;  %v1352_v33 = vpack.c.bf16 %v1716_v44, %v1716_v44 }
 0x116   :  { %v871_v56 = vadd.f32 %v870_v52, %v869_v51  ;;  %v1066_v57 = vadd.f32 %v1065_v54, %v1064_v50 }
 0x117   :  { %v1426_v58 = vpop.f32.mrb[12].mxu0  ;;  %822 = vst.msk [vmem:[#allocation7 + $0x90] sm:$0xf] %vm785_vm2, %v1349_v29  ;;  %825 = vst.msk [vmem:[#allocation7 + $0x9c] sm:$0xf] %vm785_vm2, %v1352_v33 }
 0x118   :  { %v1327_v62 = vpack.c.bf16 %v1426_v58, %v1426_v58  ;;  %v322_v63 = vpop.f32.mrb[13].mxu0  ;;  %v1068_v0 = vadd.f32 %v1067_v60, %v1066_v57  ;;  %v873_v3 = vadd.f32 %v872_v61, %v871_v56  ;;  %v998_v19 = vmul.f32 %v1426_v58, %v1426_v58 }
 0x119   :  { %v1325_v1 = vpack.c.bf16 %v322_v63, %v322_v63  ;;  %v874_v4 = vsel %vm850_vm3, %v322_v63, 0.0  ;;  %v1427_v5 = vpop.f32.mrb[14].mxu0  ;;  %v996_v9 = vmul.f32 %v322_v63, %v322_v63  ;;  %v878_v26 = vsel %vm850_vm3, %v1426_v58, 0.0 }
 0x11a   :  { %800 = vst.msk [vmem:[#allocation7 + $0x38] sm:$0xf] %vm785_vm2, %v1327_v62  ;;  %v1328_v10 = vpack.c.bf16 %v1427_v5, %v1427_v5  ;;  %v325_v12 = vpop.f32.mrb[15].mxu0  ;;  %v875_v14 = vadd.f32 %v874_v4, %v873_v3  ;;  %v1070_v15 = vadd.f32 %v1069_v8, %v1068_v0  ;;  %v999_v27 = vmul.f32 %v1427_v5, %v1427_v5  ;;  %v1761_v46 = vpop.f32.mrb[12].mxu1 }
 0x11b   :  { %798 = vst.msk [vmem:[#allocation7 + $0x30] sm:$0xf] %vm785_vm2, %v1325_v1  ;;  %v1326_v17 = vpack.c.bf16 %v325_v12, %v325_v12  ;;  %v1071_v20 = vsel %vm850_vm3, %v996_v9, 0.0  ;;  %v876_v21 = vsel %vm850_vm3, %v325_v12, 0.0  ;;  %v997_v22 = vmul.f32 %v325_v12, %v325_v12  ;;  %v1765_v52 = vpop.f32.mrb[13].mxu1 }
 0x11c   :  { %801 = vst.msk [vmem:[#allocation7 + $0x3c] sm:$0xf] %vm785_vm2, %v1328_v10  ;;  %v1072_v24 = vadd.f32 %v1071_v20, %v1070_v15  ;;  %v877_v25 = vadd.f32 %v876_v21, %v875_v14  ;;  %v1075_v34 = vsel %vm850_vm3, %v998_v19, 0.0  ;;  %v880_v36 = vsel %vm850_vm3, %v1427_v5, 0.0  ;;  %v1768_v56 = vpop.f32.mrb[14].mxu1 }
 0x11d   :  { %799 = vst.msk [vmem:[#allocation7 + $0x34] sm:$0xf] %vm785_vm2, %v1326_v17  ;;  %v1073_v28 = vsel %vm850_vm3, %v997_v22, 0.0  ;;  %v1077_v47 = vsel %vm850_vm3, %v999_v27, 0.0  ;;  %v1773_v61 = vpop.f32.mrb[15].mxu1  ;;  %v1350_v4 = vpack.c.bf16 %v1721_v49, %v1721_v49  ;;  %v1355_v10 = vpack.c.bf16 %v1735_v7, %v1735_v7 }
 0x11e   :  { %v879_v30 = vadd.f32 %v878_v26, %v877_v25  ;;  %v1074_v31 = vadd.f32 %v1073_v28, %v1072_v24 }
 0x11f   :  { %v1430_v32 = vpop.f32.mrb[16].mxu0  ;;  %823 = vst.msk [vmem:[#allocation7 + $0x94] sm:$0xf] %vm785_vm2, %v1350_v4  ;;  %828 = vst.msk [vmem:[#allocation7 + $0xa8] sm:$0xf] %vm785_vm2, %v1355_v10 }
 0x120   :  { %v1331_v37 = vpack.c.bf16 %v1430_v32, %v1430_v32  ;;  %v338_v38 = vpop.f32.mrb[17].mxu0  ;;  %v1076_v39 = vadd.f32 %v1075_v34, %v1074_v31  ;;  %v881_v42 = vadd.f32 %v880_v36, %v879_v30  ;;  %v1002_v57 = vmul.f32 %v1430_v32, %v1430_v32 }
 0x121   :  { %v1329_v41 = vpack.c.bf16 %v338_v38, %v338_v38  ;;  %v882_v43 = vsel %vm850_vm3, %v338_v38, 0.0  ;;  %v1431_v45 = vpop.f32.mrb[18].mxu0  ;;  %v1000_v48 = vmul.f32 %v338_v38, %v338_v38  ;;  %v886_v0 = vsel %vm850_vm3, %v1430_v32, 0.0 }
 0x122   :  { %804 = vst.msk [vmem:[#allocation7 + $0x48] sm:$0xf] %vm785_vm2, %v1331_v37  ;;  %v1332_v50 = vpack.c.bf16 %v1431_v45, %v1431_v45  ;;  %v341_v51 = vpop.f32.mrb[19].mxu0  ;;  %v883_v53 = vadd.f32 %v882_v43, %v881_v42  ;;  %v1078_v54 = vadd.f32 %v1077_v47, %v1076_v39  ;;  %v1003_v1 = vmul.f32 %v1431_v45, %v1431_v45  ;;  %v1787_v25 = vpop.f32.mrb[16].mxu1 }
 0x123   :  { %802 = vst.msk [vmem:[#allocation7 + $0x40] sm:$0xf] %vm785_vm2, %v1329_v41  ;;  %v1330_v55 = vpack.c.bf16 %v341_v51, %v341_v51  ;;  %v1079_v58 = vsel %vm850_vm3, %v1000_v48, 0.0  ;;  %v884_v59 = vsel %vm850_vm3, %v341_v51, 0.0  ;;  %v1001_v60 = vmul.f32 %v341_v51, %v341_v51  ;;  %v1791_v30 = vpop.f32.mrb[17].mxu1 }
 0x124   :  { %805 = vst.msk [vmem:[#allocation7 + $0x4c] sm:$0xf] %vm785_vm2, %v1332_v50  ;;  %v1080_v62 = vadd.f32 %v1079_v58, %v1078_v54  ;;  %v885_v63 = vadd.f32 %v884_v59, %v883_v53  ;;  %v1083_v12 = vsel %vm850_vm3, %v1002_v57, 0.0  ;;  %v888_v14 = vsel %vm850_vm3, %v1431_v45, 0.0  ;;  %v1794_v34 = vpop.f32.mrb[18].mxu1 }
 0x125   :  { %803 = vst.msk [vmem:[#allocation7 + $0x44] sm:$0xf] %vm785_vm2, %v1330_v55  ;;  %v1081_v3 = vsel %vm850_vm3, %v1001_v60, 0.0  ;;  %v1085_v26 = vsel %vm850_vm3, %v1003_v1, 0.0  ;;  %v1799_v41 = vpop.f32.mrb[19].mxu1  ;;  %v1353_v50 = vpack.c.bf16 %v1739_v13, %v1739_v13  ;;  %v1356_v55 = vpack.c.bf16 %v1742_v18, %v1742_v18 }
 0x126   :  { %v887_v5 = vadd.f32 %v886_v0, %v885_v63  ;;  %v1082_v8 = vadd.f32 %v1081_v3, %v1080_v62 }
 0x127   :  { %v1434_v9 = vpop.f32.mrb[20].mxu0  ;;  %826 = vst.msk [vmem:[#allocation7 + $0xa0] sm:$0xf] %vm785_vm2, %v1353_v50  ;;  %829 = vst.msk [vmem:[#allocation7 + $0xac] sm:$0xf] %vm785_vm2, %v1356_v55 }
 0x128   :  { %v1335_v15 = vpack.c.bf16 %v1434_v9, %v1434_v9  ;;  %v354_v17 = vpop.f32.mrb[21].mxu0  ;;  %v1084_v19 = vadd.f32 %v1083_v12, %v1082_v8  ;;  %v889_v21 = vadd.f32 %v888_v14, %v887_v5  ;;  %v1006_v36 = vmul.f32 %v1434_v9, %v1434_v9 }
 0x129   :  { %v1333_v20 = vpack.c.bf16 %v354_v17, %v354_v17  ;;  %v890_v22 = vsel %vm850_vm3, %v354_v17, 0.0  ;;  %v1435_v24 = vpop.f32.mrb[22].mxu0  ;;  %v1004_v27 = vmul.f32 %v354_v17, %v354_v17  ;;  %v894_v45 = vsel %vm850_vm3, %v1434_v9, 0.0 }
 0x12a   :  { %808 = vst.msk [vmem:[#allocation7 + $0x58] sm:$0xf] %vm785_vm2, %v1335_v15  ;;  %v1336_v28 = vpack.c.bf16 %v1435_v24, %v1435_v24  ;;  %v357_v29 = vpop.f32.mrb[23].mxu0  ;;  %v891_v31 = vadd.f32 %v890_v22, %v889_v21  ;;  %v1086_v32 = vadd.f32 %v1085_v26, %v1084_v19  ;;  %v1007_v47 = vmul.f32 %v1435_v24, %v1435_v24  ;;  %v1813_v4 = vpop.f32.mrb[20].mxu1 }
 0x12b   :  { %806 = vst.msk [vmem:[#allocation7 + $0x50] sm:$0xf] %vm785_vm2, %v1333_v20  ;;  %v1334_v33 = vpack.c.bf16 %v357_v29, %v357_v29  ;;  %v1087_v37 = vsel %vm850_vm3, %v1004_v27, 0.0  ;;  %v892_v38 = vsel %vm850_vm3, %v357_v29, 0.0  ;;  %v1005_v39 = vmul.f32 %v357_v29, %v357_v29  ;;  %v1817_v12 = vpop.f32.mrb[21].mxu1 }
 0x12c   :  { %809 = vst.msk [vmem:[#allocation7 + $0x5c] sm:$0xf] %vm785_vm2, %v1336_v28  ;;  %v1088_v42 = vadd.f32 %v1087_v37, %v1086_v32  ;;  %v893_v43 = vadd.f32 %v892_v38, %v891_v31  ;;  %v1091_v57 = vsel %vm850_vm3, %v1006_v36, 0.0  ;;  %v896_v58 = vsel %vm850_vm3, %v1435_v24, 0.0  ;;  %v1820_v19 = vpop.f32.mrb[22].mxu1 }
 0x12d   :  { %807 = vst.msk [vmem:[#allocation7 + $0x54] sm:$0xf] %vm785_vm2, %v1334_v33  ;;  %v1089_v48 = vsel %vm850_vm3, %v1005_v39, 0.0  ;;  %v1093_v5 = vsel %vm850_vm3, %v1007_v47, 0.0  ;;  %v1825_v26 = vpop.f32.mrb[23].mxu1  ;;  %v1354_v33 = vpack.c.bf16 %v1747_v23, %v1747_v23  ;;  %v1359_v39 = vpack.c.bf16 %v1761_v46, %v1761_v46 }
 0x12e   :  { %v895_v51 = vadd.f32 %v894_v45, %v893_v43  ;;  %v1090_v53 = vadd.f32 %v1089_v48, %v1088_v42 }
 0x12f   :  { %v1438_v54 = vpop.f32.mrb[24].mxu0  ;;  %827 = vst.msk [vmem:[#allocation7 + $0xa4] sm:$0xf] %vm785_vm2, %v1354_v33  ;;  %832 = vst.msk [vmem:[#allocation7 + $0xb8] sm:$0xf] %vm785_vm2, %v1359_v39 }
 0x130   :  { %v1339_v59 = vpack.c.bf16 %v1438_v54, %v1438_v54  ;;  %v370_v60 = vpop.f32.mrb[25].mxu0  ;;  %v1092_v62 = vadd.f32 %v1091_v57, %v1090_v53  ;;  %v897_v0 = vadd.f32 %v896_v58, %v895_v51  ;;  %v1010_v20 = vmul.f32 %v1438_v54, %v1438_v54 }
 0x131   :  { %v1337_v63 = vpack.c.bf16 %v370_v60, %v370_v60  ;;  %v898_v1 = vsel %vm850_vm3, %v370_v60, 0.0  ;;  %v1439_v3 = vpop.f32.mrb[26].mxu0  ;;  %v1008_v8 = vmul.f32 %v370_v60, %v370_v60  ;;  %v902_v29 = vsel %vm850_vm3, %v1438_v54, 0.0 }
 0x132   :  { %812 = vst.msk [vmem:[#allocation7 + $0x68] sm:$0xf] %vm785_vm2, %v1339_v59  ;;  %v1340_v9 = vpack.c.bf16 %v1439_v3, %v1439_v3  ;;  %v373_v10 = vpop.f32.mrb[27].mxu0  ;;  %v899_v14 = vadd.f32 %v898_v1, %v897_v0  ;;  %v1094_v15 = vadd.f32 %v1093_v5, %v1092_v62  ;;  %v1011_v31 = vmul.f32 %v1439_v3, %v1439_v3  ;;  %v1839_v55 = vpop.f32.mrb[24].mxu1 }
 0x133   :  { %810 = vst.msk [vmem:[#allocation7 + $0x60] sm:$0xf] %vm785_vm2, %v1337_v63  ;;  %v1338_v17 = vpack.c.bf16 %v373_v10, %v373_v10  ;;  %v1095_v21 = vsel %vm850_vm3, %v1008_v8, 0.0  ;;  %v900_v22 = vsel %vm850_vm3, %v373_v10, 0.0  ;;  %v1009_v24 = vmul.f32 %v373_v10, %v373_v10  ;;  %v1843_v62 = vpop.f32.mrb[25].mxu1 }
 0x134   :  { %813 = vst.msk [vmem:[#allocation7 + $0x6c] sm:$0xf] %vm785_vm2, %v1340_v9  ;;  %v1096_v27 = vadd.f32 %v1095_v21, %v1094_v15  ;;  %v901_v28 = vadd.f32 %v900_v22, %v899_v14  ;;  %v1099_v42 = vsel %vm850_vm3, %v1010_v20, 0.0  ;;  %v904_v43 = vsel %vm850_vm3, %v1439_v3, 0.0  ;;  %v1846_v3 = vpop.f32.mrb[26].mxu1 }
 0x135   :  { %811 = vst.msk [vmem:[#allocation7 + $0x64] sm:$0xf] %vm785_vm2, %v1338_v17  ;;  %v1097_v32 = vsel %vm850_vm3, %v1009_v24, 0.0  ;;  %v1101_v57 = vsel %vm850_vm3, %v1011_v31, 0.0  ;;  %v1851_v14 = vpop.f32.mrb[27].mxu1  ;;  %v1016_v20 = vmul.f32 %v1684_v6, %v1684_v6  ;;  %v1360_v31 = vpack.c.bf16 %v1768_v56, %v1768_v56 }
 0x136   :  { %v903_v36 = vadd.f32 %v902_v29, %v901_v28  ;;  %v1098_v37 = vadd.f32 %v1097_v32, %v1096_v27  ;;  %v1357_v27 = vpack.c.bf16 %v1765_v52, %v1765_v52 }
 0x137   :  { %v1442_v38 = vpop.f32.mrb[28].mxu0  ;;  %833 = vst.msk [vmem:[#allocation7 + $0xbc] sm:$0xf] %vm785_vm2, %v1360_v31  ;;  %v1021_v31 = vmul.f32 %v1721_v49, %v1721_v49 }
 0x138   :  { %v1343_v45 = vpack.c.bf16 %v1442_v38, %v1442_v38  ;;  %v386_v47 = vpop.f32.mrb[29].mxu0  ;;  %v1100_v48 = vadd.f32 %v1099_v42, %v1098_v37  ;;  %v905_v51 = vadd.f32 %v904_v43, %v903_v36  ;;  %v1014_v5 = vmul.f32 %v1442_v38, %v1442_v38  ;;  %830 = vst.msk [vmem:[#allocation7 + $0xb0] sm:$0xf] %vm785_vm2, %v1357_v27 }
 0x139   :  { %v1341_v50 = vpack.c.bf16 %v386_v47, %v386_v47  ;;  %v906_v53 = vsel %vm850_vm3, %v386_v47, 0.0  ;;  %v1443_v54 = vpop.f32.mrb[30].mxu0  ;;  %v1012_v58 = vmul.f32 %v386_v47, %v386_v47  ;;  %v910_v21 = vsel %vm850_vm3, %v1442_v38, 0.0 }
 0x13a   :  { %816 = vst.msk [vmem:[#allocation7 + $0x78] sm:$0xf] %vm785_vm2, %v1343_v45  ;;  %v1344_v59 = vpack.c.bf16 %v1443_v54, %v1443_v54  ;;  %v389_v60 = vpop.f32.mrb[31].mxu0  ;;  %v907_v63 = vadd.f32 %v906_v53, %v905_v51  ;;  %v1102_v0 = vadd.f32 %v1101_v57, %v1100_v48  ;;  %v1015_v22 = vmul.f32 %v1443_v54, %v1443_v54  ;;  %v1870_v42 = vpop.f32.mrb[28].mxu1 }
 0x13b   :  { %814 = vst.msk [vmem:[#allocation7 + $0x70] sm:$0xf] %vm785_vm2, %v1341_v50  ;;  %v1342_v1 = vpack.c.bf16 %v389_v60, %v389_v60  ;;  %v1103_v8 = vsel %vm850_vm3, %v1012_v58, 0.0  ;;  %v908_v9 = vsel %vm850_vm3, %v389_v60, 0.0  ;;  %v1013_v10 = vmul.f32 %v389_v60, %v389_v60  ;;  %v1879_v48 = vpop.f32.mrb[29].mxu1 }
 0x13c   :  { %817 = vst.msk [vmem:[#allocation7 + $0x7c] sm:$0xf] %vm785_vm2, %v1344_v59  ;;  %v1104_v15 = vadd.f32 %v1103_v8, %v1102_v0  ;;  %v909_v17 = vadd.f32 %v908_v9, %v907_v63  ;;  %v1107_v32 = vsel %vm850_vm3, %v1014_v5, 0.0  ;;  %v912_v33 = vsel %vm850_vm3, %v1443_v54, 0.0  ;;  %v1883_v54 = vpop.f32.mrb[30].mxu1 }
 0x13d   :  { %815 = vst.msk [vmem:[#allocation7 + $0x74] sm:$0xf] %vm785_vm2, %v1342_v1  ;;  %v1105_v24 = vsel %vm850_vm3, %v1013_v10, 0.0  ;;  %v914_v36 = vsel %vm850_vm3, %v1684_v6, 0.0  ;;  %v1358_v37 = vpack.c.bf16 %v1773_v61, %v1773_v61  ;;  %v1109_v43 = vsel %vm850_vm3, %v1015_v22, 0.0  ;;  %v1892_v60 = vpop.f32.mrb[31].mxu1 }
 0x13e   :  { %v911_v28 = vadd.f32 %v910_v21, %v909_v17  ;;  %v1106_v29 = vadd.f32 %v1105_v24, %v1104_v15  ;;  %v1111_v45 = vsel %vm850_vm3, %v1016_v20, 0.0  ;;  %v1017_v47 = vmul.f32 %v1694_v16, %v1694_v16 }
 0x13f   :  { %831 = vst.msk [vmem:[#allocation7 + $0xb4] sm:$0xf] %vm785_vm2, %v1358_v37  ;;  %v1363_v6 = vpack.c.bf16 %v1787_v25, %v1787_v25  ;;  %v1361_v53 = vpack.c.bf16 %v1791_v30, %v1791_v30  ;;  %v1018_v57 = vmul.f32 %v1681_v2, %v1681_v2  ;;  %v916_v58 = vsel %vm850_vm3, %v1694_v16, 0.0 }
 0x140   :  { %v1108_v38 = vadd.f32 %v1107_v32, %v1106_v29  ;;  %v913_v39 = vadd.f32 %v912_v33, %v911_v28  ;;  %v1364_v59 = vpack.c.bf16 %v1794_v34, %v1794_v34  ;;  %v918_v63 = vsel %vm850_vm3, %v1681_v2, 0.0 }
 0x141   :  { %836 = vst.msk [vmem:[#allocation7 + $0xc8] sm:$0xf] %vm785_vm2, %v1363_v6  ;;  %834 = vst.msk [vmem:[#allocation7 + $0xc0] sm:$0xf] %vm785_vm2, %v1361_v53  ;;  %v1019_v5 = vmul.f32 %v1688_v11, %v1688_v11  ;;  %v1113_v8 = vsel %vm850_vm3, %v1017_v47, 0.0  ;;  %v1020_v16 = vmul.f32 %v1713_v40, %v1713_v40  ;;  %v1362_v9 = vpack.c.bf16 %v1799_v41, %v1799_v41 }
 0x142   :  { %v915_v50 = vadd.f32 %v914_v36, %v913_v39  ;;  %v1110_v51 = vadd.f32 %v1109_v43, %v1108_v38  ;;  %837 = vst.msk [vmem:[#allocation7 + $0xcc] sm:$0xf] %vm785_vm2, %v1364_v59  ;;  %v1367_v2 = vpack.c.bf16 %v1813_v4, %v1813_v4  ;;  %v1115_v17 = vsel %vm850_vm3, %v1018_v57, 0.0 }
 0x143   :  { %v920_v20 = vsel %vm850_vm3, %v1688_v11, 0.0  ;;  %v922_v21 = vsel %vm850_vm3, %v1713_v40, 0.0  ;;  %835 = vst.msk [vmem:[#allocation7 + $0xc4] sm:$0xf] %vm785_vm2, %v1362_v9  ;;  %v1365_v22 = vpack.c.bf16 %v1817_v12, %v1817_v12  ;;  %v1117_v28 = vsel %vm850_vm3, %v1019_v5, 0.0 }
 0x144   :  { %v1112_v0 = vadd.f32 %v1111_v45, %v1110_v51  ;;  %v917_v1 = vadd.f32 %v916_v58, %v915_v50  ;;  %840 = vst.msk [vmem:[#allocation7 + $0xd8] sm:$0xf] %vm785_vm2, %v1367_v2  ;;  %v1119_v29 = vsel %vm850_vm3, %v1020_v16, 0.0  ;;  %v1368_v11 = vpack.c.bf16 %v1820_v19, %v1820_v19 }
 0x145   :  { %838 = vst.msk [vmem:[#allocation7 + $0xd0] sm:$0xf] %vm785_vm2, %v1365_v22  ;;  %v1366_v33 = vpack.c.bf16 %v1825_v26, %v1825_v26  ;;  %v1022_v36 = vmul.f32 %v1709_v35, %v1709_v35  ;;  %v924_v37 = vsel %vm850_vm3, %v1721_v49, 0.0  ;;  %v1371_v38 = vpack.c.bf16 %v1839_v55, %v1839_v55 }
 0x146   :  { %v919_v10 = vadd.f32 %v918_v63, %v917_v1  ;;  %v1114_v15 = vadd.f32 %v1113_v8, %v1112_v0  ;;  %841 = vst.msk [vmem:[#allocation7 + $0xdc] sm:$0xf] %vm785_vm2, %v1368_v11  ;;  %v926_v39 = vsel %vm850_vm3, %v1709_v35, 0.0  ;;  %v1023_v47 = vmul.f32 %v1716_v44, %v1716_v44 }
 0x147   :  { %839 = vst.msk [vmem:[#allocation7 + $0xd4] sm:$0xf] %vm785_vm2, %v1366_v33  ;;  %v1121_v6 = vsel %vm850_vm3, %v1021_v31, 0.0  ;;  %v1024_v49 = vmul.f32 %v1739_v13, %v1739_v13  ;;  %844 = vst.msk [vmem:[#allocation7 + $0xe8] sm:$0xf] %vm785_vm2, %v1371_v38  ;;  %v1369_v50 = vpack.c.bf16 %v1843_v62, %v1843_v62  ;;  %v1372_v35 = vpack.c.bf16 %v1846_v3, %v1846_v3 }
 0x148   :  { %v1116_v24 = vadd.f32 %v1115_v17, %v1114_v15  ;;  %v921_v27 = vadd.f32 %v920_v20, %v919_v10  ;;  %v1123_v57 = vsel %vm850_vm3, %v1022_v36, 0.0  ;;  %v928_v58 = vsel %vm850_vm3, %v1716_v44, 0.0 }
 0x149   :  { %v930_v59 = vsel %vm850_vm3, %v1739_v13, 0.0  ;;  %842 = vst.msk [vmem:[#allocation7 + $0xe0] sm:$0xf] %vm785_vm2, %v1369_v50  ;;  %v1370_v63 = vpack.c.bf16 %v1851_v14, %v1851_v14  ;;  %845 = vst.msk [vmem:[#allocation7 + $0xec] sm:$0xf] %vm785_vm2, %v1372_v35  ;;  %v1125_v5 = vsel %vm850_vm3, %v1023_v47, 0.0  ;;  %v1025_v16 = vmul.f32 %v1747_v23, %v1747_v23 }
 0x14a   :  { %v923_v40 = vadd.f32 %v922_v21, %v921_v27  ;;  %v1118_v32 = vadd.f32 %v1117_v28, %v1116_v24  ;;  %v1127_v8 = vsel %vm850_vm3, %v1024_v49, 0.0  ;;  %v1375_v44 = vpack.c.bf16 %v1870_v42, %v1870_v42 }
 0x14b   :  { %843 = vst.msk [vmem:[#allocation7 + $0xe4] sm:$0xf] %vm785_vm2, %v1370_v63  ;;  %v1373_v10 = vpack.c.bf16 %v1879_v48, %v1879_v48  ;;  %v1026_v15 = vmul.f32 %v1735_v7, %v1735_v7  ;;  %v932_v2 = vsel %vm850_vm3, %v1747_v23, 0.0  ;;  %v1376_v17 = vpack.c.bf16 %v1883_v54, %v1883_v54 }
 0x14c   :  { %v1120_v43 = vadd.f32 %v1119_v29, %v1118_v32  ;;  %v925_v45 = vadd.f32 %v924_v37, %v923_v40  ;;  %848 = vst.msk [vmem:[#allocation7 + $0xf8] sm:$0xf] %vm785_vm2, %v1375_v44  ;;  %v934_v20 = vsel %vm850_vm3, %v1735_v7, 0.0  ;;  %v1027_v24 = vmul.f32 %v1742_v18, %v1742_v18 }
 0x14d   :  { %846 = vst.msk [vmem:[#allocation7 + $0xf0] sm:$0xf] %vm785_vm2, %v1373_v10  ;;  %v1129_v27 = vsel %vm850_vm3, %v1025_v16, 0.0  ;;  %v1028_v23 = vmul.f32 %v1765_v52, %v1765_v52  ;;  %849 = vst.msk [vmem:[#allocation7 + $0xfc] sm:$0xf] %vm785_vm2, %v1376_v17  ;;  %v1374_v28 = vpack.c.bf16 %v1892_v60, %v1892_v60  ;;  %v1131_v31 = vsel %vm850_vm3, %v1026_v15, 0.0 }
 0x14e   :  { %v927_v51 = vadd.f32 %v926_v39, %v925_v45  ;;  %v1122_v53 = vadd.f32 %v1121_v6, %v1120_v43  ;;  %v936_v11 = vsel %vm850_vm3, %v1742_v18, 0.0  ;;  %v938_v40 = vsel %vm850_vm3, %v1765_v52, 0.0 }
 0x14f   :  { %847 = vst.msk [vmem:[#allocation7 + $0xf4] sm:$0xf] %vm785_vm2, %v1374_v28 }
 0x150   :  { %v1124_v0 = vadd.f32 %v1123_v57, %v1122_v53  ;;  %v929_v1 = vadd.f32 %v928_v58, %v927_v51 }
 0x152   :  { %v931_v13 = vadd.f32 %v930_v59, %v929_v1  ;;  %v1126_v9 = vadd.f32 %v1125_v5, %v1124_v0 }
 0x154   :  { %v1128_v21 = vadd.f32 %v1127_v8, %v1126_v9  ;;  %v933_v22 = vadd.f32 %v932_v2, %v931_v13 }
 0x156   :  { %v935_v29 = vadd.f32 %v934_v20, %v933_v22  ;;  %v1130_v7 = vadd.f32 %v1129_v27, %v1128_v21 }
 0x158   :  { %v1132_v32 = vadd.f32 %v1131_v31, %v1130_v7  ;;  %v937_v33 = vadd.f32 %v936_v11, %v935_v29 }
 0x159   :  { %1543 = shalt.err (!%p1540_p6)
}
 0x15a   :  { %s1544_s14 = scalar_lea.hbm %s2110_s2, 4096 }
 0x15b   :  { %p1545_p7 = scmp.ne.s32.totalorder %s2110_s2, %s1544_s14  ;;  %p1548_p8 = scmp.lt.u32.totalorder %s1544_s14, %s2110_s2 }
 0x15d   :  { %p1550_p9 = pnand %p1548_p8, %p1545_p7 }
 0x15f   :  { %1553 = shalt.err (!%p1550_p9)
}
 0x160   :  { %s1589_s19 = smov 64   ;;  %s1590_s20 = smov 4   ;;  %v1133_v18 = vsel %vm850_vm3, %v1027_v24, 0.0  ;;  %v1135_v52 = vsel %vm850_vm3, %v1028_v23, 0.0  ;;  %v1029_v36 = vmul.f32 %v1773_v61, %v1773_v61  ;;  %v939_v37 = vadd.f32 %v938_v40, %v937_v33 }
 0x161   :  { %1196 = dma.vmem_to_hbm [thread:$0]  %s1191_s10, 4096, %s2110_s2, [#allocation4], %s1589_s19, %s1589_s19, %s1590_s20   ;;  %v1134_v38 = vadd.f32 %v1133_v18, %v1132_v32  ;;  %v1030_v39 = vmul.f32 %v1761_v46, %v1761_v46  ;;  %v940_v43 = vsel %vm850_vm3, %v1773_v61, 0.0  ;;  %v942_v6 = vsel %vm850_vm3, %v1761_v46, 0.0 }
 0x162   :  { %v941_v47 = vadd.f32 %v940_v43, %v939_v37  ;;  %v1031_v49 = vmul.f32 %v1768_v56, %v1768_v56  ;;  %v1137_v50 = vsel %vm850_vm3, %v1029_v36, 0.0  ;;  %v1032_v51 = vmul.f32 %v1791_v30, %v1791_v30  ;;  %s1591_s2 = smov [#allocation8]  }
 0x163   :  { %v1136_v45 = vadd.f32 %v1135_v52, %v1134_v38  ;;  %v1139_v57 = vsel %vm850_vm3, %v1030_v39, 0.0  ;;  %v944_v61 = vsel %vm850_vm3, %v1768_v56, 0.0  ;;  %v946_v58 = vsel %vm850_vm3, %v1791_v30, 0.0  ;;  %s1203_s23 = sshll.u32 %s1591_s2, 4  ;;  %s1204_s23 = int_to_ptr.vmem [resolvable:$true] %s1203_s23 }
 0x164   :  { %v943_v53 = vadd.f32 %v942_v6, %v941_v47  ;;  %v1141_v63 = vsel %vm850_vm3, %v1031_v49, 0.0  ;;  %v1143_v0 = vsel %vm850_vm3, %v1032_v51, 0.0  ;;  %v1033_v1 = vmul.f32 %v1799_v41, %v1799_v41  ;;  %s1554_s24 = scalar_lea.vmem %s1204_s23, 32  ;;  %p1559_p11 = scmp.lt.s32.totalorder %s1204_s23, %s1204_s23 }
 0x165   :  { %v1138_v35 = vadd.f32 %v1137_v50, %v1136_v45  ;;  %v1034_v16 = vmul.f32 %v1787_v25, %v1787_v25  ;;  %v948_v56 = vsel %vm850_vm3, %v1799_v41, 0.0  ;;  %v950_v30 = vsel %vm850_vm3, %v1787_v25, 0.0  ;;  %p1555_p10 = scmp.ne.s32.totalorder %s1204_s23, %s1554_s24  ;;  %p1560_p12 = scmp.lt.s32.totalorder %s1554_s24, %s1554_s24 }
 0x166   :  { %v945_v46 = vadd.f32 %v944_v61, %v943_v53  ;;  %v1035_v9 = vmul.f32 %v1794_v34, %v1794_v34  ;;  %v1145_v10 = vsel %vm850_vm3, %v1033_v1, 0.0  ;;  %v1036_v15 = vmul.f32 %v1817_v12, %v1817_v12 }
 0x167   :  { %v1140_v59 = vadd.f32 %v1139_v57, %v1138_v35  ;;  %v1147_v20 = vsel %vm850_vm3, %v1034_v16, 0.0  ;;  %v952_v41 = vsel %vm850_vm3, %v1794_v34, 0.0  ;;  %v954_v21 = vsel %vm850_vm3, %v1817_v12, 0.0  ;;  %p1561_p13 = por %p1560_p12, %p1559_p11 }
 0x168   :  { %v947_v5 = vadd.f32 %v946_v58, %v945_v46  ;;  %v1149_v24 = vsel %vm850_vm3, %v1035_v9, 0.0  ;;  %v1151_v27 = vsel %vm850_vm3, %v1036_v15, 0.0  ;;  %v1037_v23 = vmul.f32 %v1825_v26, %v1825_v26 }
 0x169   :  { %v1142_v8 = vadd.f32 %v1141_v63, %v1140_v59  ;;  %v1038_v7 = vmul.f32 %v1813_v4, %v1813_v4  ;;  %v956_v34 = vsel %vm850_vm3, %v1825_v26, 0.0  ;;  %v958_v12 = vsel %vm850_vm3, %v1813_v4, 0.0  ;;  %p1562_p0 = pnand %p1561_p13, %p1555_p10 }
 0x16a   :  { %v949_v13 = vadd.f32 %v948_v56, %v947_v5  ;;  %v1039_v40 = vmul.f32 %v1820_v19, %v1820_v19  ;;  %v1153_v32 = vsel %vm850_vm3, %v1037_v23, 0.0  ;;  %v1040_v33 = vmul.f32 %v1843_v62, %v1843_v62 }
 0x16b   :  { %v1144_v44 = vadd.f32 %v1143_v0, %v1142_v8  ;;  %v1155_v36 = vsel %vm850_vm3, %v1038_v7, 0.0  ;;  %v960_v26 = vsel %vm850_vm3, %v1820_v19, 0.0  ;;  %v962_v37 = vsel %vm850_vm3, %v1843_v62, 0.0 }
 0x16c   :  { %v951_v2 = vadd.f32 %v950_v30, %v949_v13  ;;  %v1157_v39 = vsel %vm850_vm3, %v1039_v40, 0.0  ;;  %v1159_v43 = vsel %vm850_vm3, %v1040_v33, 0.0  ;;  %v1041_v45 = vmul.f32 %v1851_v14, %v1851_v14 }
 0x16d   :  { %v1146_v17 = vadd.f32 %v1145_v10, %v1144_v44  ;;  %v1042_v49 = vmul.f32 %v1839_v55, %v1839_v55  ;;  %v964_v19 = vsel %vm850_vm3, %v1851_v14, 0.0  ;;  %v966_v62 = vsel %vm850_vm3, %v1839_v55, 0.0 }
 0x16e   :  { %v953_v25 = vadd.f32 %v952_v41, %v951_v2  ;;  %v1043_v53 = vmul.f32 %v1846_v3, %v1846_v3  ;;  %v1161_v35 = vsel %vm850_vm3, %v1041_v45, 0.0  ;;  %v1044_v57 = vmul.f32 %v1879_v48, %v1879_v48 }
 0x16f   :  { %v1148_v22 = vadd.f32 %v1147_v20, %v1146_v17  ;;  %v1163_v59 = vsel %vm850_vm3, %v1042_v49, 0.0  ;;  %v968_v14 = vsel %vm850_vm3, %v1846_v3, 0.0  ;;  %v970_v46 = vsel %vm850_vm3, %v1879_v48, 0.0 }
 0x170   :  { %v955_v28 = vadd.f32 %v954_v21, %v953_v25  ;;  %v1165_v0 = vsel %vm850_vm3, %v1043_v53, 0.0  ;;  %v1167_v1 = vsel %vm850_vm3, %v1044_v57, 0.0  ;;  %v1045_v5 = vmul.f32 %v1892_v60, %v1892_v60 }
 0x171   :  { %v1150_v29 = vadd.f32 %v1149_v24, %v1148_v22  ;;  %v1046_v56 = vmul.f32 %v1870_v42, %v1870_v42  ;;  %v972_v3 = vsel %vm850_vm3, %v1892_v60, 0.0  ;;  %v974_v48 = vsel %vm850_vm3, %v1870_v42, 0.0 }
 0x172   :  { %v957_v11 = vadd.f32 %v956_v34, %v955_v28  ;;  %v1047_v30 = vmul.f32 %v1883_v54, %v1883_v54  ;;  %v1169_v9 = vsel %vm850_vm3, %v1045_v5, 0.0  ;;  %v976_v17 = vsel %vm850_vm3, %v1883_v54, 0.0 }
 0x173   :  { %v1152_v31 = vadd.f32 %v1151_v27, %v1150_v29  ;;  %v1171_v2 = vsel %vm850_vm3, %v1046_v56, 0.0  ;;  %vm1181_vm4 = vcmask 1040384   ;;  %vm1183_vm5 = vcmask 58368  }
 0x174   :  { %v959_v18 = vadd.f32 %v958_v12, %v957_v11  ;;  %v1173_v60 = vsel %vm850_vm3, %v1047_v30, 0.0 }
 0x175   :  { %v1154_v52 = vadd.f32 %v1153_v32, %v1152_v31 }
 0x176   :  { %v961_v4 = vadd.f32 %v960_v26, %v959_v18 }
 0x177   :  { %v1156_v38 = vadd.f32 %v1155_v36, %v1154_v52 }
 0x178   :  { %v963_v47 = vadd.f32 %v962_v37, %v961_v4 }
 0x179   :  { %v1158_v6 = vadd.f32 %v1157_v39, %v1156_v38 }
 0x17a   :  { %v965_v51 = vadd.f32 %v964_v19, %v963_v47 }
 0x17b   :  { %v1160_v50 = vadd.f32 %v1159_v43, %v1158_v6 }
 0x17c   :  { %v967_v61 = vadd.f32 %v966_v62, %v965_v51 }
 0x17d   :  { %v1162_v58 = vadd.f32 %v1161_v35, %v1160_v50 }
 0x17e   :  { %v969_v55 = vadd.f32 %v968_v14, %v967_v61 }
 0x17f   :  { %v1164_v63 = vadd.f32 %v1163_v59, %v1162_v58 }
 0x180   :  { %v971_v8 = vadd.f32 %v970_v46, %v969_v55 }
 0x181   :  { %v1166_v16 = vadd.f32 %v1165_v0, %v1164_v63 }
 0x182   :  { %v973_v13 = vadd.f32 %v972_v3, %v971_v8 }
 0x183   :  { %v1168_v44 = vadd.f32 %v1167_v1, %v1166_v16 }
 0x184   :  { %v975_v10 = vadd.f32 %v974_v48, %v973_v13 }
 0x185   :  { %v1170_v15 = vadd.f32 %v1169_v9, %v1168_v44 }
 0x186   :  { %v977_v20 = vadd.f32 %v976_v17, %v975_v10 }
 0x187   :  { %v1172_v41 = vadd.f32 %v1171_v2, %v1170_v15 }
 0x188   :  { %v978_v21 = vrot.slane %v977_v20, 4 }
 0x189   :  { %v1174_v22 = vadd.f32 %v1173_v60, %v1172_v41 }
 0x18a   :  { %v979_v25 = vadd.f32 %v978_v21, %v977_v20 }
 0x18b   :  { %v1175_v42 = vrot.slane %v1174_v22, 4 }
 0x18c   :  { %v980_v24 = vrot.slane %v979_v25, 2 }
 0x18d   :  { %v1176_v27 = vadd.f32 %v1175_v42, %v1174_v22 }
 0x18e   :  { %v981_v23 = vadd.f32 %v980_v24, %v979_v25 }
 0x18f   :  { %v1177_v28 = vrot.slane %v1176_v27, 2 }
 0x190   :  { %v982_v29 = vrot.slane %v981_v23, 1 }
 0x191   :  { %v1178_v7 = vadd.f32 %v1177_v28, %v1176_v27 }
 0x192   :  { %v983_v31 = vadd.f32 %v982_v29, %v981_v23 }
 0x193   :  { %v1179_v34 = vrot.slane %v1178_v7, 1 }
 0x195   :  { %v1180_v54 = vadd.f32 %v1179_v34, %v1178_v7 }
 0x197   :  { %v1182_v11 = vsel %vm1181_vm4, %v983_v31, %v1180_v54 }
 0x198   :  { %1184 = vst.msk [vmem:[#allocation8] sm:$0x3] %vm1183_vm5, %v1182_v11 }
 0x199   :  { %1565 = shalt.err (!%p1562_p0)
}
 0x19a   :  { %s1566_s27 = scalar_lea.hbm %s2111_s3, 32 }
 0x19b   :  { %p1567_p1 = scmp.ne.s32.totalorder %s2111_s3, %s1566_s27  ;;  %p1570_p2 = scmp.lt.u32.totalorder %s1566_s27, %s2111_s3 }
 0x19d   :  { %p1572_p3 = pnand %p1570_p2, %p1567_p1 }
 0x19f   :  { %1575 = shalt.err (!%p1572_p3)
}
 0x1a0   :  { %1206 = dma.vmem_to_hbm [thread:$0]  %s1204_s23, 32, %s2111_s3, [#allocation9]  }
 0x1a1   :  { %1580 = dma.done.wait [#allocation4], 4096  }
 0x1a2   :  { %1581 = vsyncadd [#allocation4], 4294963200 }
 0x1a3   :  { %1582 = dma.done.wait [#allocation9], 32  }
 0x1a4   :  { %1583 = vsyncadd [#allocation9], 4294967264 }
 0x1a5   :  { %1213 = vsyncpa [#allocation3], 1 }
 0x1a6   :  { %1214 = vsyncpa [#allocation6], 1 }
 0x1a7   :  { %1215 = vsyncpa [#allocation4], 1 }
 0x1a8   :  { %1216 = vsyncpa [#allocation9], 1 }

// kernel: bottleneck_identity_forward.7
= control target key start
LH: loop header
LB: loop body
LE: loop exit
PB: predicated region body
PF: predicated region fallthrough
CT: control target
= control target key end

     0   :  { %9 = vsyncpa [#allocation3], 0  ;;  %s1213_s0 = inlined_call_operand.hbm [shape: bf16[512,4], index: 0, kind: input, shape index: {}]   ;;  %s1214_s1 = inlined_call_operand.hbm [shape: f32[1,4], index: 1, kind: input, shape index: {}]   ;;  %s1215_s2 = inlined_call_operand.hbm [shape: f32[1,4], index: 2, kind: input, shape index: {}]   ;;  %s1216_s3 = inlined_call_operand.hbm [shape: f32[512,4], index: 3, kind: input, shape index: {}]   ;;  %s1217_s4 = inlined_call_operand.hbm [shape: f32[512,4], index: 4, kind: output, shape index: {}]  }
   0x1   :  { %10 = vsyncpa [#allocation6], 0 }
   0x2   :  { %11 = vsyncpa [#allocation9], 0 }
   0x3   :  { %12 = vsyncpa [#allocation4], 0  ;;  %s903_s15 = smov [#allocation5]   ;;  %s904_s17 = smov [#allocation2]  }
   0x4   :  { %s31_s16 = sshll.u32 %s903_s15, 4  ;;  %s18_s18 = sshll.u32 %s904_s17, 4  ;;  %s32_s16 = int_to_ptr.vmem [resolvable:$true] %s31_s16  ;;  %s937_s18 = int_to_ptr.vmem [resolvable:$true] %s18_s18 }
   0x5   :  { %s785_s21 = scalar_lea.hbm %s1214_s1, 16 }
   0x6   :  { %p786_p0 = scmp.ne.s32.totalorder %s1214_s1, %s785_s21  ;;  %p789_p1 = scmp.lt.u32.totalorder %s785_s21, %s1214_s1 }
   0x8   :  { %p791_p2 = pnand %p789_p1, %p786_p0 }
   0xa   :  { %794 = shalt.err (!%p791_p2)
}
   0xb   :  { %s795_s26 = scalar_lea.vmem %s32_s16, 16  ;;  %s799_s27 = scalar_lea.vmem %s32_s16, 32 }
   0xc   :  { %p796_p3 = scmp.ne.s32.totalorder %s32_s16, %s795_s26  ;;  %p800_p4 = scmp.lt.s32.totalorder %s32_s16, %s32_s16 }
   0xd   :  { %p801_p5 = scmp.lt.s32.totalorder %s799_s27, %s795_s26 }
   0xf   :  { %p802_p6 = por %p801_p5, %p800_p4 }
  0x11   :  { %p803_p7 = pnand %p802_p6, %p796_p3 }
  0x13   :  { %806 = shalt.err (!%p803_p7)
}
  0x14   :  { %34 = dma.hbm_to_vmem [thread:$0]  %s1214_s1, 16, %s32_s16, [#allocation6]  }
  0x15   :  { %s807_s6 = scalar_lea.hbm %s1213_s0, 4096 }
  0x16   :  { %p808_p8 = scmp.ne.s32.totalorder %s1213_s0, %s807_s6  ;;  %p811_p9 = scmp.lt.u32.totalorder %s807_s6, %s1213_s0 }
  0x18   :  { %p813_p10 = pnand %p811_p9, %p808_p8 }
  0x1a   :  { %816 = shalt.err (!%p813_p10)
}
  0x1b   :  { %s817_s11 = scalar_lea.vmem %s937_s18, 4096  ;;  %p822_p12 = scmp.lt.s32.totalorder %s937_s18, %s937_s18 }
  0x1c   :  { %p818_p11 = scmp.ne.s32.totalorder %s937_s18, %s817_s11  ;;  %p823_p13 = scmp.lt.s32.totalorder %s817_s11, %s817_s11 }
  0x1e   :  { %p824_p0 = por %p823_p13, %p822_p12 }
  0x20   :  { %p825_p1 = pnand %p824_p0, %p818_p11 }
  0x22   :  { %828 = shalt.err (!%p825_p1)
}
  0x23   :  { %s905_s1 = smov 64   ;;  %s906_s12 = smov 4  }
  0x24   :  { %24 = dma.hbm_to_vmem [thread:$0]  %s1213_s0, 4096, %s937_s18, [#allocation3], %s905_s1, %s905_s1, %s906_s12  }
  0x25   :  { %s907_s15 = smov [#allocation7]   ;;  %s908_s17 = smov [#allocation8]  }
  0x26   :  { %s41_s16 = sshll.u32 %s907_s15, 4  ;;  %s50_s19 = sshll.u32 %s908_s17, 4  ;;  %s42_s16 = int_to_ptr.vmem [resolvable:$true] %s41_s16  ;;  %s968_s19 = int_to_ptr.vmem [resolvable:$true] %s50_s19 }
  0x27   :  { %s829_s22 = scalar_lea.hbm %s1215_s2, 16 }
  0x28   :  { %p830_p2 = scmp.ne.s32.totalorder %s1215_s2, %s829_s22  ;;  %p833_p3 = scmp.lt.u32.totalorder %s829_s22, %s1215_s2 }
  0x2a   :  { %p835_p4 = pnand %p833_p3, %p830_p2 }
  0x2c   :  { %838 = shalt.err (!%p835_p4)
}
  0x2d   :  { %s839_s0 = scalar_lea.vmem %s42_s16, 16  ;;  %s843_s18 = scalar_lea.vmem %s42_s16, 32 }
  0x2e   :  { %p840_p5 = scmp.ne.s32.totalorder %s42_s16, %s839_s0  ;;  %p844_p6 = scmp.lt.s32.totalorder %s42_s16, %s42_s16 }
  0x2f   :  { %p845_p7 = scmp.lt.s32.totalorder %s843_s18, %s839_s0 }
  0x31   :  { %p846_p8 = por %p845_p7, %p844_p6 }
  0x33   :  { %p847_p9 = pnand %p846_p8, %p840_p5 }
  0x35   :  { %850 = shalt.err (!%p847_p9)
}
  0x36   :  { %44 = dma.hbm_to_vmem [thread:$0]  %s1215_s2, 16, %s42_s16, [#allocation6]  }
  0x37   :  { %s851_s5 = scalar_lea.hbm %s1216_s3, 8192 }
  0x38   :  { %p852_p10 = scmp.ne.s32.totalorder %s1216_s3, %s851_s5  ;;  %p855_p11 = scmp.lt.u32.totalorder %s851_s5, %s1216_s3 }
  0x3a   :  { %p857_p12 = pnand %p855_p11, %p852_p10 }
  0x3c   :  { %860 = shalt.err (!%p857_p12)
}
  0x3d   :  { %s861_s10 = scalar_lea.vmem %s968_s19, 8192  ;;  %p866_p0 = scmp.lt.s32.totalorder %s968_s19, %s968_s19 }
  0x3e   :  { %p862_p13 = scmp.ne.s32.totalorder %s968_s19, %s861_s10  ;;  %p867_p1 = scmp.lt.s32.totalorder %s861_s10, %s861_s10 }
  0x40   :  { %p868_p2 = por %p867_p1, %p866_p0 }
  0x42   :  { %p869_p3 = pnand %p868_p2, %p862_p13 }
  0x44   :  { %872 = shalt.err (!%p869_p3)
}
  0x45   :  { %s909_s2 = smov 128   ;;  %s910_s11 = smov 8  }
  0x46   :  { %56 = dma.hbm_to_vmem [thread:$0]  %s1216_s3, 8192, %s968_s19, [#allocation9], %s909_s2, %s909_s2, %s910_s11  }
  0x47   :  { %895 = dma.done.wait [#allocation3], 4096  }
  0x48   :  { %896 = vsyncadd [#allocation3], 4294963200 }
  0x49   :  { %897 = dma.done.wait [#allocation6], 32  }
  0x4a   :  { %898 = vsyncadd [#allocation6], 4294967264 }
  0x4b   :  { %899 = dma.done.wait [#allocation9], 8192  }
  0x4c   :  { %900 = vsyncadd [#allocation9], 4294959104  ;;  %v618_v0 = vld [vmem:[#allocation2] sm:$0xff]   ;;  %v745_v4 = vld [vmem:[#allocation2 + $0x8] sm:$0xff]   ;;  %vm531_vm0 = vcmask 31744   ;;  %s911_s3 = smov [#allocation10]  }
  0x4d   :  { %v1002_v1 = vld [vmem:[#allocation5] ss:$0 sm:$0xff]  ;;  %v619_v2 = vunpack.c.l.bf16 %v618_v0  ;;  %v620_v3 = vunpack.c.h.bf16 %v618_v0  ;;  %v1004_v5 = vld [vmem:[#allocation7] ss:$0 sm:$0xff]  ;;  %v623_v6 = vunpack.c.l.bf16 %v745_v4  ;;  %v624_v7 = vunpack.c.h.bf16 %v745_v4  ;;  %v746_v8 = vld [vmem:[#allocation2 + $0x10] sm:$0xff]   ;;  %s601_s13 = sshll.u32 %s911_s3, 4  ;;  %s602_s13 = int_to_ptr.vmem [resolvable:$true] %s601_s13 }
  0x4e   :  { %v627_v11 = vunpack.c.l.bf16 %v746_v8  ;;  %v628_v12 = vunpack.c.h.bf16 %v746_v8  ;;  %v747_v13 = vld [vmem:[#allocation2 + $0x18] sm:$0xff]   ;;  %v339_v14 = vld [vmem:[#allocation8] sm:$0xff]  ;;  %v340_v15 = vld [vmem:[#allocation8 + $0x8] sm:$0xff]  ;;  %s873_s14 = scalar_lea.vmem %s602_s13, 8192  ;;  %p878_p5 = scmp.lt.s32.totalorder %s602_s13, %s602_s13 }
  0x4f   :  { %v204_v9 = vmul.f32 %v619_v2, %v1002_v1  ;;  %v205_v10 = vmul.f32 %v620_v3, %v1002_v1  ;;  %v206_v16 = vmul.f32 %v623_v6, %v1002_v1  ;;  %v207_v17 = vmul.f32 %v624_v7, %v1002_v1  ;;  %v341_v22 = vld [vmem:[#allocation8 + $0x10] sm:$0xff]  ;;  %v342_v23 = vld [vmem:[#allocation8 + $0x18] sm:$0xff]  ;;  %v343_v28 = vld [vmem:[#allocation8 + $0x20] sm:$0xff]  ;;  %p874_p4 = scmp.ne.s32.totalorder %s602_s13, %s873_s14  ;;  %p879_p6 = scmp.lt.s32.totalorder %s873_s14, %s873_s14 }
  0x50   :  { %v631_v18 = vunpack.c.l.bf16 %v747_v13  ;;  %v632_v19 = vunpack.c.h.bf16 %v747_v13  ;;  %v208_v24 = vmul.f32 %v627_v11, %v1002_v1  ;;  %v209_v25 = vmul.f32 %v628_v12, %v1002_v1  ;;  %v344_v29 = vld [vmem:[#allocation8 + $0x28] sm:$0xff]  ;;  %v345_v36 = vld [vmem:[#allocation8 + $0x30] sm:$0xff]  ;;  %v346_v37 = vld [vmem:[#allocation8 + $0x38] sm:$0xff] }
  0x51   :  { %v275_v20 = vadd.f32 %v1004_v5, %v204_v9  ;;  %v276_v21 = vadd.f32 %v1004_v5, %v205_v10  ;;  %v277_v26 = vadd.f32 %v1004_v5, %v206_v16  ;;  %v278_v27 = vadd.f32 %v1004_v5, %v207_v17  ;;  %v748_v42 = vld [vmem:[#allocation2 + $0x20] sm:$0xff]   ;;  %v749_v47 = vld [vmem:[#allocation2 + $0x28] sm:$0xff]   ;;  %v750_v52 = vld [vmem:[#allocation2 + $0x30] sm:$0xff]   ;;  %p880_p7 = por %p879_p6, %p878_p5 }
  0x52   :  { %v210_v30 = vmul.f32 %v631_v18, %v1002_v1  ;;  %v211_v31 = vmul.f32 %v632_v19, %v1002_v1  ;;  %v279_v34 = vadd.f32 %v1004_v5, %v208_v24  ;;  %v280_v35 = vadd.f32 %v1004_v5, %v209_v25  ;;  %v751_v57 = vld [vmem:[#allocation2 + $0x38] sm:$0xff]   ;;  %v347_v3 = vld [vmem:[#allocation8 + $0x40] sm:$0xff]  ;;  %v348_v4 = vld [vmem:[#allocation8 + $0x48] sm:$0xff] }
  0x53   :  { %v403_v32 = vadd.f32 %v339_v14, %v275_v20  ;;  %v404_v33 = vadd.f32 %v340_v15, %v276_v21  ;;  %v405_v38 = vadd.f32 %v341_v22, %v277_v26  ;;  %v406_v39 = vadd.f32 %v342_v23, %v278_v27  ;;  %v349_v12 = vld [vmem:[#allocation8 + $0x50] sm:$0xff]  ;;  %v350_v13 = vld [vmem:[#allocation8 + $0x58] sm:$0xff]  ;;  %v351_v18 = vld [vmem:[#allocation8 + $0x60] sm:$0xff]  ;;  %p881_p8 = pnand %p880_p7, %p874_p4 }
  0x54   :  { %v281_v40 = vadd.f32 %v1004_v5, %v210_v30  ;;  %v282_v41 = vadd.f32 %v1004_v5, %v211_v31  ;;  %v407_v45 = vadd.f32 %v343_v28, %v279_v34  ;;  %v408_v46 = vadd.f32 %v344_v29, %v280_v35  ;;  %v352_v19 = vld [vmem:[#allocation8 + $0x68] sm:$0xff]  ;;  %v353_v26 = vld [vmem:[#allocation8 + $0x70] sm:$0xff]  ;;  %v354_v27 = vld [vmem:[#allocation8 + $0x78] sm:$0xff] }
  0x55   :  { %v467_v43 = vmax.f32 %v403_v32, 0.0  ;;  %v468_v44 = vmax.f32 %v404_v33, 0.0  ;;  %v469_v48 = vmax.f32 %v405_v38, 0.0  ;;  %v470_v49 = vmax.f32 %v406_v39, 0.0  ;;  %v752_v32 = vld [vmem:[#allocation2 + $0x40] sm:$0xff]  }
  0x56   :  { %v409_v50 = vadd.f32 %v345_v36, %v281_v40  ;;  %v410_v51 = vadd.f32 %v346_v37, %v282_v41  ;;  %v471_v53 = vmax.f32 %v407_v45, 0.0  ;;  %v472_v54 = vmax.f32 %v408_v46, 0.0  ;;  %v753_v37 = vld [vmem:[#allocation2 + $0x48] sm:$0xff]  }
  0x57   :  { %532 = vst.msk [vmem:[#allocation10] sm:$0xff] %vm531_vm0, %v467_v43  ;;  %533 = vst.msk [vmem:[#allocation10 + $0x8] sm:$0xff] %vm531_vm0, %v468_v44  ;;  %v635_v55 = vunpack.c.l.bf16 %v748_v42  ;;  %v636_v56 = vunpack.c.h.bf16 %v748_v42  ;;  %v639_v60 = vunpack.c.l.bf16 %v749_v47  ;;  %v640_v61 = vunpack.c.h.bf16 %v749_v47  ;;  %v754_v42 = vld [vmem:[#allocation2 + $0x50] sm:$0xff]   ;;  %v755_v47 = vld [vmem:[#allocation2 + $0x58] sm:$0xff]  }
  0x58   :  { %534 = vst.msk [vmem:[#allocation10 + $0x10] sm:$0xff] %vm531_vm0, %v469_v48  ;;  %535 = vst.msk [vmem:[#allocation10 + $0x18] sm:$0xff] %vm531_vm0, %v470_v49  ;;  %v473_v58 = vmax.f32 %v409_v50, 0.0  ;;  %v474_v59 = vmax.f32 %v410_v51, 0.0  ;;  %v643_v0 = vunpack.c.l.bf16 %v750_v52  ;;  %v644_v2 = vunpack.c.h.bf16 %v750_v52 }
  0x59   :  { %536 = vst.msk [vmem:[#allocation10 + $0x20] sm:$0xff] %vm531_vm0, %v471_v53  ;;  %537 = vst.msk [vmem:[#allocation10 + $0x28] sm:$0xff] %vm531_vm0, %v472_v54  ;;  %v212_v62 = vmul.f32 %v635_v55, %v1002_v1  ;;  %v213_v63 = vmul.f32 %v636_v56, %v1002_v1  ;;  %v214_v6 = vmul.f32 %v639_v60, %v1002_v1  ;;  %v647_v8 = vunpack.c.l.bf16 %v751_v57  ;;  %v355_v56 = vld [vmem:[#allocation8 + $0x80] sm:$0xff] }
  0x5a   :  { %538 = vst.msk [vmem:[#allocation10 + $0x30] sm:$0xff] %vm531_vm0, %v473_v58  ;;  %539 = vst.msk [vmem:[#allocation10 + $0x38] sm:$0xff] %vm531_vm0, %v474_v59  ;;  %v215_v7 = vmul.f32 %v640_v61, %v1002_v1  ;;  %v648_v9 = vunpack.c.h.bf16 %v751_v57  ;;  %v216_v14 = vmul.f32 %v643_v0, %v1002_v1  ;;  %v217_v15 = vmul.f32 %v644_v2, %v1002_v1  ;;  %v356_v57 = vld [vmem:[#allocation8 + $0x88] sm:$0xff]  ;;  %v357_v0 = vld [vmem:[#allocation8 + $0x90] sm:$0xff] }
  0x5b   :  { %v283_v10 = vadd.f32 %v1004_v5, %v212_v62  ;;  %v284_v11 = vadd.f32 %v1004_v5, %v213_v63  ;;  %v285_v16 = vadd.f32 %v1004_v5, %v214_v6  ;;  %v218_v20 = vmul.f32 %v647_v8, %v1002_v1  ;;  %v358_v2 = vld [vmem:[#allocation8 + $0x98] sm:$0xff]  ;;  %v359_v8 = vld [vmem:[#allocation8 + $0xa0] sm:$0xff] }
  0x5c   :  { %v286_v17 = vadd.f32 %v1004_v5, %v215_v7  ;;  %v219_v21 = vmul.f32 %v648_v9, %v1002_v1  ;;  %v287_v24 = vadd.f32 %v1004_v5, %v216_v14  ;;  %v288_v25 = vadd.f32 %v1004_v5, %v217_v15  ;;  %v360_v9 = vld [vmem:[#allocation8 + $0xa8] sm:$0xff] }
  0x5d   :  { %v411_v22 = vadd.f32 %v347_v3, %v283_v10  ;;  %v412_v23 = vadd.f32 %v348_v4, %v284_v11  ;;  %v413_v28 = vadd.f32 %v349_v12, %v285_v16  ;;  %v289_v30 = vadd.f32 %v1004_v5, %v218_v20  ;;  %v361_v16 = vld [vmem:[#allocation8 + $0xb0] sm:$0xff] }
  0x5e   :  { %v414_v29 = vadd.f32 %v350_v13, %v286_v17  ;;  %v290_v31 = vadd.f32 %v1004_v5, %v219_v21  ;;  %v415_v35 = vadd.f32 %v351_v18, %v287_v24  ;;  %v416_v36 = vadd.f32 %v352_v19, %v288_v25  ;;  %v362_v17 = vld [vmem:[#allocation8 + $0xb8] sm:$0xff] }
  0x5f   :  { %v475_v33 = vmax.f32 %v411_v22, 0.0  ;;  %v476_v34 = vmax.f32 %v412_v23, 0.0  ;;  %v477_v38 = vmax.f32 %v413_v28, 0.0  ;;  %v417_v40 = vadd.f32 %v353_v26, %v289_v30  ;;  %v756_v22 = vld [vmem:[#allocation2 + $0x60] sm:$0xff]  }
  0x60   :  { %v478_v39 = vmax.f32 %v414_v29, 0.0  ;;  %v418_v41 = vadd.f32 %v354_v27, %v290_v31  ;;  %v479_v43 = vmax.f32 %v415_v35, 0.0  ;;  %v480_v44 = vmax.f32 %v416_v36, 0.0  ;;  %v757_v27 = vld [vmem:[#allocation2 + $0x68] sm:$0xff]  }
  0x61   :  { %540 = vst.msk [vmem:[#allocation10 + $0x40] sm:$0xff] %vm531_vm0, %v475_v33  ;;  %541 = vst.msk [vmem:[#allocation10 + $0x48] sm:$0xff] %vm531_vm0, %v476_v34  ;;  %v651_v45 = vunpack.c.l.bf16 %v752_v32  ;;  %v652_v46 = vunpack.c.h.bf16 %v752_v32  ;;  %v481_v48 = vmax.f32 %v417_v40, 0.0  ;;  %v655_v50 = vunpack.c.l.bf16 %v753_v37  ;;  %v758_v32 = vld [vmem:[#allocation2 + $0x70] sm:$0xff]  }
  0x62   :  { %542 = vst.msk [vmem:[#allocation10 + $0x50] sm:$0xff] %vm531_vm0, %v477_v38  ;;  %543 = vst.msk [vmem:[#allocation10 + $0x58] sm:$0xff] %vm531_vm0, %v478_v39  ;;  %v482_v49 = vmax.f32 %v418_v41, 0.0  ;;  %v656_v51 = vunpack.c.h.bf16 %v753_v37  ;;  %v659_v54 = vunpack.c.l.bf16 %v754_v42  ;;  %v660_v55 = vunpack.c.h.bf16 %v754_v42  ;;  %v759_v37 = vld [vmem:[#allocation2 + $0x78] sm:$0xff]  }
  0x63   :  { %544 = vst.msk [vmem:[#allocation10 + $0x60] sm:$0xff] %vm531_vm0, %v479_v43  ;;  %545 = vst.msk [vmem:[#allocation10 + $0x68] sm:$0xff] %vm531_vm0, %v480_v44  ;;  %v220_v52 = vmul.f32 %v651_v45, %v1002_v1  ;;  %v221_v53 = vmul.f32 %v652_v46, %v1002_v1  ;;  %v222_v58 = vmul.f32 %v655_v50, %v1002_v1  ;;  %v663_v60 = vunpack.c.l.bf16 %v755_v47  ;;  %v363_v46 = vld [vmem:[#allocation8 + $0xc0] sm:$0xff] }
  0x64   :  { %546 = vst.msk [vmem:[#allocation10 + $0x70] sm:$0xff] %vm531_vm0, %v481_v48  ;;  %547 = vst.msk [vmem:[#allocation10 + $0x78] sm:$0xff] %vm531_vm0, %v482_v49  ;;  %v223_v59 = vmul.f32 %v656_v51, %v1002_v1  ;;  %v664_v61 = vunpack.c.h.bf16 %v755_v47  ;;  %v224_v3 = vmul.f32 %v659_v54, %v1002_v1  ;;  %v225_v4 = vmul.f32 %v660_v55, %v1002_v1  ;;  %v364_v47 = vld [vmem:[#allocation8 + $0xc8] sm:$0xff]  ;;  %v365_v54 = vld [vmem:[#allocation8 + $0xd0] sm:$0xff] }
  0x65   :  { %v291_v62 = vadd.f32 %v1004_v5, %v220_v52  ;;  %v292_v63 = vadd.f32 %v1004_v5, %v221_v53  ;;  %v293_v6 = vadd.f32 %v1004_v5, %v222_v58  ;;  %v226_v10 = vmul.f32 %v663_v60, %v1002_v1  ;;  %v366_v55 = vld [vmem:[#allocation8 + $0xd8] sm:$0xff]  ;;  %v367_v60 = vld [vmem:[#allocation8 + $0xe0] sm:$0xff] }
  0x66   :  { %v294_v7 = vadd.f32 %v1004_v5, %v223_v59  ;;  %v227_v11 = vmul.f32 %v664_v61, %v1002_v1  ;;  %v295_v14 = vadd.f32 %v1004_v5, %v224_v3  ;;  %v296_v15 = vadd.f32 %v1004_v5, %v225_v4  ;;  %v368_v61 = vld [vmem:[#allocation8 + $0xe8] sm:$0xff] }
  0x67   :  { %v419_v12 = vadd.f32 %v355_v56, %v291_v62  ;;  %v420_v13 = vadd.f32 %v356_v57, %v292_v63  ;;  %v421_v18 = vadd.f32 %v357_v0, %v293_v6  ;;  %v297_v20 = vadd.f32 %v1004_v5, %v226_v10  ;;  %v369_v6 = vld [vmem:[#allocation8 + $0xf0] sm:$0xff] }
  0x68   :  { %v422_v19 = vadd.f32 %v358_v2, %v294_v7  ;;  %v298_v21 = vadd.f32 %v1004_v5, %v227_v11  ;;  %v423_v25 = vadd.f32 %v359_v8, %v295_v14  ;;  %v424_v26 = vadd.f32 %v360_v9, %v296_v15  ;;  %v370_v7 = vld [vmem:[#allocation8 + $0xf8] sm:$0xff] }
  0x69   :  { %v483_v23 = vmax.f32 %v419_v12, 0.0  ;;  %v484_v24 = vmax.f32 %v420_v13, 0.0  ;;  %v485_v28 = vmax.f32 %v421_v18, 0.0  ;;  %v425_v30 = vadd.f32 %v361_v16, %v297_v20  ;;  %v760_v12 = vld [vmem:[#allocation2 + $0x80] sm:$0xff]  }
  0x6a   :  { %v486_v29 = vmax.f32 %v422_v19, 0.0  ;;  %v426_v31 = vadd.f32 %v362_v17, %v298_v21  ;;  %v487_v33 = vmax.f32 %v423_v25, 0.0  ;;  %v488_v34 = vmax.f32 %v424_v26, 0.0  ;;  %v761_v17 = vld [vmem:[#allocation2 + $0x88] sm:$0xff]  }
  0x6b   :  { %548 = vst.msk [vmem:[#allocation10 + $0x80] sm:$0xff] %vm531_vm0, %v483_v23  ;;  %549 = vst.msk [vmem:[#allocation10 + $0x88] sm:$0xff] %vm531_vm0, %v484_v24  ;;  %v667_v35 = vunpack.c.l.bf16 %v756_v22  ;;  %v668_v36 = vunpack.c.h.bf16 %v756_v22  ;;  %v489_v38 = vmax.f32 %v425_v30, 0.0  ;;  %v671_v40 = vunpack.c.l.bf16 %v757_v27  ;;  %v762_v22 = vld [vmem:[#allocation2 + $0x90] sm:$0xff]  }
  0x6c   :  { %550 = vst.msk [vmem:[#allocation10 + $0x90] sm:$0xff] %vm531_vm0, %v485_v28  ;;  %551 = vst.msk [vmem:[#allocation10 + $0x98] sm:$0xff] %vm531_vm0, %v486_v29  ;;  %v490_v39 = vmax.f32 %v426_v31, 0.0  ;;  %v672_v41 = vunpack.c.h.bf16 %v757_v27  ;;  %v675_v44 = vunpack.c.l.bf16 %v758_v32  ;;  %v676_v45 = vunpack.c.h.bf16 %v758_v32  ;;  %v763_v27 = vld [vmem:[#allocation2 + $0x98] sm:$0xff]  }
  0x6d   :  { %552 = vst.msk [vmem:[#allocation10 + $0xa0] sm:$0xff] %vm531_vm0, %v487_v33  ;;  %553 = vst.msk [vmem:[#allocation10 + $0xa8] sm:$0xff] %vm531_vm0, %v488_v34  ;;  %v228_v42 = vmul.f32 %v667_v35, %v1002_v1  ;;  %v229_v43 = vmul.f32 %v668_v36, %v1002_v1  ;;  %v230_v48 = vmul.f32 %v671_v40, %v1002_v1  ;;  %v679_v50 = vunpack.c.l.bf16 %v759_v37  ;;  %v371_v36 = vld [vmem:[#allocation8 + $0x100] sm:$0xff] }
  0x6e   :  { %554 = vst.msk [vmem:[#allocation10 + $0xb0] sm:$0xff] %vm531_vm0, %v489_v38  ;;  %555 = vst.msk [vmem:[#allocation10 + $0xb8] sm:$0xff] %vm531_vm0, %v490_v39  ;;  %v231_v49 = vmul.f32 %v672_v41, %v1002_v1  ;;  %v680_v51 = vunpack.c.h.bf16 %v759_v37  ;;  %v232_v56 = vmul.f32 %v675_v44, %v1002_v1  ;;  %v233_v57 = vmul.f32 %v676_v45, %v1002_v1  ;;  %v372_v37 = vld [vmem:[#allocation8 + $0x108] sm:$0xff]  ;;  %v373_v44 = vld [vmem:[#allocation8 + $0x110] sm:$0xff] }
  0x6f   :  { %v299_v52 = vadd.f32 %v1004_v5, %v228_v42  ;;  %v300_v53 = vadd.f32 %v1004_v5, %v229_v43  ;;  %v301_v58 = vadd.f32 %v1004_v5, %v230_v48  ;;  %v234_v62 = vmul.f32 %v679_v50, %v1002_v1  ;;  %v374_v45 = vld [vmem:[#allocation8 + $0x118] sm:$0xff]  ;;  %v375_v50 = vld [vmem:[#allocation8 + $0x120] sm:$0xff] }
  0x70   :  { %v302_v59 = vadd.f32 %v1004_v5, %v231_v49  ;;  %v235_v63 = vmul.f32 %v680_v51, %v1002_v1  ;;  %v303_v3 = vadd.f32 %v1004_v5, %v232_v56  ;;  %v304_v4 = vadd.f32 %v1004_v5, %v233_v57  ;;  %v376_v51 = vld [vmem:[#allocation8 + $0x128] sm:$0xff] }
  0x71   :  { %v427_v0 = vadd.f32 %v363_v46, %v299_v52  ;;  %v428_v2 = vadd.f32 %v364_v47, %v300_v53  ;;  %v429_v8 = vadd.f32 %v365_v54, %v301_v58  ;;  %v305_v10 = vadd.f32 %v1004_v5, %v234_v62  ;;  %v377_v58 = vld [vmem:[#allocation8 + $0x130] sm:$0xff] }
  0x72   :  { %v430_v9 = vadd.f32 %v366_v55, %v302_v59  ;;  %v306_v11 = vadd.f32 %v1004_v5, %v235_v63  ;;  %v431_v15 = vadd.f32 %v367_v60, %v303_v3  ;;  %v432_v16 = vadd.f32 %v368_v61, %v304_v4  ;;  %v378_v59 = vld [vmem:[#allocation8 + $0x138] sm:$0xff] }
  0x73   :  { %v491_v13 = vmax.f32 %v427_v0, 0.0  ;;  %v492_v14 = vmax.f32 %v428_v2, 0.0  ;;  %v493_v18 = vmax.f32 %v429_v8, 0.0  ;;  %v433_v20 = vadd.f32 %v369_v6, %v305_v10  ;;  %v764_v0 = vld [vmem:[#allocation2 + $0xa0] sm:$0xff]  }
  0x74   :  { %v494_v19 = vmax.f32 %v430_v9, 0.0  ;;  %v434_v21 = vadd.f32 %v370_v7, %v306_v11  ;;  %v495_v23 = vmax.f32 %v431_v15, 0.0  ;;  %v496_v24 = vmax.f32 %v432_v16, 0.0  ;;  %v765_v7 = vld [vmem:[#allocation2 + $0xa8] sm:$0xff]  }
  0x75   :  { %556 = vst.msk [vmem:[#allocation10 + $0xc0] sm:$0xff] %vm531_vm0, %v491_v13  ;;  %557 = vst.msk [vmem:[#allocation10 + $0xc8] sm:$0xff] %vm531_vm0, %v492_v14  ;;  %v683_v25 = vunpack.c.l.bf16 %v760_v12  ;;  %v684_v26 = vunpack.c.h.bf16 %v760_v12  ;;  %v497_v28 = vmax.f32 %v433_v20, 0.0  ;;  %v687_v30 = vunpack.c.l.bf16 %v761_v17  ;;  %v766_v12 = vld [vmem:[#allocation2 + $0xb0] sm:$0xff]  }
  0x76   :  { %558 = vst.msk [vmem:[#allocation10 + $0xd0] sm:$0xff] %vm531_vm0, %v493_v18  ;;  %559 = vst.msk [vmem:[#allocation10 + $0xd8] sm:$0xff] %vm531_vm0, %v494_v19  ;;  %v498_v29 = vmax.f32 %v434_v21, 0.0  ;;  %v688_v31 = vunpack.c.h.bf16 %v761_v17  ;;  %v691_v34 = vunpack.c.l.bf16 %v762_v22  ;;  %v692_v35 = vunpack.c.h.bf16 %v762_v22  ;;  %v767_v17 = vld [vmem:[#allocation2 + $0xb8] sm:$0xff]  }
  0x77   :  { %560 = vst.msk [vmem:[#allocation10 + $0xe0] sm:$0xff] %vm531_vm0, %v495_v23  ;;  %561 = vst.msk [vmem:[#allocation10 + $0xe8] sm:$0xff] %vm531_vm0, %v496_v24  ;;  %v236_v32 = vmul.f32 %v683_v25, %v1002_v1  ;;  %v237_v33 = vmul.f32 %v684_v26, %v1002_v1  ;;  %v238_v38 = vmul.f32 %v687_v30, %v1002_v1  ;;  %v695_v40 = vunpack.c.l.bf16 %v763_v27  ;;  %v379_v26 = vld [vmem:[#allocation8 + $0x140] sm:$0xff] }
  0x78   :  { %562 = vst.msk [vmem:[#allocation10 + $0xf0] sm:$0xff] %vm531_vm0, %v497_v28  ;;  %563 = vst.msk [vmem:[#allocation10 + $0xf8] sm:$0xff] %vm531_vm0, %v498_v29  ;;  %v239_v39 = vmul.f32 %v688_v31, %v1002_v1  ;;  %v696_v41 = vunpack.c.h.bf16 %v763_v27  ;;  %v240_v46 = vmul.f32 %v691_v34, %v1002_v1  ;;  %v241_v47 = vmul.f32 %v692_v35, %v1002_v1  ;;  %v380_v27 = vld [vmem:[#allocation8 + $0x148] sm:$0xff]  ;;  %v381_v34 = vld [vmem:[#allocation8 + $0x150] sm:$0xff] }
  0x79   :  { %v307_v42 = vadd.f32 %v1004_v5, %v236_v32  ;;  %v308_v43 = vadd.f32 %v1004_v5, %v237_v33  ;;  %v309_v48 = vadd.f32 %v1004_v5, %v238_v38  ;;  %v242_v52 = vmul.f32 %v695_v40, %v1002_v1  ;;  %v382_v35 = vld [vmem:[#allocation8 + $0x158] sm:$0xff]  ;;  %v383_v40 = vld [vmem:[#allocation8 + $0x160] sm:$0xff] }
  0x7a   :  { %v310_v49 = vadd.f32 %v1004_v5, %v239_v39  ;;  %v243_v53 = vmul.f32 %v696_v41, %v1002_v1  ;;  %v311_v56 = vadd.f32 %v1004_v5, %v240_v46  ;;  %v312_v57 = vadd.f32 %v1004_v5, %v241_v47  ;;  %v384_v41 = vld [vmem:[#allocation8 + $0x168] sm:$0xff] }
  0x7b   :  { %v435_v54 = vadd.f32 %v371_v36, %v307_v42  ;;  %v436_v55 = vadd.f32 %v372_v37, %v308_v43  ;;  %v437_v60 = vadd.f32 %v373_v44, %v309_v48  ;;  %v313_v62 = vadd.f32 %v1004_v5, %v242_v52  ;;  %v385_v48 = vld [vmem:[#allocation8 + $0x170] sm:$0xff] }
  0x7c   :  { %v438_v61 = vadd.f32 %v374_v45, %v310_v49  ;;  %v314_v63 = vadd.f32 %v1004_v5, %v243_v53  ;;  %v439_v4 = vadd.f32 %v375_v50, %v311_v56  ;;  %v440_v6 = vadd.f32 %v376_v51, %v312_v57  ;;  %v386_v49 = vld [vmem:[#allocation8 + $0x178] sm:$0xff] }
  0x7d   :  { %v499_v2 = vmax.f32 %v435_v54, 0.0  ;;  %v500_v3 = vmax.f32 %v436_v55, 0.0  ;;  %v501_v8 = vmax.f32 %v437_v60, 0.0  ;;  %v441_v10 = vadd.f32 %v377_v58, %v313_v62  ;;  %v768_v54 = vld [vmem:[#allocation2 + $0xc0] sm:$0xff]  }
  0x7e   :  { %v502_v9 = vmax.f32 %v438_v61, 0.0  ;;  %v442_v11 = vadd.f32 %v378_v59, %v314_v63  ;;  %v503_v13 = vmax.f32 %v439_v4, 0.0  ;;  %v504_v14 = vmax.f32 %v440_v6, 0.0  ;;  %v769_v59 = vld [vmem:[#allocation2 + $0xc8] sm:$0xff]  }
  0x7f   :  { %564 = vst.msk [vmem:[#allocation10 + $0x100] sm:$0xff] %vm531_vm0, %v499_v2  ;;  %565 = vst.msk [vmem:[#allocation10 + $0x108] sm:$0xff] %vm531_vm0, %v500_v3  ;;  %v699_v15 = vunpack.c.l.bf16 %v764_v0  ;;  %v700_v16 = vunpack.c.h.bf16 %v764_v0  ;;  %v505_v18 = vmax.f32 %v441_v10, 0.0  ;;  %v703_v20 = vunpack.c.l.bf16 %v765_v7  ;;  %v770_v0 = vld [vmem:[#allocation2 + $0xd0] sm:$0xff]  }
  0x80   :  { %566 = vst.msk [vmem:[#allocation10 + $0x110] sm:$0xff] %vm531_vm0, %v501_v8  ;;  %567 = vst.msk [vmem:[#allocation10 + $0x118] sm:$0xff] %vm531_vm0, %v502_v9  ;;  %v506_v19 = vmax.f32 %v442_v11, 0.0  ;;  %v704_v21 = vunpack.c.h.bf16 %v765_v7  ;;  %v707_v24 = vunpack.c.l.bf16 %v766_v12  ;;  %v708_v25 = vunpack.c.h.bf16 %v766_v12  ;;  %v771_v7 = vld [vmem:[#allocation2 + $0xd8] sm:$0xff]  }
  0x81   :  { %568 = vst.msk [vmem:[#allocation10 + $0x120] sm:$0xff] %vm531_vm0, %v503_v13  ;;  %569 = vst.msk [vmem:[#allocation10 + $0x128] sm:$0xff] %vm531_vm0, %v504_v14  ;;  %v244_v22 = vmul.f32 %v699_v15, %v1002_v1  ;;  %v245_v23 = vmul.f32 %v700_v16, %v1002_v1  ;;  %v246_v28 = vmul.f32 %v703_v20, %v1002_v1  ;;  %v711_v30 = vunpack.c.l.bf16 %v767_v17  ;;  %v387_v16 = vld [vmem:[#allocation8 + $0x180] sm:$0xff] }
  0x82   :  { %570 = vst.msk [vmem:[#allocation10 + $0x130] sm:$0xff] %vm531_vm0, %v505_v18  ;;  %571 = vst.msk [vmem:[#allocation10 + $0x138] sm:$0xff] %vm531_vm0, %v506_v19  ;;  %v247_v29 = vmul.f32 %v704_v21, %v1002_v1  ;;  %v712_v31 = vunpack.c.h.bf16 %v767_v17  ;;  %v248_v36 = vmul.f32 %v707_v24, %v1002_v1  ;;  %v249_v37 = vmul.f32 %v708_v25, %v1002_v1  ;;  %v388_v17 = vld [vmem:[#allocation8 + $0x188] sm:$0xff]  ;;  %v389_v24 = vld [vmem:[#allocation8 + $0x190] sm:$0xff] }
  0x83   :  { %v315_v32 = vadd.f32 %v1004_v5, %v244_v22  ;;  %v316_v33 = vadd.f32 %v1004_v5, %v245_v23  ;;  %v317_v38 = vadd.f32 %v1004_v5, %v246_v28  ;;  %v250_v42 = vmul.f32 %v711_v30, %v1002_v1  ;;  %v390_v25 = vld [vmem:[#allocation8 + $0x198] sm:$0xff]  ;;  %v391_v30 = vld [vmem:[#allocation8 + $0x1a0] sm:$0xff] }
  0x84   :  { %v318_v39 = vadd.f32 %v1004_v5, %v247_v29  ;;  %v251_v43 = vmul.f32 %v712_v31, %v1002_v1  ;;  %v319_v46 = vadd.f32 %v1004_v5, %v248_v36  ;;  %v320_v47 = vadd.f32 %v1004_v5, %v249_v37  ;;  %v392_v31 = vld [vmem:[#allocation8 + $0x1a8] sm:$0xff] }
  0x85   :  { %v443_v44 = vadd.f32 %v379_v26, %v315_v32  ;;  %v444_v45 = vadd.f32 %v380_v27, %v316_v33  ;;  %v445_v50 = vadd.f32 %v381_v34, %v317_v38  ;;  %v321_v52 = vadd.f32 %v1004_v5, %v250_v42  ;;  %v393_v38 = vld [vmem:[#allocation8 + $0x1b0] sm:$0xff] }
  0x86   :  { %v446_v51 = vadd.f32 %v382_v35, %v318_v39  ;;  %v322_v53 = vadd.f32 %v1004_v5, %v251_v43  ;;  %v447_v57 = vadd.f32 %v383_v40, %v319_v46  ;;  %v448_v58 = vadd.f32 %v384_v41, %v320_v47  ;;  %v394_v39 = vld [vmem:[#allocation8 + $0x1b8] sm:$0xff] }
  0x87   :  { %v507_v55 = vmax.f32 %v443_v44, 0.0  ;;  %v508_v56 = vmax.f32 %v444_v45, 0.0  ;;  %v509_v60 = vmax.f32 %v445_v50, 0.0  ;;  %v449_v62 = vadd.f32 %v385_v48, %v321_v52  ;;  %v772_v44 = vld [vmem:[#allocation2 + $0xe0] sm:$0xff]  }
  0x88   :  { %v510_v61 = vmax.f32 %v446_v51, 0.0  ;;  %v450_v63 = vadd.f32 %v386_v49, %v322_v53  ;;  %v511_v2 = vmax.f32 %v447_v57, 0.0  ;;  %v512_v3 = vmax.f32 %v448_v58, 0.0  ;;  %v773_v49 = vld [vmem:[#allocation2 + $0xe8] sm:$0xff]  }
  0x89   :  { %572 = vst.msk [vmem:[#allocation10 + $0x140] sm:$0xff] %vm531_vm0, %v507_v55  ;;  %573 = vst.msk [vmem:[#allocation10 + $0x148] sm:$0xff] %vm531_vm0, %v508_v56  ;;  %v715_v4 = vunpack.c.l.bf16 %v768_v54  ;;  %v716_v6 = vunpack.c.h.bf16 %v768_v54  ;;  %v513_v8 = vmax.f32 %v449_v62, 0.0  ;;  %v719_v10 = vunpack.c.l.bf16 %v769_v59  ;;  %v774_v54 = vld [vmem:[#allocation2 + $0xf0] sm:$0xff]  }
  0x8a   :  { %574 = vst.msk [vmem:[#allocation10 + $0x150] sm:$0xff] %vm531_vm0, %v509_v60  ;;  %575 = vst.msk [vmem:[#allocation10 + $0x158] sm:$0xff] %vm531_vm0, %v510_v61  ;;  %v514_v9 = vmax.f32 %v450_v63, 0.0  ;;  %v720_v11 = vunpack.c.h.bf16 %v769_v59  ;;  %v723_v14 = vunpack.c.l.bf16 %v770_v0  ;;  %v724_v15 = vunpack.c.h.bf16 %v770_v0  ;;  %v775_v59 = vld [vmem:[#allocation2 + $0xf8] sm:$0xff]  }
  0x8b   :  { %576 = vst.msk [vmem:[#allocation10 + $0x160] sm:$0xff] %vm531_vm0, %v511_v2  ;;  %577 = vst.msk [vmem:[#allocation10 + $0x168] sm:$0xff] %vm531_vm0, %v512_v3  ;;  %v252_v12 = vmul.f32 %v715_v4, %v1002_v1  ;;  %v253_v13 = vmul.f32 %v716_v6, %v1002_v1  ;;  %v254_v18 = vmul.f32 %v719_v10, %v1002_v1  ;;  %v727_v20 = vunpack.c.l.bf16 %v771_v7  ;;  %v395_v6 = vld [vmem:[#allocation8 + $0x1c0] sm:$0xff] }
  0x8c   :  { %578 = vst.msk [vmem:[#allocation10 + $0x170] sm:$0xff] %vm531_vm0, %v513_v8  ;;  %579 = vst.msk [vmem:[#allocation10 + $0x178] sm:$0xff] %vm531_vm0, %v514_v9  ;;  %v255_v19 = vmul.f32 %v720_v11, %v1002_v1  ;;  %v728_v21 = vunpack.c.h.bf16 %v771_v7  ;;  %v256_v26 = vmul.f32 %v723_v14, %v1002_v1  ;;  %v257_v27 = vmul.f32 %v724_v15, %v1002_v1  ;;  %v396_v7 = vld [vmem:[#allocation8 + $0x1c8] sm:$0xff]  ;;  %v397_v14 = vld [vmem:[#allocation8 + $0x1d0] sm:$0xff] }
  0x8d   :  { %v323_v22 = vadd.f32 %v1004_v5, %v252_v12  ;;  %v324_v23 = vadd.f32 %v1004_v5, %v253_v13  ;;  %v325_v28 = vadd.f32 %v1004_v5, %v254_v18  ;;  %v258_v32 = vmul.f32 %v727_v20, %v1002_v1  ;;  %v398_v15 = vld [vmem:[#allocation8 + $0x1d8] sm:$0xff]  ;;  %v399_v20 = vld [vmem:[#allocation8 + $0x1e0] sm:$0xff] }
  0x8e   :  { %v326_v29 = vadd.f32 %v1004_v5, %v255_v19  ;;  %v259_v33 = vmul.f32 %v728_v21, %v1002_v1  ;;  %v327_v36 = vadd.f32 %v1004_v5, %v256_v26  ;;  %v328_v37 = vadd.f32 %v1004_v5, %v257_v27  ;;  %v400_v21 = vld [vmem:[#allocation8 + $0x1e8] sm:$0xff] }
  0x8f   :  { %v451_v34 = vadd.f32 %v387_v16, %v323_v22  ;;  %v452_v35 = vadd.f32 %v388_v17, %v324_v23  ;;  %v453_v40 = vadd.f32 %v389_v24, %v325_v28  ;;  %v329_v42 = vadd.f32 %v1004_v5, %v258_v32  ;;  %v401_v28 = vld [vmem:[#allocation8 + $0x1f0] sm:$0xff] }
  0x90   :  { %v454_v41 = vadd.f32 %v390_v25, %v326_v29  ;;  %v330_v43 = vadd.f32 %v1004_v5, %v259_v33  ;;  %v455_v47 = vadd.f32 %v391_v30, %v327_v36  ;;  %v456_v48 = vadd.f32 %v392_v31, %v328_v37  ;;  %v402_v29 = vld [vmem:[#allocation8 + $0x1f8] sm:$0xff] }
  0x91   :  { %v515_v45 = vmax.f32 %v451_v34, 0.0  ;;  %v516_v46 = vmax.f32 %v452_v35, 0.0  ;;  %v517_v50 = vmax.f32 %v453_v40, 0.0  ;;  %v457_v52 = vadd.f32 %v393_v38, %v329_v42 }
  0x92   :  { %v518_v51 = vmax.f32 %v454_v41, 0.0  ;;  %v458_v53 = vadd.f32 %v394_v39, %v330_v43  ;;  %v519_v55 = vmax.f32 %v455_v47, 0.0  ;;  %v520_v56 = vmax.f32 %v456_v48, 0.0 }
  0x93   :  { %580 = vst.msk [vmem:[#allocation10 + $0x180] sm:$0xff] %vm531_vm0, %v515_v45  ;;  %581 = vst.msk [vmem:[#allocation10 + $0x188] sm:$0xff] %vm531_vm0, %v516_v46  ;;  %v731_v57 = vunpack.c.l.bf16 %v772_v44  ;;  %v732_v58 = vunpack.c.h.bf16 %v772_v44  ;;  %v521_v60 = vmax.f32 %v457_v52, 0.0  ;;  %v735_v62 = vunpack.c.l.bf16 %v773_v49 }
  0x94   :  { %582 = vst.msk [vmem:[#allocation10 + $0x190] sm:$0xff] %vm531_vm0, %v517_v50  ;;  %583 = vst.msk [vmem:[#allocation10 + $0x198] sm:$0xff] %vm531_vm0, %v518_v51  ;;  %v522_v61 = vmax.f32 %v458_v53, 0.0  ;;  %v736_v63 = vunpack.c.h.bf16 %v773_v49  ;;  %v739_v3 = vunpack.c.l.bf16 %v774_v54  ;;  %v740_v4 = vunpack.c.h.bf16 %v774_v54 }
  0x95   :  { %584 = vst.msk [vmem:[#allocation10 + $0x1a0] sm:$0xff] %vm531_vm0, %v519_v55  ;;  %585 = vst.msk [vmem:[#allocation10 + $0x1a8] sm:$0xff] %vm531_vm0, %v520_v56  ;;  %v260_v0 = vmul.f32 %v731_v57, %v1002_v1  ;;  %v261_v2 = vmul.f32 %v732_v58, %v1002_v1  ;;  %v262_v8 = vmul.f32 %v735_v62, %v1002_v1  ;;  %v743_v10 = vunpack.c.l.bf16 %v775_v59 }
  0x96   :  { %586 = vst.msk [vmem:[#allocation10 + $0x1b0] sm:$0xff] %vm531_vm0, %v521_v60  ;;  %587 = vst.msk [vmem:[#allocation10 + $0x1b8] sm:$0xff] %vm531_vm0, %v522_v61  ;;  %v263_v9 = vmul.f32 %v736_v63, %v1002_v1  ;;  %v744_v11 = vunpack.c.h.bf16 %v775_v59  ;;  %v264_v16 = vmul.f32 %v739_v3, %v1002_v1  ;;  %v265_v17 = vmul.f32 %v740_v4, %v1002_v1 }
  0x97   :  { %v331_v12 = vadd.f32 %v1004_v5, %v260_v0  ;;  %v332_v13 = vadd.f32 %v1004_v5, %v261_v2  ;;  %v333_v18 = vadd.f32 %v1004_v5, %v262_v8  ;;  %v266_v22 = vmul.f32 %v743_v10, %v1002_v1 }
  0x98   :  { %v334_v19 = vadd.f32 %v1004_v5, %v263_v9  ;;  %v267_v23 = vmul.f32 %v744_v11, %v1002_v1  ;;  %v335_v26 = vadd.f32 %v1004_v5, %v264_v16  ;;  %v336_v27 = vadd.f32 %v1004_v5, %v265_v17 }
  0x99   :  { %v459_v24 = vadd.f32 %v395_v6, %v331_v12  ;;  %v460_v25 = vadd.f32 %v396_v7, %v332_v13  ;;  %v461_v30 = vadd.f32 %v397_v14, %v333_v18  ;;  %v337_v32 = vadd.f32 %v1004_v5, %v266_v22 }
  0x9a   :  { %v462_v31 = vadd.f32 %v398_v15, %v334_v19  ;;  %v338_v33 = vadd.f32 %v1004_v5, %v267_v23  ;;  %v463_v36 = vadd.f32 %v399_v20, %v335_v26  ;;  %v464_v37 = vadd.f32 %v400_v21, %v336_v27 }
  0x9b   :  { %v523_v34 = vmax.f32 %v459_v24, 0.0  ;;  %v524_v35 = vmax.f32 %v460_v25, 0.0  ;;  %v525_v1 = vmax.f32 %v461_v30, 0.0  ;;  %v465_v39 = vadd.f32 %v401_v28, %v337_v32 }
  0x9c   :  { %v526_v38 = vmax.f32 %v462_v31, 0.0  ;;  %v466_v40 = vadd.f32 %v402_v29, %v338_v33  ;;  %v527_v41 = vmax.f32 %v463_v36, 0.0  ;;  %v528_v42 = vmax.f32 %v464_v37, 0.0 }
  0x9d   :  { %588 = vst.msk [vmem:[#allocation10 + $0x1c0] sm:$0xff] %vm531_vm0, %v523_v34  ;;  %589 = vst.msk [vmem:[#allocation10 + $0x1c8] sm:$0xff] %vm531_vm0, %v524_v35  ;;  %v529_v5 = vmax.f32 %v465_v39, 0.0 }
  0x9e   :  { %590 = vst.msk [vmem:[#allocation10 + $0x1d0] sm:$0xff] %vm531_vm0, %v525_v1  ;;  %591 = vst.msk [vmem:[#allocation10 + $0x1d8] sm:$0xff] %vm531_vm0, %v526_v38  ;;  %v530_v43 = vmax.f32 %v466_v40, 0.0 }
  0x9f   :  { %592 = vst.msk [vmem:[#allocation10 + $0x1e0] sm:$0xff] %vm531_vm0, %v527_v41  ;;  %593 = vst.msk [vmem:[#allocation10 + $0x1e8] sm:$0xff] %vm531_vm0, %v528_v42 }
  0xa0   :  { %594 = vst.msk [vmem:[#allocation10 + $0x1f0] sm:$0xff] %vm531_vm0, %v529_v5  ;;  %595 = vst.msk [vmem:[#allocation10 + $0x1f8] sm:$0xff] %vm531_vm0, %v530_v43 }
  0xa1   :  { %884 = shalt.err (!%p881_p8)
}
  0xa2   :  { %s885_s17 = scalar_lea.hbm %s1217_s4, 8192 }
  0xa3   :  { %p886_p9 = scmp.ne.s32.totalorder %s1217_s4, %s885_s17  ;;  %p889_p10 = scmp.lt.u32.totalorder %s885_s17, %s1217_s4 }
  0xa5   :  { %p891_p11 = pnand %p889_p10, %p886_p9 }
  0xa7   :  { %894 = shalt.err (!%p891_p11)
}
  0xa8   :  { %607 = dma.vmem_to_hbm [thread:$0]  %s602_s13, 8192, %s1217_s4, [#allocation4], %s909_s2, %s909_s2, %s910_s11  }
  0xa9   :  { %901 = dma.done.wait [#allocation4], 8192  }
  0xaa   :  { %902 = vsyncadd [#allocation4], 4294959104 }
  0xab   :  { %611 = vsyncpa [#allocation3], 1 }
  0xac   :  { %612 = vsyncpa [#allocation6], 1 }
  0xad   :  { %613 = vsyncpa [#allocation9], 1 }
  0xae   :  { %614 = vsyncpa [#allocation4], 1 }

// kernel: bottleneck_identity_forward.5
= control target key start
LH: loop header
LB: loop body
LE: loop exit
PB: predicated region body
PF: predicated region fallthrough
CT: control target
= control target key end

     0   :  { %11 = vsyncpa [#allocation3], 0  ;;  %s3906_s0 = inlined_call_operand.hbm [shape: bf16[2,16,16,8], index: 0, kind: input, shape index: {}]   ;;  %s3907_s1 = inlined_call_operand.hbm [shape: f32[1,8], index: 1, kind: input, shape index: {}]   ;;  %s3908_s2 = inlined_call_operand.hbm [shape: f32[1,8], index: 2, kind: input, shape index: {}]   ;;  %s3909_s3 = inlined_call_operand.hbm [shape: bf16[3,24,8], index: 3, kind: input, shape index: {}]   ;;  %s3910_s4 = inlined_call_operand.hbm [shape: bf16[2,16,16,8], index: 4, kind: output, shape index: {0}]   ;;  %s3911_s5 = inlined_call_operand.hbm [shape: f32[2,2,8], index: 5, kind: output, shape index: {1}]  }
   0x1   :  { %13 = vsyncpa [#allocation3 + $0x1], 0 }
   0x2   :  { %14 = vsyncpa [#allocation6], 0 }
   0x3   :  { %15 = vsyncpa [#allocation9], 0 }
   0x4   :  { %16 = vsyncpa [#allocation4], 0 }
   0x5   :  { %18 = vsyncpa [#allocation4 + $0x1], 0 }
   0x6   :  { %19 = vsyncpa [#allocation12], 0 }
   0x7   :  { %21 = vsyncpa [#allocation12 + $0x1], 0  ;;  %s2836_s18 = smov 0   ;;  %s2838_s19 = smov 0  }
   0x8   :  { %s2840_s20 = smov 0   ;;  %s2842_s21 = smov 0  }
   0x9 LB: > { %s2857_s22 = sadd.s32 4294967295, %s2791_s21   ;;  %s2020_s23 = sadd.s32 4294967294, %s2791_s21   ;;  %s2791_s21 = sphi %s2842_s21, %s3934_s21   ;;  %s2787_s20 = sphi %s2840_s20, %s3933_s20   ;;  %s2783_s19 = sphi %s2838_s19, %s3932_s19   ;;  %s2779_s18 = sphi %s2836_s18, %s3931_s18  }
   0xa   : > { %p47_p0 = scmp.ne.s32.totalorder %s2783_s19, %s2779_s18  ;;  %p3912_p1 = scmp.eq.s32.totalorder %s2857_s22, 0 }
   0xb   : > { %p140_p3 = scmp.eq.s32.totalorder %s2020_s23, 1  ;;  %p2021_p5 = scmp.ge.s32.totalorder %s2791_s21, 1 }
   0xc   : > { %p2866_p4 = por %p3912_p1, %p47_p0  ;;  %p173_p7 = scmp.lt.s32.totalorder %s2791_s21, 3 }
   0xd   : > { %p2871_p6 = por %p140_p3, %p47_p0  ;;  %s2793_s27 = smov [#allocation5]  }
   0xe   : > { %s3915_s24 = scalar_select %p2866_p4, 1, 0 }
   0xf   : > { %s3916_s25 = scalar_select %p2871_p6, 1, 0 }
  0x10   : > { %p2876_p8 = pnand %p2021_p5, %p173_p7  ;;  %s186_s28 = sshll.u32 %s2793_s27, 4  ;;  %s187_s28 = int_to_ptr.vmem [resolvable:$true] %s186_s28 }
  0x11   : > { %s2794_s29 = smov [#allocation7]   ;;  %s2795_s7 = smov [#allocation8]  }
  0x12   : > { %s3917_s26 = scalar_select %p2876_p8, 1, 0 }
  0x13   : > { %p2494_p10 = pneg %p2876_p8  ;;  %s197_s30 = sshll.u32 %s2794_s29, 4  ;;  %s2889_s30 = int_to_ptr.vmem [resolvable:$true] %s197_s30 }
  0x14   : > { %s207_s8 = sshll.u32 %s2795_s7, 4  ;;  %s2571_s11 = scalar_lea.hbm %s3907_s1, 16  ;;  %s2891_s8 = int_to_ptr.vmem [resolvable:$true] %s207_s8 }
  0x15   : > { %p2885_p11 = pnand %p2494_p10, %p3912_p1  ;;  %p2572_p12 = scmp.ne.s32.totalorder %s3907_s1, %s2571_s11 }
  0x16   : > { %p2578_p5 = scmp.lt.u32.totalorder %s2571_s11, %s3907_s1 }
  0x17   : > { %p2901_p13 = pneg %p2885_p11 }
  0x19   : > { %p2574_p0 = pnand %p2901_p13, %p2572_p12 }
  0x1b   : > { %p2575_p3 = pneg %p2574_p0 }
  0x1d   : > { %p2580_p7 = pnand %p2578_p5, %p2575_p3 }
  0x1f   : > { %2583 = shalt.err (!%p2580_p7)
}
  0x20   : > { %s2584_s17 = scalar_lea.vmem %s187_s28, 16  ;;  %s2591_s23 = scalar_lea.vmem %s187_s28, 32 }
  0x21   : > { %p2585_p10 = scmp.ne.s32.totalorder %s187_s28, %s2584_s17  ;;  %p2592_p2 = scmp.lt.s32.totalorder %s187_s28, %s187_s28 }
  0x22   : > { %p2593_p6 = scmp.lt.s32.totalorder %s2591_s23, %s2584_s17 }
  0x23   : > { %p2587_p9 = pnand %p2585_p10, %p2901_p13 }
  0x24   : > { %p2594_p4 = por %p2593_p6, %p2592_p2 }
  0x25   : > { %p2588_p1 = pneg %p2587_p9 }
  0x27   : > { %p2595_p8 = pnand %p2594_p4, %p2588_p1 }
  0x29   : > { %2598 = shalt.err (!%p2595_p8)
}
  0x2a   : > { %2497 = dma.hbm_to_vmem [thread:$0]  (!%p2885_p11), %s3907_s1, 16, %s187_s28, [#allocation6]  }
  0x2b   : > { %s2599_s10 = scalar_lea.hbm %s3908_s2, 16 }
  0x2c   : > { %p2600_p9 = scmp.ne.s32.totalorder %s3908_s2, %s2599_s10  ;;  %p2606_p1 = scmp.lt.u32.totalorder %s2599_s10, %s3908_s2 }
  0x2e   : > { %p2602_p12 = pnand %p2600_p9, %p2901_p13 }
  0x30   : > { %p2603_p2 = pneg %p2602_p12 }
  0x32   : > { %p2608_p4 = pnand %p2606_p1, %p2603_p2 }
  0x34   : > { %2611 = shalt.err (!%p2608_p4)
}
  0x35   : > { %s2612_s28 = scalar_lea.vmem %s2889_s30, 16  ;;  %s2619_s16 = scalar_lea.vmem %s2889_s30, 32 }
  0x36   : > { %p2613_p6 = scmp.ne.s32.totalorder %s2889_s30, %s2612_s28  ;;  %p2620_p3 = scmp.lt.s32.totalorder %s2889_s30, %s2889_s30 }
  0x37   : > { %p2621_p5 = scmp.lt.s32.totalorder %s2619_s16, %s2612_s28 }
  0x38   : > { %p2615_p8 = pnand %p2613_p6, %p2901_p13 }
  0x39   : > { %p2622_p7 = por %p2621_p5, %p2620_p3 }
  0x3a   : > { %p2616_p0 = pneg %p2615_p8 }
  0x3c   : > { %p2623_p10 = pnand %p2622_p7, %p2616_p0 }
  0x3e   : > { %2626 = shalt.err (!%p2623_p10)
}
  0x3f   : > { %2500 = dma.hbm_to_vmem [thread:$0]  (!%p2885_p11), %s3908_s2, 16, %s2889_s30, [#allocation6]  }
  0x40   : > { %s2627_s7 = scalar_lea.hbm %s3909_s3, 576 }
  0x41   : > { %p2628_p9 = scmp.ne.s32.totalorder %s3909_s3, %s2627_s7  ;;  %p2634_p1 = scmp.lt.u32.totalorder %s2627_s7, %s3909_s3 }
  0x43   : > { %p2630_p12 = pnand %p2628_p9, %p2901_p13 }
  0x45   : > { %p2631_p2 = pneg %p2630_p12 }
  0x47   : > { %p2636_p4 = pnand %p2634_p1, %p2631_p2 }
  0x49   : > { %2639 = shalt.err (!%p2636_p4)
}
  0x4a   : > { %s2640_s30 = scalar_lea.vmem %s2891_s8, 576  ;;  %p2648_p3 = scmp.lt.s32.totalorder %s2891_s8, %s2891_s8 }
  0x4b   : > { %p2641_p6 = scmp.ne.s32.totalorder %s2891_s8, %s2640_s30  ;;  %p2649_p5 = scmp.lt.s32.totalorder %s2640_s30, %s2640_s30 }
  0x4d   : > { %p2643_p8 = pnand %p2641_p6, %p2901_p13  ;;  %p2650_p7 = por %p2649_p5, %p2648_p3 }
  0x4f   : > { %p2644_p0 = pneg %p2643_p8 }
  0x51   : > { %p2651_p10 = pnand %p2650_p7, %p2644_p0 }
  0x53   : > { %2654 = shalt.err (!%p2651_p10)
}
  0x54   : > { %s2796_s13 = smov 64   ;;  %s2797_s14 = smov 4  }
  0x55   : > { %2503 = dma.hbm_to_vmem [thread:$0]  (!%p2885_p11), %s3909_s3, 576, %s2891_s8, [#allocation9], %s2796_s13, %s2796_s13, %s2797_s14  }
  0x56   : > { %s2968_s16 = sadd.s32 1, %s2791_s21   ;;  %s34_s23 = sadd.s32 1, %s2787_s20 }
  0x57   : > { %s31_s17 = ssub.s32 %s2791_s21, %s2968_s16  ;;  %p41_p9 = scmp.ne.s32.totalorder %s2787_s20, %s2783_s19 }
  0x58   : > { %p32_p13 = scmp.eq.s32.totalorder %s31_s17, 0  ;;  %p42_p12 = scmp.eq.s32.totalorder %s2791_s21, 0 }
  0x59   : > { %p2518_p2 = scmp.lt.s32.totalorder %s2791_s21, 2  ;;  %p3920_p4 = scmp.eq.s32.totalorder %s2857_s22, 1 }
  0x5a   : > { %s2978_s27 = scalar_select %p32_p13, %s2787_s20, %s34_s23  }
  0x5b   : > { %p43_p1 = por %p42_p12, %p41_p9  ;;  %p2982_p6 = por %p3920_p4, %p41_p9 }
  0x5c   : > { %s221_s29 = sand.u32 1, %s2787_s20   ;;  %s2129_s7 = sshll.u32 %s2791_s21, 11 }
  0x5d   : > { %s2026_s8 = sshll.u32 %s221_s29, 7  ;;  %s2991_s11 = scalar_lea.hbm %s3906_s0, %s2129_s7 }
  0x5e   : > { %s225_s12 = scalar_lea.vmem [#allocation2], %s2026_s8  ;;  %p2993_p11 = pnand %p2518_p2, %p43_p1 }
  0x5f   : > { %s232_s30 = sshll.u32 %s225_s12, 4  ;;  %s2999_s28 = scalar_lea.sflag [#allocation3], %s221_s29  ;;  %s2997_s30 = int_to_ptr.vmem [resolvable:$true] %s232_s30 }
  0x60   : > { %s2655_s17 = scalar_lea.hbm %s2991_s11, 2048  ;;  %p2657_p0 = pneg %p2993_p11 }
  0x61   : > { %p2656_p8 = scmp.ne.s32.totalorder %s2991_s11, %s2655_s17  ;;  %s2660_s8 = scalar_lea.hbm %s3906_s0, 4096 }
  0x62   : > { %p2661_p7 = scmp.lt.u32.totalorder %s2991_s11, %s3906_s0  ;;  %p2662_p10 = scmp.lt.u32.totalorder %s2660_s8, %s2655_s17 }
  0x63   : > { %p2658_p3 = pnand %p2657_p0, %p2656_p8  ;;  %p2664_p9 = scmp.lt.u32.totalorder %s2655_s17, %s2991_s11 }
  0x64   : > { %p2663_p13 = por %p2662_p10, %p2661_p7 }
  0x65   : > { %p2659_p5 = pneg %p2658_p3 }
  0x66   : > { %p2665_p12 = por %p2664_p9, %p2663_p13 }
  0x68   : > { %p2666_p2 = pnand %p2665_p12, %p2659_p5 }
  0x6a   : > { %2669 = shalt.err (!%p2666_p2)
}
  0x6b   : > { %s2670_s29 = scalar_lea.vmem %s2997_s30, 2048  ;;  %s2798_s12 = smov [#allocation2]  }
  0x6c   : > { %p2671_p1 = scmp.ne.s32.totalorder %s2997_s30, %s2670_s29  ;;  %s2675_s23 = sshll.u32 %s2798_s12, 4  ;;  %s2676_s23 = int_to_ptr.vmem [resolvable:$false] %s2675_s23 }
  0x6d   : > { %s2677_s7 = scalar_lea.vmem %s2676_s23, 4096  ;;  %p2678_p3 = scmp.lt.s32.totalorder %s2997_s30, %s2676_s23 }
  0x6e   : > { %p2673_p4 = pnand %p2671_p1, %p2657_p0  ;;  %p2679_p7 = scmp.lt.s32.totalorder %s2677_s7, %s2670_s29 }
  0x70   : > { %p2674_p8 = pneg %p2673_p4  ;;  %p2680_p10 = por %p2679_p7, %p2678_p3 }
  0x72   : > { %p2681_p13 = pnand %p2680_p10, %p2674_p8 }
  0x74   : > { %2684 = shalt.err (!%p2681_p13)
}
  0x75   : > { %2507 = dma.hbm_to_vmem [thread:$0]  (!%p2993_p11), %s2991_s11, 2048, %s2997_s30, %s2999_s28, %s2796_s13, %s2796_s13, %s2797_s14  }
  0x76   : > { %p3923_p0 = scmp.ne.s32.totalorder %s3917_s26, 0 }
  0x77   : > { %s3033_s17 = sand.u32 (!%p3923_p0), 1, %s2783_s19   ;;  %p3924_p5 = scmp.ne.s32.totalorder (!%p3923_p0), %s3915_s24, 0 }
  0x78   : > { %244 = sbr.rel (%p3923_p0) target bundleno = 623 (0x26f), region = 36  ;;  %s2030_s8 = sshll.u32 (!%p3923_p0), %s3033_s17, 7 }
  0x79   : > { %s247_s9 = scalar_lea.sflag (!%p3923_p0), [#allocation3], %s3033_s17  ;;  %s3039_s15 = scalar_lea.vmem (!%p3923_p0), [#allocation2], %s2030_s8 }
  0x7f   : > { %2758 = dma.done.wait (%p3924_p5), %s247_s9, 2048  }
  0x80   : > { %2760 = vsyncadd (%p3924_p5), %s247_s9, 4294965248  ;;  %p3925_p11 = scmp.eq.s32.totalorder %s2857_s22, 0 }
  0x82   : > { %2762 = dma.done.wait (%p3925_p11), [#allocation6], 32   ;;  %p3926_p9 = pmov %p3925_p11 }
  0x84   : > { %2764 = vsyncadd (%p3926_p9), [#allocation6], 4294967264  ;;  %p3927_p12 = pmov %p3926_p9 }
  0x85   : > { %p3928_p2 = pmov %p3926_p9 }
  0x86   : > { %2766 = dma.done.wait (%p3927_p12), [#allocation9], 576  }
  0x87   : > { %2768 = vsyncadd (%p3928_p2), [#allocation9], 4294966720  ;;  %v3053_v0 = vld [vmem:[#allocation5] ss:$0 sm:$0xff]  ;;  %vm598_vm0 = vcmask 1046528   ;;  %v2227_v4 = vld [vmem:[%s3039_s15 + $0x8] sm:$0xff]  }
  0x88   : > { %v2164_v1 = vld [vmem:[%s3039_s15] sm:$0xff]   ;;  %v2228_v5 = vld [vmem:[%s3039_s15 + $0x10] sm:$0xff]   ;;  %v2229_v6 = vld [vmem:[%s3039_s15 + $0x18] sm:$0xff]   ;;  %vm971_vm1 = vcmask 1043456   ;;  %v2799_v7 = vmov 0   ;;  %v2169_v9 = vunpack.c.l.bf16 %v2227_v4  ;;  %v2170_v10 = vunpack.c.h.bf16 %v2227_v4  ;;  %s2800_s24 = smov 8  }
  0x89   : > { %v2165_v2 = vunpack.c.l.bf16 %v2164_v1  ;;  %v2166_v3 = vunpack.c.h.bf16 %v2164_v1  ;;  %2300 = vmatprep.mubr.bf16.mxu1 %v2799_v7  ;;  %v3060_v8 = vld [vmem:[#allocation7] ss:$0 sm:$0xff]  ;;  %v2173_v11 = vunpack.c.l.bf16 %v2228_v5  ;;  %v2174_v12 = vunpack.c.h.bf16 %v2228_v5  ;;  %v2565_v29 = vld [vmem:[#allocation8] sm:$0xff]   ;;  %v3090_v38 = vld [vmem:[#allocation8 + $0xc] sm:$0xff]   ;;  %s2801_s26 = smov 16   ;;  %s3685_s13 = scalar_lea.vmem [#allocation10], %s2030_s8 }
  0x8a   : > { %v2177_v15 = vunpack.c.l.bf16 %v2229_v6  ;;  %v2178_v16 = vunpack.c.h.bf16 %v2229_v6  ;;  %v369_v17 = vmul.f32 %v2169_v9, %v3053_v0  ;;  %v370_v18 = vmul.f32 %v2170_v10, %v3053_v0  ;;  %2296 = vmatprep.subr.bf16.mxu1 %v2565_v29  ;;  %v2230_v42 = vld [vmem:[%s3039_s15 + $0x20] sm:$0xff]   ;;  %v2231_v43 = vld [vmem:[%s3039_s15 + $0x28] sm:$0xff]   ;;  %2332 = vmatprep.subr.bf16.mxu0 %v3090_v38  ;;  %v2232_v53 = vld [vmem:[%s3039_s15 + $0x30] sm:$0xff]   ;;  %s2162_s14 = sshll.u32 %s2857_s22, 11  ;;  %s1873_s11 = sshll.u32 %s3685_s13, 4  ;;  %s3820_s11 = int_to_ptr.vmem [resolvable:$true] %s1873_s11 }
  0x8b   : > { %v367_v13 = vmul.f32 %v2165_v2, %v3053_v0  ;;  %v368_v14 = vmul.f32 %v2166_v3, %v3053_v0  ;;  %v371_v19 = vmul.f32 %v2173_v11, %v3053_v0  ;;  %v372_v20 = vmul.f32 %v2174_v12, %v3053_v0  ;;  %2297 = vmatpush3.bf16.msra.mxu1 %v2565_v29  ;;  %v3105_v48 = vld [vmem:[#allocation8 + $0x8] ss:$0 sps:$4 sm:$0xff]   ;;  %v3116_v54 = vld [vmem:[#allocation8 + $0x14] ss:$0 sps:$4 sm:$0xff]   ;;  %s3818_s10 = scalar_lea.hbm %s3910_s4, %s2162_s14  ;;  %s1855_s29 = scalar_lea.sflag [#allocation4], %s3033_s17 }
  0x8c   : > { %v373_v23 = vmul.f32 %v2177_v15, %v3053_v0  ;;  %v374_v24 = vmul.f32 %v2178_v16, %v3053_v0  ;;  %v407_v25 = vadd.f32 %v3060_v8, %v369_v17  ;;  %v408_v26 = vadd.f32 %v3060_v8, %v370_v18  ;;  %2333 = vmatpush3.bf16.msra.mxu0 %v3090_v38  ;;  %v2233_v10 = vld [vmem:[%s3039_s15 + $0x38] sm:$0xff]   ;;  %s2685_s12 = scalar_lea.vmem %s3820_s11, 2048  ;;  %s2802_s23 = smov [#allocation10]  }
  0x8d   : > { %v405_v21 = vadd.f32 %v3060_v8, %v367_v13  ;;  %v406_v22 = vadd.f32 %v3060_v8, %v368_v14  ;;  %v409_v27 = vadd.f32 %v3060_v8, %v371_v19  ;;  %v410_v28 = vadd.f32 %v3060_v8, %v372_v20  ;;  %2472 = vmatprep.subr.msk.bf16.mxu1 %vm971_vm1, %v3105_v48  ;;  %p2686_p1 = scmp.ne.s32.totalorder %s3820_s11, %s2685_s12  ;;  %s2689_s7 = sshll.u32 %s2802_s23, 4  ;;  %s2690_s7 = int_to_ptr.vmem [resolvable:$false] %s2689_s7 }
  0x8e   : > { %v411_v32 = vadd.f32 %v3060_v8, %v373_v23  ;;  %v412_v33 = vadd.f32 %v3060_v8, %v374_v24  ;;  %v3082_v34 = vmax.f32 %v407_v25, 0.0  ;;  %v3084_v35 = vmax.f32 %v408_v26, 0.0  ;;  %2473 = vmatprep.subr.msk.bf16.mxu0 %vm971_vm1, %v3116_v54  ;;  %s2691_s8 = scalar_lea.vmem %s2690_s7, 4096  ;;  %p2692_p3 = scmp.lt.s32.totalorder %s3820_s11, %s2690_s7 }
  0x8f   : > { %v3076_v30 = vmax.f32 %v405_v21, 0.0  ;;  %v3078_v31 = vmax.f32 %v406_v22, 0.0  ;;  %v3086_v36 = vmax.f32 %v409_v27, 0.0  ;;  %v3088_v37 = vmax.f32 %v410_v28, 0.0  ;;  %p2687_p4 = pnand %p2686_p1, %p2982_p6  ;;  %p2693_p7 = scmp.lt.s32.totalorder %s2691_s8, %s2685_s12 }
  0x90   : > { %v696_v44 = vpack.c.bf16 %v3084_v35, %v3082_v34  ;;  %v602_v45 = vrot.slane %v3082_v34, 1  ;;  %v603_v46 = vrot.slane %v3084_v35, 1  ;;  %v3110_v51 = vmax.f32 %v411_v32, 0.0 }
  0x91   : > { %v695_v39 = vpack.c.bf16 %v3078_v31, %v3076_v30  ;;  %v599_v40 = vrot.slane %v3076_v30, 1  ;;  %v600_v41 = vrot.slane %v3078_v31, 1  ;;  %v697_v47 = vpack.c.bf16 %v3088_v37, %v3086_v36  ;;  %p2688_p8 = pneg %p2687_p4  ;;  %p2694_p10 = por %p2693_p7, %p2692_p3 }
  0x92   : > { %v3112_v52 = vmax.f32 %v412_v33, 0.0  ;;  %v604_v56 = vsel %vm598_vm0, %v602_v45, %v603_v46  ;;  %v680_v57 = vsel %vm598_vm0, %v603_v46, 0.0  ;;  %v605_v58 = vrot.slane %v3086_v36, 1  ;;  %v2234_v46 = vld [vmem:[%s3039_s15 + $0x40] sm:$0xff]  }
  0x93   : > { %759 = vrot.lane.b32.xlu0 %v695_v39, %s2800_s24  ;;  %v601_v49 = vsel %vm598_vm0, %v599_v40, %v600_v41  ;;  %v679_v50 = vsel %vm598_vm0, %v600_v41, 0.0  ;;  %v728_v59 = vpack.c.bf16 %v680_v57, %v604_v56  ;;  %v606_v61 = vrot.slane %v3088_v37, 1  ;;  %p2695_p13 = pnand %p2694_p10, %p2688_p8 }
  0x94   : > { %v727_v55 = vpack.c.bf16 %v679_v50, %v601_v49  ;;  %v698_v60 = vpack.c.bf16 %v3112_v52, %v3110_v51  ;;  %v608_v62 = vrot.slane %v3110_v51, 1  ;;  %v609_v63 = vrot.slane %v3112_v52, 1 }
  0x95   : > { %v2181_v1 = vunpack.c.l.bf16 %v2230_v42  ;;  %v2182_v2 = vunpack.c.h.bf16 %v2230_v42  ;;  %v2185_v3 = vunpack.c.l.bf16 %v2231_v43  ;;  %v607_v4 = vsel %vm598_vm0, %v605_v58, %v606_v61 }
  0x96   : > { %807 = vrot.lane.b32.xlu1 %v727_v55, %s2801_s26  ;;  %v681_v5 = vsel %vm598_vm0, %v606_v61, 0.0  ;;  %v2186_v6 = vunpack.c.h.bf16 %v2231_v43  ;;  %v2189_v9 = vunpack.c.l.bf16 %v2232_v53  ;;  %v610_v12 = vsel %vm598_vm0, %v608_v62, %v609_v63 }
  0x97   : > { %761 = vrot.lane.b32.xlu0 %v696_v44, %s2800_s24  ;;  %v729_v11 = vpack.c.bf16 %v681_v5, %v607_v4  ;;  %v682_v13 = vsel %vm598_vm0, %v609_v63, 0.0  ;;  %v375_v14 = vmul.f32 %v2181_v1, %v3053_v0  ;;  %v376_v16 = vmul.f32 %v2182_v2, %v3053_v0  ;;  %v2235_v63 = vld [vmem:[%s3039_s15 + $0x48] sm:$0xff]  }
  0x98   : > { %v730_v15 = vpack.c.bf16 %v682_v13, %v610_v12  ;;  %v377_v17 = vmul.f32 %v2185_v3, %v3053_v0  ;;  %v378_v18 = vmul.f32 %v2186_v6, %v3053_v0  ;;  %v2190_v20 = vunpack.c.h.bf16 %v2232_v53 }
  0x99   : > { %v413_v19 = vadd.f32 %v3060_v8, %v375_v14  ;;  %v379_v21 = vmul.f32 %v2189_v9, %v3053_v0  ;;  %v2193_v22 = vunpack.c.l.bf16 %v2233_v10  ;;  %v414_v23 = vadd.f32 %v3060_v8, %v376_v16 }
  0x9a   : > { %809 = vrot.lane.b32.xlu1 %v728_v59, %s2801_s26  ;;  %v415_v24 = vadd.f32 %v3060_v8, %v377_v17  ;;  %v416_v25 = vadd.f32 %v3060_v8, %v378_v18  ;;  %v2194_v26 = vunpack.c.h.bf16 %v2233_v10  ;;  %v380_v28 = vmul.f32 %v2190_v20, %v3053_v0 }
  0x9b   : > { %763 = vrot.lane.b32.xlu0 %v697_v47, %s2800_s24  ;;  %v3148_v27 = vmax.f32 %v413_v19, 0.0  ;;  %v417_v29 = vadd.f32 %v3060_v8, %v379_v21  ;;  %v381_v32 = vmul.f32 %v2193_v22, %v3053_v0  ;;  %v3153_v33 = vmax.f32 %v414_v23, 0.0 }
  0x9c   : > { %v3155_v39 = vmax.f32 %v415_v24, 0.0  ;;  %v3157_v40 = vmax.f32 %v416_v25, 0.0  ;;  %v382_v41 = vmul.f32 %v2194_v26, %v3053_v0  ;;  %v418_v43 = vadd.f32 %v3060_v8, %v380_v28  ;;  %v2237_v24 = vld [vmem:[%s3039_s15 + $0x58] sm:$0xff]  }
  0x9d   : > { %v611_v42 = vrot.slane %v3148_v27, 1  ;;  %v3163_v44 = vmax.f32 %v417_v29, 0.0  ;;  %v419_v45 = vadd.f32 %v3060_v8, %v381_v32  ;;  %v503_v47 = vrot.slane %v3078_v31, 7 }
  0x9e   : > { %765 = vrot.lane.b32.xlu1 %v698_v60, %s2800_s24  ;;  %v699_v49 = vpack.c.bf16 %v3153_v33, %v3148_v27  ;;  %v612_v50 = vrot.slane %v3153_v33, 1  ;;  %v614_v53 = vrot.slane %v3155_v39, 1  ;;  %v615_v55 = vrot.slane %v3157_v40, 1 }
  0x9f   : > { %811 = vrot.lane.b32.xlu0 %v729_v11, %s2801_s26  ;;  %v3174_v56 = vmax.f32 %v418_v43, 0.0  ;;  %v420_v57 = vadd.f32 %v3060_v8, %v382_v41  ;;  %v3177_v58 = vmax.f32 %v419_v45, 0.0  ;;  %v617_v61 = vrot.slane %v3163_v44, 1 }
  0xa0   : > { %v613_v59 = vsel %vm598_vm0, %v611_v42, %v612_v50  ;;  %v683_v60 = vsel %vm598_vm0, %v612_v50, 0.0  ;;  %v2197_v62 = vunpack.c.l.bf16 %v2234_v46  ;;  %v700_v1 = vpack.c.bf16 %v3157_v40, %v3155_v39 }
  0xa1   : > { %v731_v2 = vpack.c.bf16 %v683_v60, %v613_v59  ;;  %v616_v3 = vsel %vm598_vm0, %v614_v53, %v615_v55  ;;  %v684_v4 = vsel %vm598_vm0, %v615_v55, 0.0  ;;  %v701_v5 = vpack.c.bf16 %v3174_v56, %v3163_v44 }
  0xa2   : > { %813 = vrot.lane.b32.xlu1 %v730_v15, %s2801_s26  ;;  %v3191_v6 = vmax.f32 %v420_v57, 0.0  ;;  %v618_v9 = vrot.slane %v3174_v56, 1  ;;  %v620_v10 = vrot.slane %v3177_v58, 1  ;;  %v2198_v11 = vunpack.c.h.bf16 %v2234_v46  ;;  %v2236_v15 = vld [vmem:[%s3039_s15 + $0x50] sm:$0xff]  }
  0xa3   : > { %767 = vrot.lane.b32.xlu0 %v699_v49, %s2800_s24  ;;  %v383_v12 = vmul.f32 %v2197_v62, %v3053_v0  ;;  %v2201_v13 = vunpack.c.l.bf16 %v2235_v63  ;;  %v2202_v14 = vunpack.c.h.bf16 %v2235_v63  ;;  %v732_v16 = vpack.c.bf16 %v684_v4, %v616_v3 }
  0xa4   : > { %v619_v17 = vsel %vm598_vm0, %v617_v61, %v618_v9  ;;  %v685_v18 = vsel %vm598_vm0, %v618_v9, 0.0  ;;  %v621_v19 = vrot.slane %v3191_v6, 1  ;;  %v702_v20 = vpack.c.bf16 %v3191_v6, %v3177_v58 }
  0xa5   : > { %v384_v21 = vmul.f32 %v2198_v11, %v3053_v0  ;;  %v421_v22 = vadd.f32 %v3060_v8, %v383_v12  ;;  %v385_v23 = vmul.f32 %v2201_v13, %v3053_v0  ;;  %v733_v25 = vpack.c.bf16 %v685_v18, %v619_v17 }
  0xa6   : > { %769 = vrot.lane.b32.xlu1 %v700_v1, %s2800_s24  ;;  %v622_v26 = vsel %vm598_vm0, %v620_v10, %v621_v19  ;;  %v386_v28 = vmul.f32 %v2202_v14, %v3053_v0  ;;  %v2205_v29 = vunpack.c.l.bf16 %v2236_v15  ;;  %v686_v32 = vsel %vm598_vm0, %v621_v19, 0.0 }
  0xa7   : > { %815 = vrot.lane.b32.xlu0 %v731_v2, %s2801_s26  ;;  %v422_v41 = vadd.f32 %v3060_v8, %v384_v21  ;;  %v3212_v42 = vmax.f32 %v421_v22, 0.0  ;;  %v423_v43 = vadd.f32 %v3060_v8, %v385_v23  ;;  %v2206_v46 = vunpack.c.h.bf16 %v2236_v15  ;;  %v2239_v21 = vld [vmem:[%s3039_s15 + $0x68] sm:$0xff]  }
  0xa8   : > { %v424_v45 = vadd.f32 %v3060_v8, %v386_v28  ;;  %v387_v49 = vmul.f32 %v2205_v29, %v3053_v0  ;;  %v2209_v50 = vunpack.c.l.bf16 %v2237_v24  ;;  %v2210_v59 = vunpack.c.h.bf16 %v2237_v24 }
  0xa9   : > { %v3218_v53 = vmax.f32 %v422_v41, 0.0  ;;  %v623_v55 = vrot.slane %v3212_v42, 1  ;;  %v3221_v57 = vmax.f32 %v423_v43, 0.0  ;;  %v388_v61 = vmul.f32 %v2206_v46, %v3053_v0 }
  0xaa   : > { %817 = vrot.lane.b32.xlu1 %v732_v16, %s2801_s26  ;;  %v3224_v60 = vmax.f32 %v424_v45, 0.0  ;;  %v425_v62 = vadd.f32 %v3060_v8, %v387_v49  ;;  %v389_v63 = vmul.f32 %v2209_v50, %v3053_v0  ;;  %v734_v1 = vpack.c.bf16 %v686_v32, %v622_v26  ;;  %v2238_v16 = vld [vmem:[%s3039_s15 + $0x60] sm:$0xff]  }
  0xab   : > { %771 = vrot.lane.b32.xlu0 %v701_v5, %s2800_s24  ;;  %v624_v2 = vrot.slane %v3218_v53, 1  ;;  %v626_v3 = vrot.slane %v3221_v57, 1  ;;  %v390_v4 = vmul.f32 %v2210_v59, %v3053_v0  ;;  %v703_v5 = vpack.c.bf16 %v3218_v53, %v3212_v42 }
  0xac   : > { %v426_v9 = vadd.f32 %v3060_v8, %v388_v61  ;;  %v3235_v10 = vmax.f32 %v425_v62, 0.0  ;;  %v627_v11 = vrot.slane %v3224_v60, 1  ;;  %v427_v14 = vadd.f32 %v3060_v8, %v389_v63  ;;  %v2240_v61 = vld [vmem:[%s3039_s15 + $0x70] sm:$0xff]   ;;  %v2241_v62 = vld [vmem:[%s3039_s15 + $0x78] sm:$0xff]  }
  0xad   : > { %v625_v12 = vsel %vm598_vm0, %v623_v55, %v624_v2  ;;  %v687_v13 = vsel %vm598_vm0, %v624_v2, 0.0  ;;  %v428_v15 = vadd.f32 %v3060_v8, %v390_v4  ;;  %v704_v17 = vpack.c.bf16 %v3224_v60, %v3221_v57 }
  0xae   : > { %773 = vrot.lane.b32.xlu1 %v702_v20, %s2800_s24  ;;  %v3247_v18 = vmax.f32 %v426_v9, 0.0  ;;  %v628_v19 = vsel %vm598_vm0, %v626_v3, %v627_v11  ;;  %v688_v20 = vsel %vm598_vm0, %v627_v11, 0.0  ;;  %v735_v22 = vpack.c.bf16 %v687_v13, %v625_v12 }
  0xaf   : > { %819 = vrot.lane.b32.xlu0 %v733_v25, %s2801_s26  ;;  %v629_v23 = vrot.slane %v3235_v10, 1  ;;  %v3253_v24 = vmax.f32 %v427_v14, 0.0  ;;  %v3255_v26 = vmax.f32 %v428_v15, 0.0  ;;  %v736_v25 = vpack.c.bf16 %v688_v20, %v628_v19 }
  0xb0   : > { %v630_v28 = vrot.slane %v3247_v18, 1  ;;  %v2213_v29 = vunpack.c.l.bf16 %v2238_v16  ;;  %v2214_v32 = vunpack.c.h.bf16 %v2238_v16  ;;  %v705_v41 = vpack.c.bf16 %v3247_v18, %v3235_v10 }
  0xb1   : > { %v632_v43 = vrot.slane %v3253_v24, 1  ;;  %v633_v45 = vrot.slane %v3255_v26, 1  ;;  %v2217_v46 = vunpack.c.l.bf16 %v2239_v21  ;;  %v2218_v3 = vunpack.c.h.bf16 %v2239_v21 }
  0xb2   : > { %821 = vrot.lane.b32.xlu1 %v734_v1, %s2801_s26  ;;  %v631_v49 = vsel %vm598_vm0, %v629_v23, %v630_v28  ;;  %v689_v50 = vsel %vm598_vm0, %v630_v28, 0.0  ;;  %v391_v55 = vmul.f32 %v2213_v29, %v3053_v0  ;;  %v392_v59 = vmul.f32 %v2214_v32, %v3053_v0 }
  0xb3   : > { %775 = vrot.lane.b32.xlu0 %v703_v5, %s2800_s24  ;;  %v737_v63 = vpack.c.bf16 %v689_v50, %v631_v49  ;;  %v706_v1 = vpack.c.bf16 %v3255_v26, %v3253_v24  ;;  %v3273_v2 = vsel %vm598_vm0, %v632_v43, %v633_v45  ;;  %v3278_v9 = vsel %vm598_vm0, %v633_v45, 0.0 }
  0xb4   : > { %v429_v4 = vadd.f32 %v3060_v8, %v391_v55  ;;  %v430_v5 = vadd.f32 %v3060_v8, %v392_v59  ;;  %v393_v11 = vmul.f32 %v2217_v46, %v3053_v0  ;;  %vm501_vm2 = vcmask 1040384  }
  0xb5   : > { %v394_v12 = vmul.f32 %v2218_v3, %v3053_v0  ;;  %v2221_v13 = vunpack.c.l.bf16 %v2240_v61  ;;  %v2222_v14 = vunpack.c.h.bf16 %v2240_v61  ;;  %v2225_v15 = vunpack.c.l.bf16 %v2241_v62 }
  0xb6   : > { %823 = vrot.lane.b32.xlu1 %v735_v22, %s2801_s26  ;;  %v3284_v16 = vmax.f32 %v429_v4, 0.0  ;;  %v3286_v19 = vmax.f32 %v430_v5, 0.0  ;;  %v431_v20 = vadd.f32 %v3060_v8, %v393_v11  ;;  %v2226_v21 = vunpack.c.h.bf16 %v2241_v62 }
  0xb7   : > { %777 = vrot.lane.b32.xlu0 %v704_v17, %s2800_s24  ;;  %v432_v23 = vadd.f32 %v3060_v8, %v394_v12  ;;  %v395_v28 = vmul.f32 %v2221_v13, %v3053_v0  ;;  %v396_v22 = vmul.f32 %v2222_v14, %v3053_v0  ;;  %v397_v29 = vmul.f32 %v2225_v15, %v3053_v0 }
  0xb8   : > { %v738_v32 = vpack.c.bf16 %v3278_v9, %v3273_v2  ;;  %v635_v17 = vrot.slane %v3284_v16, 1  ;;  %v636_v43 = vrot.slane %v3286_v19, 1  ;;  %v3297_v45 = vmax.f32 %v431_v20, 0.0 }
  0xb9   : > { %v3300_v46 = vmax.f32 %v432_v23, 0.0  ;;  %v433_v49 = vadd.f32 %v3060_v8, %v395_v28  ;;  %v434_v50 = vadd.f32 %v3060_v8, %v396_v22  ;;  %v398_v55 = vmul.f32 %v2226_v21, %v3053_v0 }
  0xba   : > { %779 = vrot.lane.b32.xlu1 %v705_v41, %s2800_s24  ;;  %v637_v59 = vsel %vm598_vm0, %v635_v17, %v636_v43  ;;  %v691_v61 = vsel %vm598_vm0, %v636_v43, 0.0  ;;  %v638_v62 = vrot.slane %v3297_v45, 1  ;;  %v435_v2 = vadd.f32 %v3060_v8, %v397_v29 }
  0xbb   : > { %825 = vrot.lane.b32.xlu0 %v736_v25, %s2801_s26  ;;  %v707_v41 = vpack.c.bf16 %v3286_v19, %v3284_v16  ;;  %v739_v3 = vpack.c.bf16 %v691_v61, %v637_v59  ;;  %v3312_v4 = vmax.f32 %v433_v49, 0.0  ;;  %v3314_v5 = vmax.f32 %v434_v50, 0.0 }
  0xbc   : > { %v639_v0 = vrot.slane %v3300_v46, 1  ;;  %v436_v25 = vadd.f32 %v3060_v8, %v398_v55  ;;  %v3318_v9 = vmax.f32 %v435_v2, 0.0  ;;  %v502_v11 = vrot.slane %v3076_v30, 7 }
  0xbd   : > { %v708_v12 = vpack.c.bf16 %v3300_v46, %v3297_v45  ;;  %v641_v13 = vrot.slane %v3312_v4, 1  ;;  %v642_v14 = vrot.slane %v3314_v5, 1  ;;  %v973_v15 = vsel %vm971_vm1, %v3105_v48, 0 }
  0xbe   : > { %827 = vrot.lane.b32.xlu1 %v737_v63, %s2801_s26  ;;  %v640_v8 = vsel %vm598_vm0, %v638_v62, %v639_v0  ;;  %v692_v20 = vsel %vm598_vm0, %v639_v0, 0.0  ;;  %v3331_v21 = vmax.f32 %v436_v25, 0.0  ;;  %v644_v30 = vrot.slane %v3318_v9, 1  ;;  %2299 = vmatpush3.bf16.msra.mxu1 %v973_v15 }
  0xbf   : > { %781 = vrot.lane.b32.xlu0 %v706_v1, %s2800_s24  ;;  %v709_v63 = vpack.c.bf16 %v3314_v5, %v3312_v4  ;;  %v3337_v23 = vsel %vm598_vm0, %v641_v13, %v642_v14  ;;  %v3340_v28 = vsel %vm598_vm0, %v642_v14, 0.0  ;;  %v3345_v48 = vsel %vm501_vm2, %v502_v11, %v503_v47  ;;  %2404 = vmatprep.subr.bf16.mxu1 %v3090_v38  ;;  %v3348_v1 = vld [vmem:[#allocation8 + $0x18] sm:$0xff]  }
  0xc0   : > { %v740_v22 = vpack.c.bf16 %v692_v20, %v640_v8  ;;  %v741_v29 = vpack.c.bf16 %v3340_v28, %v3337_v23  ;;  %v645_v17 = vrot.slane %v3331_v21, 1  ;;  %v3354_v43 = vsel %vm501_vm2, 0.0, %v502_v11 }
  0xc1   : > { %v711_v31 = vpack.c.bf16 %v3345_v48, %v3354_v43  ;;  %v505_v47 = vrot.slane %v3082_v34, 7  ;;  %v506_v49 = vrot.slane %v3084_v35, 7  ;;  %v3363_v50 = vsel %vm971_vm1, %v3116_v54, 0  ;;  %v2570_v43 = vld [vmem:[#allocation8 + $0x20] ss:$0 sps:$4 sm:$0xff]  }
  0xc2   : > { %783 = vrot.lane.b32.xlu1 %v707_v41, %s2800_s24  ;;  %v710_v55 = vpack.c.bf16 %v3331_v21, %v3318_v9  ;;  %v3369_v59 = vsel %vm598_vm0, %v644_v30, %v645_v17  ;;  %2335 = vmatpush3.bf16.msra.mxu0 %v3363_v50  ;;  %v508_v61 = vrot.slane %v3086_v36, 7  ;;  %v509_v34 = vrot.slane %v3088_v37, 7 }
  0xc3   : > { %829 = vrot.lane.b32.xlu0 %v738_v32, %s2801_s26  ;;  %v3375_v35 = vsel %vm598_vm0, %v645_v17, 0.0  ;;  %v3378_v62 = vsel %vm501_vm2, %v505_v47, %v506_v49  ;;  %v3381_v32 = vsel %vm501_vm2, 0.0, %v505_v47  ;;  %2368 = vmatprep.subr.bf16.mxu0 %v3348_v1  ;;  %v511_v2 = vrot.slane %v3110_v51, 7 }
  0xc4   : > { %v712_v41 = vpack.c.bf16 %v3378_v62, %v3381_v32  ;;  %v3388_v36 = vsel %vm501_vm2, %v508_v61, %v509_v34  ;;  %v3391_v37 = vsel %vm501_vm2, 0.0, %v508_v61  ;;  %v512_v0 = vrot.slane %v3112_v52, 7 }
  0xc5   : > { %v713_v25 = vpack.c.bf16 %v3388_v36, %v3391_v37  ;;  %v3398_v11 = vsel %vm501_vm2, 0.0, %v511_v2  ;;  %v514_v51 = vrot.slane %v3148_v27, 7  ;;  %v515_v13 = vrot.slane %v3153_v33, 7 }
  0xc6   : > { %831 = vrot.lane.b32.xlu1 %v739_v3, %s2801_s26  ;;  %v3404_v14 = vsel %vm501_vm2, %v511_v2, %v512_v0  ;;  %v517_v15 = vrot.slane %v3155_v39, 7  ;;  %v518_v52 = vrot.slane %v3157_v40, 7  ;;  %v520_v3 = vrot.slane %v3163_v44, 7 }
  0xc7   : > { %785 = vrot.lane.b32.xlu0 %v708_v12, %s2800_s24  ;;  %v714_v8 = vpack.c.bf16 %v3404_v14, %v3398_v11  ;;  %v3412_v20 = vsel %vm501_vm2, %v514_v51, %v515_v13  ;;  %v3415_v27 = vsel %vm501_vm2, 0.0, %v514_v51  ;;  %v521_v33 = vrot.slane %v3174_v56, 7 }
  0xc8   : > { %v715_v12 = vpack.c.bf16 %v3412_v20, %v3415_v27  ;;  %v3421_v39 = vsel %vm501_vm2, %v517_v15, %v518_v52  ;;  %v3424_v40 = vsel %vm501_vm2, 0.0, %v517_v15  ;;  %v3427_v44 = vsel %vm501_vm2, 0.0, %v520_v3 }
  0xc9   : > { %v742_v30 = vpack.c.bf16 %v3375_v35, %v3369_v59  ;;  %v716_v56 = vpack.c.bf16 %v3421_v39, %v3424_v40  ;;  %v3435_v23 = vsel %vm501_vm2, %v520_v3, %v521_v33  ;;  %v523_v28 = vrot.slane %v3177_v58, 7 }
  0xca   : > { %787 = vrot.lane.b32.xlu1 %v709_v63, %s2800_s24  ;;  %v717_v17 = vpack.c.bf16 %v3435_v23, %v3427_v44  ;;  %v524_v47 = vrot.slane %v3191_v6, 7  ;;  %v526_v63 = vrot.slane %v3212_v42, 7  ;;  %v527_v49 = vrot.slane %v3218_v53, 7 }
  0xcb   : > { %833 = vrot.lane.b32.xlu0 %v740_v22, %s2801_s26  ;;  %v3445_v59 = vsel %vm501_vm2, 0.0, %v523_v28  ;;  %v529_v61 = vrot.slane %v3221_v57, 7  ;;  %v530_v34 = vrot.slane %v3224_v60, 7  ;;  %v532_v58 = vrot.slane %v3235_v10, 7 }
  0xcc   : > { %v3451_v22 = vsel %vm501_vm2, %v523_v28, %v524_v47  ;;  %v3454_v35 = vsel %vm501_vm2, %v526_v63, %v527_v49  ;;  %v3457_v6 = vsel %vm501_vm2, 0.0, %v526_v63  ;;  %v533_v42 = vrot.slane %v3247_v18, 7 }
  0xcd   : > { %v718_v53 = vpack.c.bf16 %v3451_v22, %v3445_v59  ;;  %v719_v57 = vpack.c.bf16 %v3454_v35, %v3457_v6  ;;  %v3466_v60 = vsel %vm501_vm2, %v529_v61, %v530_v34  ;;  %v3469_v10 = vsel %vm501_vm2, 0.0, %v529_v61 }
  0xce   : > { %835 = vrot.lane.b32.xlu1 %v741_v29, %s2801_s26  ;;  %v720_v2 = vpack.c.bf16 %v3466_v60, %v3469_v10  ;;  %v3475_v18 = vsel %vm501_vm2, %v532_v58, %v533_v42  ;;  %v3478_v29 = vsel %vm501_vm2, 0.0, %v532_v58  ;;  %v535_v0 = vrot.slane %v3253_v24, 7 }
  0xcf   : > { %789 = vrot.lane.b32.xlu0 %v710_v55, %s2800_s24  ;;  %v721_v51 = vpack.c.bf16 %v3475_v18, %v3478_v29  ;;  %v536_v13 = vrot.slane %v3255_v26, 7  ;;  %v538_v15 = vrot.slane %v3284_v16, 7  ;;  %v539_v55 = vrot.slane %v3286_v19, 7 }
  0xd0   : > { %v3487_v52 = vsel %vm501_vm2, 0.0, %v535_v0  ;;  %v541_v3 = vrot.slane %v3297_v45, 7  ;;  %v542_v33 = vrot.slane %v3300_v46, 7  ;;  %v544_v28 = vrot.slane %v3312_v4, 7 }
  0xd1   : > { %v3494_v24 = vsel %vm501_vm2, %v535_v0, %v536_v13  ;;  %v3497_v26 = vsel %vm501_vm2, %v538_v15, %v539_v55  ;;  %v3500_v16 = vsel %vm501_vm2, 0.0, %v538_v15  ;;  %v545_v19 = vrot.slane %v3314_v5, 7 }
  0xd2   : > { %837 = vrot.lane.b32.xlu1 %v742_v30, %s2801_s26  ;;  %v722_v45 = vpack.c.bf16 %v3494_v24, %v3487_v52  ;;  %v723_v46 = vpack.c.bf16 %v3497_v26, %v3500_v16  ;;  %v3508_v4 = vsel %vm501_vm2, %v541_v3, %v542_v33  ;;  %v3511_v30 = vsel %vm501_vm2, 0.0, %v541_v3 }
  0xd3   : > { %v724_v47 = vpack.c.bf16 %v3508_v4, %v3511_v30  ;;  %v3516_v63 = vsel %vm501_vm2, %v544_v28, %v545_v19  ;;  %v3519_v5 = vsel %vm501_vm2, 0.0, %v544_v28  ;;  %v547_v61 = vrot.slane %v3318_v9, 7 }
  0xd4   : > { %v725_v49 = vpack.c.bf16 %v3516_v63, %v3519_v5  ;;  %v548_v34 = vrot.slane %v3331_v21, 7  ;;  %vm839_vm3 = vcmask 64512   ;;  %vm888_vm4 = vcmask 130048  }
  0xd5   : > { %v3529_v42 = vsel %vm501_vm2, 0.0, %v547_v61  ;;  %vm937_vm5 = vcmask 195584   ;;  %v1325_v32 = vsel %vm971_vm1, %v2570_v43, 0  ;;  %vm1648_vm6 = vcmask 60416  }
  0xd6   : > { %v3526_v58 = vsel %vm501_vm2, %v547_v61, %v548_v34 }
  0xd7   : > { %v726_v0 = vpack.c.bf16 %v3526_v58, %v3529_v42 }
 0x105   : > { %v760_v13 = vpop.permute.xlu0 %759 }
 0x106   : > { %v842_v15 = vsel %vm839_vm3, %v711_v31, %v760_v13 }
 0x108   : > { %v808_v9 = vpop.permute.xlu1 %807 }
 0x109   : > { %v890_v21 = vsel %vm888_vm4, %v842_v15, %v808_v9  ;;  %v762_v55 = vpop.permute.xlu0 %761 }
 0x10a   : > { %v845_v3 = vsel %vm839_vm3, %v712_v41, %v762_v55  ;;  %2301 = vmatmul.mubr.msk.bf16.vlgmr.msra.gmra.mrb[0].mxu1 %vm937_vm5, %v890_v21  ;;  %2336 = vmatprep.mubr.msk.bf16.mxu0 %vm937_vm5, %v890_v21 }
 0x10b   : > { %2406 = vmatpush3.bf16.msra.mxu1 %v3090_v38 }
 0x10c   : > { %v810_v48 = vpop.permute.xlu1 %809  ;;  %2474 = vmatprep.subr.msk.bf16.mxu1 %vm971_vm1, %v3116_v54 }
 0x10d   : > { %v892_v31 = vsel %vm888_vm4, %v845_v3, %v810_v48  ;;  %v764_v33 = vpop.permute.xlu0 %763 }
 0x10e   : > { %2304 = vmatprep.mubr.msk.bf16.mxu1 %vm937_vm5, %v892_v31  ;;  %2337 = vmatmul.mubr.msk.bf16.vlgmr.msra.gmra.mrb[0].mxu0 %vm937_vm5, %v892_v31  ;;  %v848_v62 = vsel %vm839_vm3, %v713_v25, %v764_v33 }
 0x10f   : > { %2369 = vmatpush3.bf16.msra.mxu0 %v3348_v1  ;;  %2407 = vmatpush3.bf16.msra.mxu1 %v3363_v50 }
 0x110   : > { %v766_v38 = vpop.permute.xlu1 %765  ;;  %2475 = vmatprep.subr.msk.bf16.mxu0 %vm971_vm1, %v2570_v43 }
 0x111   : > { %v812_v54 = vpop.permute.xlu0 %811  ;;  %v851_v36 = vsel %vm839_vm3, %v714_v8, %v766_v38 }
 0x112   : > { %v894_v41 = vsel %vm888_vm4, %v848_v62, %v812_v54 }
 0x113   : > { %2305 = vmatmul.mubr.msk.bf16.gmra.mrb[4].mxu1 %vm937_vm5, %v894_v41  ;;  %2340 = vmatprep.mubr.msk.bf16.mxu0 %vm937_vm5, %v894_v41 }
 0x114   : > { %v814_v1 = vpop.permute.xlu1 %813  ;;  %2371 = vmatpush3.bf16.msra.mxu0 %v1325_v32 }
 0x115   : > { %v896_v50 = vsel %vm888_vm4, %v851_v36, %v814_v1  ;;  %v768_v37 = vpop.permute.xlu0 %767 }
 0x116   : > { %2308 = vmatprep.mubr.msk.bf16.mxu1 %vm937_vm5, %v896_v50  ;;  %2341 = vmatmul.mubr.msk.bf16.gmra.mrb[4].mxu0 %vm937_vm5, %v896_v50  ;;  %v854_v25 = vsel %vm839_vm3, %v715_v12, %v768_v37 }
 0x118   : > { %v770_v28 = vpop.permute.xlu1 %769 }
 0x119   : > { %v816_v19 = vpop.permute.xlu0 %815  ;;  %v857_v14 = vsel %vm839_vm3, %v716_v56, %v770_v28 }
 0x11a   : > { %v898_v11 = vsel %vm888_vm4, %v854_v25, %v816_v19 }
 0x11b   : > { %2309 = vmatmul.mubr.msk.bf16.gmra.mrb[8].mxu1 %vm937_vm5, %v898_v11  ;;  %2344 = vmatprep.mubr.msk.bf16.mxu0 %vm937_vm5, %v898_v11 }
 0x11c   : > { %v818_v8 = vpop.permute.xlu1 %817 }
 0x11d   : > { %v900_v61 = vsel %vm888_vm4, %v857_v14, %v818_v8  ;;  %v772_v34 = vpop.permute.xlu0 %771 }
 0x11e   : > { %2312 = vmatprep.mubr.msk.bf16.mxu1 %vm937_vm5, %v900_v61  ;;  %2345 = vmatmul.mubr.msk.bf16.gmra.mrb[8].mxu0 %vm937_vm5, %v900_v61  ;;  %v860_v20 = vsel %vm839_vm3, %v717_v17, %v772_v34 }
 0x120   : > { %v774_v27 = vpop.permute.xlu1 %773 }
 0x121   : > { %v820_v12 = vpop.permute.xlu0 %819  ;;  %v863_v39 = vsel %vm839_vm3, %v718_v53, %v774_v27 }
 0x122   : > { %v902_v13 = vsel %vm888_vm4, %v860_v20, %v820_v12 }
 0x123   : > { %2313 = vmatmul.mubr.msk.bf16.gmra.mrb[12].mxu1 %vm937_vm5, %v902_v13  ;;  %2348 = vmatprep.mubr.msk.bf16.mxu0 %vm937_vm5, %v902_v13 }
 0x124   : > { %v822_v40 = vpop.permute.xlu1 %821 }
 0x125   : > { %v904_v56 = vsel %vm888_vm4, %v863_v39, %v822_v40  ;;  %v776_v15 = vpop.permute.xlu0 %775 }
 0x126   : > { %2316 = vmatprep.mubr.msk.bf16.mxu1 %vm937_vm5, %v904_v56  ;;  %2349 = vmatmul.mubr.msk.bf16.gmra.mrb[12].mxu0 %vm937_vm5, %v904_v56  ;;  %v866_v44 = vsel %vm839_vm3, %v719_v57, %v776_v15 }
 0x127   : > { %2372 = vmatprep.mubr.msk.bf16.mxu0 %vm937_vm5, %v892_v31 }
 0x128   : > { %v824_v23 = vpop.permute.xlu1 %823 }
 0x129   : > { %v906_v17 = vsel %vm888_vm4, %v866_v44, %v824_v23  ;;  %v778_v59 = vpop.permute.xlu0 %777 }
 0x12a   : > { %v869_v22 = vsel %vm839_vm3, %v720_v2, %v778_v59 }
 0x12b   : > { %2317 = vmatmul.mubr.msk.bf16.gmra.mrb[16].mxu1 %vm937_vm5, %v906_v17 }
 0x12c   : > { %v780_v53 = vpop.permute.xlu1 %779 }
 0x12d   : > { %v826_v9 = vpop.permute.xlu0 %825  ;;  %v872_v35 = vsel %vm839_vm3, %v721_v51, %v780_v53 }
 0x12e   : > { %2373 = vmatmul.mubr.msk.bf16.vlgmr.msra.gmra.mrb[0].mxu0 %vm937_vm5, %v894_v41  ;;  %v908_v6 = vsel %vm888_vm4, %v869_v22, %v826_v9 }
 0x12f   : > { %2376 = vmatprep.mubr.msk.bf16.mxu0 %vm937_vm5, %v896_v50  ;;  %2320 = vmatprep.mubr.msk.bf16.mxu1 %vm937_vm5, %v908_v6 }
 0x130   : > { %v828_v57 = vpop.permute.xlu1 %827 }
 0x131   : > { %v910_v60 = vsel %vm888_vm4, %v872_v35, %v828_v57  ;;  %v782_v10 = vpop.permute.xlu0 %781 }
 0x132   : > { %v875_v2 = vsel %vm839_vm3, %v722_v45, %v782_v10 }
 0x133   : > { %2321 = vmatmul.mubr.msk.bf16.gmra.mrb[20].mxu1 %vm937_vm5, %v910_v60 }
 0x134   : > { %v784_v18 = vpop.permute.xlu1 %783 }
 0x135   : > { %v830_v29 = vpop.permute.xlu0 %829  ;;  %v878_v51 = vsel %vm839_vm3, %v723_v46, %v784_v18 }
 0x136   : > { %2377 = vmatmul.mubr.msk.bf16.gmra.mrb[4].mxu0 %vm937_vm5, %v898_v11  ;;  %v912_v21 = vsel %vm888_vm4, %v875_v2, %v830_v29 }
 0x137   : > { %2380 = vmatprep.mubr.msk.bf16.mxu0 %vm937_vm5, %v900_v61  ;;  %2324 = vmatprep.mubr.msk.bf16.mxu1 %vm937_vm5, %v912_v21 }
 0x138   : > { %v832_v55 = vpop.permute.xlu1 %831 }
 0x139   : > { %v914_v52 = vsel %vm888_vm4, %v878_v51, %v832_v55  ;;  %v786_v24 = vpop.permute.xlu0 %785 }
 0x13a   : > { %v881_v26 = vsel %vm839_vm3, %v724_v47, %v786_v24 }
 0x13b   : > { %2325 = vmatmul.mubr.msk.bf16.gmra.mrb[24].mxu1 %vm937_vm5, %v914_v52 }
 0x13c   : > { %v788_v16 = vpop.permute.xlu1 %787 }
 0x13d   : > { %v834_v45 = vpop.permute.xlu0 %833  ;;  %v884_v46 = vsel %vm839_vm3, %v725_v49, %v788_v16 }
 0x13e   : > { %2381 = vmatmul.mubr.msk.bf16.gmra.mrb[8].mxu0 %vm937_vm5, %v902_v13  ;;  %v916_v3 = vsel %vm888_vm4, %v881_v26, %v834_v45 }
 0x13f   : > { %2384 = vmatprep.mubr.msk.bf16.mxu0 %vm937_vm5, %v904_v56  ;;  %2328 = vmatprep.mubr.msk.bf16.mxu1 %vm937_vm5, %v916_v3 }
 0x140   : > { %v836_v48 = vpop.permute.xlu1 %835 }
 0x141   : > { %v918_v4 = vsel %vm888_vm4, %v884_v46, %v836_v48  ;;  %v790_v30 = vpop.permute.xlu0 %789 }
 0x142   : > { %v887_v47 = vsel %vm839_vm3, %v726_v0, %v790_v30 }
 0x143   : > { %2329 = vmatmul.mubr.msk.bf16.gmra.mrb[28].mxu1 %vm937_vm5, %v918_v4 }
 0x144   : > { %2352 = vmatprep.mubr.msk.bf16.mxu1 %vm937_vm5, %v906_v17  ;;  %v838_v63 = vpop.permute.xlu1 %837 }
 0x145   : > { %v920_v5 = vsel %vm888_vm4, %v887_v47, %v838_v63 }
 0x146   : > { %2385 = vmatmul.mubr.msk.bf16.gmra.mrb[12].mxu0 %vm937_vm5, %v906_v17 }
 0x147   : > { %2388 = vmatprep.mubr.msk.bf16.mxu0 %vm937_vm5, %v908_v6 }
 0x14b   : > { %2353 = vmatmul.mubr.msk.bf16.vlgmr.msra.gmra.mrb[16].mxu1 %vm937_vm5, %v908_v6 }
 0x14c   : > { %2356 = vmatprep.mubr.msk.bf16.mxu1 %vm937_vm5, %v910_v60 }
 0x14e   : > { %2389 = vmatmul.mubr.msk.bf16.gmra.mrb[16].mxu0 %vm937_vm5, %v910_v60 }
 0x14f   : > { %2392 = vmatprep.mubr.msk.bf16.mxu0 %vm937_vm5, %v912_v21 }
 0x153   : > { %2357 = vmatmul.mubr.msk.bf16.gmra.mrb[20].mxu1 %vm937_vm5, %v912_v21 }
 0x154   : > { %2360 = vmatprep.mubr.msk.bf16.mxu1 %vm937_vm5, %v914_v52 }
 0x156   : > { %2393 = vmatmul.mubr.msk.bf16.gmra.mrb[20].mxu0 %vm937_vm5, %v914_v52 }
 0x157   : > { %2396 = vmatprep.mubr.msk.bf16.mxu0 %vm937_vm5, %v916_v3 }
 0x15b   : > { %2361 = vmatmul.mubr.msk.bf16.gmra.mrb[24].mxu1 %vm937_vm5, %v916_v3 }
 0x15c   : > { %2364 = vmatprep.mubr.msk.bf16.mxu1 %vm937_vm5, %v918_v4 }
 0x15e   : > { %2397 = vmatmul.mubr.msk.bf16.gmra.mrb[24].mxu0 %vm937_vm5, %v918_v4 }
 0x15f   : > { %2400 = vmatprep.mubr.msk.bf16.mxu0 %vm937_vm5, %v920_v5 }
 0x163   : > { %2365 = vmatmul.mubr.msk.bf16.gmra.mrb[28].mxu1 %vm937_vm5, %v920_v5 }
 0x166   : > { %2401 = vmatmul.mubr.bf16.gmra.mrb[28].mxu0 %v2799_v7 }
 0x1dd   : > { %v2302_v49 = vpop.f32.mrb[0].mxu1 }
 0x1de   : > { %v1009_v58 = vpop.f32.mrb[1].mxu1 }
 0x1df   : > { %v2303_v42 = vpop.f32.mrb[2].mxu1 }
 0x1e0   : > { %v1012_v0 = vpop.f32.mrb[3].mxu1 }
 0x1e6   : > { %v2306_v43 = vpop.f32.mrb[4].mxu1 }
 0x1e7   : > { %v1025_v31 = vpop.f32.mrb[5].mxu1 }
 0x1e8   : > { %v2307_v33 = vpop.f32.mrb[6].mxu1 }
 0x1e9   : > { %v1028_v62 = vpop.f32.mrb[7].mxu1 }
 0x1ee   : > { %v3667_v38 = vpop.f32.mrb[8].mxu1 }
 0x1ef   : > { %v3669_v54 = vpop.f32.mrb[9].mxu1 }
 0x1f0   : > { %v3671_v32 = vpop.f32.mrb[10].mxu1 }
 0x1f1   : > { %v3673_v41 = vpop.f32.mrb[11].mxu1 }
 0x1f6   : > { %v3675_v36 = vpop.f32.mrb[12].mxu1 }
 0x1f7   : > { %v3677_v7 = vpop.f32.mrb[13].mxu1 }
 0x1f8   : > { %v3679_v1 = vpop.f32.mrb[14].mxu1 }
 0x1f9   : > { %v3681_v50 = vpop.f32.mrb[15].mxu1 }
 0x201   : > { %v2374_v37 = vpop.f32.mrb[0].mxu0 }
 0x202   : > { %v2408_v25 = vadd.f32 %v2374_v37, %v2302_v49  ;;  %v1361_v28 = vpop.f32.mrb[1].mxu0 }
 0x203   : > { %v2409_v19 = vadd.f32 %v1361_v28, %v1009_v58  ;;  %v2375_v11 = vpop.f32.mrb[2].mxu0 }
 0x204   : > { %v2132_v14 = vpack.c.bf16 %v2408_v25, %v2408_v25  ;;  %v2410_v8 = vadd.f32 %v2375_v11, %v2303_v42  ;;  %v1364_v61 = vpop.f32.mrb[3].mxu0  ;;  %v1752_v12 = vmul.f32 %v2408_v25, %v2408_v25  ;;  %v1684_v17 = vsel %vm839_vm3, %v2408_v25, 0.0 }
 0x205   : > { %v2130_v34 = vpack.c.bf16 %v2409_v19, %v2409_v19  ;;  %v1750_v20 = vmul.f32 %v2409_v19, %v2409_v19  ;;  %v2411_v27 = vadd.f32 %v1364_v61, %v1012_v0  ;;  %v1681_v39 = vsel %vm839_vm3, %v2409_v19, 0.0 }
 0x206   : > { %1651 = vst.msk [vmem:[%s3685_s13 + $0x8] sm:$0xf] %vm1648_vm6, %v2132_v14  ;;  %v2133_v13 = vpack.c.bf16 %v2410_v8, %v2410_v8  ;;  %v1753_v44 = vmul.f32 %v2410_v8, %v2410_v8  ;;  %v1785_v60 = vsel %vm839_vm3, %v1752_v12, 0.0  ;;  %v1686_v18 = vsel %vm839_vm3, %v2410_v8, 0.0 }
 0x207   : > { %1649 = vst.msk [vmem:[%s3685_s13] sm:$0xf] %vm1648_vm6, %v2130_v34  ;;  %v2131_v40 = vpack.c.bf16 %v2411_v27, %v2411_v27  ;;  %v1682_v56 = vsel %vm839_vm3, %v2411_v27, 0.0  ;;  %v1751_v15 = vmul.f32 %v2411_v27, %v2411_v27  ;;  %v1782_v59 = vsel %vm839_vm3, %v1750_v20, 0.0 }
 0x208   : > { %1652 = vst.msk [vmem:[%s3685_s13 + $0xc] sm:$0xf] %vm1648_vm6, %v2133_v13  ;;  %v1683_v23 = vadd.f32 %v1682_v56, %v1681_v39  ;;  %v1787_v29 = vsel %vm839_vm3, %v1753_v44, 0.0 }
 0x209   : > { %1650 = vst.msk [vmem:[%s3685_s13 + $0x4] sm:$0xf] %vm1648_vm6, %v2131_v40  ;;  %v1783_v22 = vsel %vm839_vm3, %v1751_v15, 0.0  ;;  %v2378_v53 = vpop.f32.mrb[4].mxu0 }
 0x20a   : > { %v1685_v9 = vadd.f32 %v1684_v17, %v1683_v23  ;;  %v1784_v35 = vadd.f32 %v1783_v22, %v1782_v59  ;;  %v2412_v6 = vadd.f32 %v2378_v53, %v2306_v43  ;;  %v1377_v57 = vpop.f32.mrb[5].mxu0 }
 0x20b   : > { %v2413_v10 = vadd.f32 %v1377_v57, %v1025_v31  ;;  %v2379_v2 = vpop.f32.mrb[6].mxu0 }
 0x20c   : > { %v1786_v51 = vadd.f32 %v1785_v60, %v1784_v35  ;;  %v2136_v21 = vpack.c.bf16 %v2412_v6, %v2412_v6  ;;  %v1380_v55 = vpop.f32.mrb[7].mxu0  ;;  %v1687_v24 = vadd.f32 %v1686_v18, %v1685_v9  ;;  %v2414_v46 = vadd.f32 %v2379_v2, %v2307_v33 }
 0x20d   : > { %v2134_v52 = vpack.c.bf16 %v2413_v10, %v2413_v10  ;;  %v1688_v26 = vsel %vm839_vm3, %v2413_v10, 0.0  ;;  %v1754_v16 = vmul.f32 %v2413_v10, %v2413_v10  ;;  %v2415_v3 = vadd.f32 %v1380_v55, %v1028_v62 }
 0x20e   : > { %1655 = vst.msk [vmem:[%s3685_s13 + $0x18] sm:$0xf] %vm1648_vm6, %v2136_v21  ;;  %v1788_v45 = vadd.f32 %v1787_v29, %v1786_v51  ;;  %v1689_v48 = vadd.f32 %v1688_v26, %v1687_v24  ;;  %v1756_v30 = vmul.f32 %v2412_v6, %v2412_v6  ;;  %v2137_v63 = vpack.c.bf16 %v2414_v46, %v2414_v46 }
 0x20f   : > { %1653 = vst.msk [vmem:[%s3685_s13 + $0x10] sm:$0xf] %vm1648_vm6, %v2134_v52  ;;  %v1789_v4 = vsel %vm839_vm3, %v1754_v16, 0.0  ;;  %v2135_v5 = vpack.c.bf16 %v2415_v3, %v2415_v3  ;;  %v1690_v49 = vsel %vm839_vm3, %v2415_v3, 0.0  ;;  %v1755_v58 = vmul.f32 %v2415_v3, %v2415_v3 }
 0x210   : > { %v1790_v47 = vadd.f32 %v1789_v4, %v1788_v45  ;;  %1656 = vst.msk [vmem:[%s3685_s13 + $0x1c] sm:$0xf] %vm1648_vm6, %v2137_v63  ;;  %v1691_v0 = vadd.f32 %v1690_v49, %v1689_v48  ;;  %v1692_v33 = vsel %vm839_vm3, %v2412_v6, 0.0  ;;  %v1757_v62 = vmul.f32 %v2414_v46, %v2414_v46 }
 0x211   : > { %v2382_v42 = vpop.f32.mrb[8].mxu0  ;;  %1654 = vst.msk [vmem:[%s3685_s13 + $0x14] sm:$0xf] %vm1648_vm6, %v2135_v5  ;;  %v1791_v37 = vsel %vm839_vm3, %v1755_v58, 0.0  ;;  %v1793_v19 = vsel %vm839_vm3, %v1756_v30, 0.0 }
 0x212   : > { %v2416_v43 = vadd.f32 %v2382_v42, %v3667_v38  ;;  %v1393_v31 = vpop.f32.mrb[9].mxu0  ;;  %v1693_v11 = vadd.f32 %v1692_v33, %v1691_v0  ;;  %v1792_v14 = vadd.f32 %v1791_v37, %v1790_v47  ;;  %v1694_v38 = vsel %vm839_vm3, %v2414_v46, 0.0 }
 0x213   : > { %v2417_v25 = vadd.f32 %v1393_v31, %v3669_v54  ;;  %v2383_v28 = vpop.f32.mrb[10].mxu0  ;;  %v1795_v40 = vsel %vm839_vm3, %v1757_v62, 0.0 }
 0x214   : > { %v2140_v8 = vpack.c.bf16 %v2416_v43, %v2416_v43  ;;  %v1396_v61 = vpop.f32.mrb[11].mxu0  ;;  %v1794_v12 = vadd.f32 %v1793_v19, %v1792_v14  ;;  %v1695_v13 = vadd.f32 %v1694_v38, %v1693_v11  ;;  %v2418_v54 = vadd.f32 %v2383_v28, %v3671_v32 }
 0x215   : > { %v2138_v34 = vpack.c.bf16 %v2417_v25, %v2417_v25  ;;  %v1696_v20 = vsel %vm839_vm3, %v2417_v25, 0.0  ;;  %v1758_v27 = vmul.f32 %v2417_v25, %v2417_v25  ;;  %v2419_v39 = vadd.f32 %v1396_v61, %v3673_v41 }
 0x216   : > { %1659 = vst.msk [vmem:[%s3685_s13 + $0x28] sm:$0xf] %vm1648_vm6, %v2140_v8  ;;  %v1760_v15 = vmul.f32 %v2416_v43, %v2416_v43  ;;  %v1697_v44 = vadd.f32 %v1696_v20, %v1695_v13  ;;  %v1796_v23 = vadd.f32 %v1795_v40, %v1794_v12  ;;  %v2141_v17 = vpack.c.bf16 %v2418_v54, %v2418_v54 }
 0x217   : > { %1657 = vst.msk [vmem:[%s3685_s13 + $0x20] sm:$0xf] %vm1648_vm6, %v2138_v34  ;;  %v1797_v56 = vsel %vm839_vm3, %v1758_v27, 0.0  ;;  %v2139_v59 = vpack.c.bf16 %v2419_v39, %v2419_v39  ;;  %v1698_v22 = vsel %vm839_vm3, %v2419_v39, 0.0  ;;  %v1759_v53 = vmul.f32 %v2419_v39, %v2419_v39 }
 0x218   : > { %v1798_v35 = vadd.f32 %v1797_v56, %v1796_v23  ;;  %1660 = vst.msk [vmem:[%s3685_s13 + $0x2c] sm:$0xf] %vm1648_vm6, %v2141_v17  ;;  %v1699_v32 = vadd.f32 %v1698_v22, %v1697_v44  ;;  %v1700_v57 = vsel %vm839_vm3, %v2416_v43, 0.0  ;;  %v1761_v60 = vmul.f32 %v2418_v54, %v2418_v54 }
 0x219   : > { %v2386_v9 = vpop.f32.mrb[12].mxu0  ;;  %1658 = vst.msk [vmem:[%s3685_s13 + $0x24] sm:$0xf] %vm1648_vm6, %v2139_v59  ;;  %v1799_v10 = vsel %vm839_vm3, %v1759_v53, 0.0  ;;  %v1801_v29 = vsel %vm839_vm3, %v1760_v15, 0.0 }
 0x21a   : > { %v2420_v41 = vadd.f32 %v2386_v9, %v3675_v36  ;;  %v1409_v6 = vpop.f32.mrb[13].mxu0  ;;  %v1701_v51 = vadd.f32 %v1700_v57, %v1699_v32  ;;  %v1800_v21 = vadd.f32 %v1799_v10, %v1798_v35  ;;  %v1702_v36 = vsel %vm839_vm3, %v2418_v54, 0.0 }
 0x21b   : > { %v2421_v2 = vadd.f32 %v1409_v6, %v3677_v7  ;;  %v2387_v18 = vpop.f32.mrb[14].mxu0  ;;  %v1803_v4 = vsel %vm839_vm3, %v1761_v60, 0.0 }
 0x21c   : > { %v2144_v55 = vpack.c.bf16 %v2420_v41, %v2420_v41  ;;  %v1412_v52 = vpop.f32.mrb[15].mxu0  ;;  %v1802_v45 = vadd.f32 %v1801_v29, %v1800_v21  ;;  %v1703_v46 = vadd.f32 %v1702_v36, %v1701_v51  ;;  %v2422_v7 = vadd.f32 %v2387_v18, %v3679_v1 }
 0x21d   : > { %v2142_v24 = vpack.c.bf16 %v2421_v2, %v2421_v2  ;;  %v1704_v26 = vsel %vm839_vm3, %v2421_v2, 0.0  ;;  %v1762_v16 = vmul.f32 %v2421_v2, %v2421_v2  ;;  %v2423_v3 = vadd.f32 %v1412_v52, %v3681_v50 }
 0x21e   : > { %1663 = vst.msk [vmem:[%s3685_s13 + $0x38] sm:$0xf] %vm1648_vm6, %v2144_v55  ;;  %v2354_v48 = vpop.f32.mrb[16].mxu1  ;;  %v1764_v63 = vmul.f32 %v2420_v41, %v2420_v41  ;;  %v1705_v5 = vadd.f32 %v1704_v26, %v1703_v46  ;;  %v1804_v49 = vadd.f32 %v1803_v4, %v1802_v45  ;;  %v2145_v58 = vpack.c.bf16 %v2422_v7, %v2422_v7 }
 0x21f   : > { %1661 = vst.msk [vmem:[%s3685_s13 + $0x30] sm:$0xf] %vm1648_vm6, %v2142_v24  ;;  %v1805_v30 = vsel %vm839_vm3, %v1762_v16, 0.0  ;;  %v1248_v47 = vpop.f32.mrb[17].mxu1  ;;  %v2143_v0 = vpack.c.bf16 %v2423_v3, %v2423_v3  ;;  %v1706_v1 = vsel %vm839_vm3, %v2423_v3, 0.0  ;;  %v1763_v43 = vmul.f32 %v2423_v3, %v2423_v3 }
 0x220   : > { %v2355_v42 = vpop.f32.mrb[18].mxu1  ;;  %v1806_v33 = vadd.f32 %v1805_v30, %v1804_v49  ;;  %1664 = vst.msk [vmem:[%s3685_s13 + $0x3c] sm:$0xf] %vm1648_vm6, %v2145_v58  ;;  %v1707_v62 = vadd.f32 %v1706_v1, %v1705_v5  ;;  %v1708_v28 = vsel %vm839_vm3, %v2420_v41, 0.0  ;;  %v1765_v19 = vmul.f32 %v2422_v7, %v2422_v7 }
 0x221   : > { %v1251_v50 = vpop.f32.mrb[19].mxu1  ;;  %v2390_v31 = vpop.f32.mrb[16].mxu0  ;;  %1662 = vst.msk [vmem:[%s3685_s13 + $0x34] sm:$0xf] %vm1648_vm6, %v2143_v0  ;;  %v1807_v11 = vsel %vm839_vm3, %v1763_v43, 0.0  ;;  %v1809_v61 = vsel %vm839_vm3, %v1764_v63, 0.0 }
 0x222   : > { %v2424_v37 = vadd.f32 %v2390_v31, %v2354_v48  ;;  %v1425_v25 = vpop.f32.mrb[17].mxu0  ;;  %v1709_v38 = vadd.f32 %v1708_v28, %v1707_v62  ;;  %v1808_v34 = vadd.f32 %v1807_v11, %v1806_v33  ;;  %v1710_v12 = vsel %vm839_vm3, %v2422_v7, 0.0 }
 0x223   : > { %v2425_v14 = vadd.f32 %v1425_v25, %v1248_v47  ;;  %v2391_v8 = vpop.f32.mrb[18].mxu0  ;;  %v1811_v17 = vsel %vm839_vm3, %v1765_v19, 0.0 }
 0x224   : > { %v2148_v20 = vpack.c.bf16 %v2424_v37, %v2424_v37  ;;  %v1428_v27 = vpop.f32.mrb[19].mxu0  ;;  %v1810_v40 = vadd.f32 %v1809_v61, %v1808_v34  ;;  %v1711_v56 = vadd.f32 %v1710_v12, %v1709_v38  ;;  %v2426_v15 = vadd.f32 %v2391_v8, %v2355_v42 }
 0x225   : > { %v2146_v13 = vpack.c.bf16 %v2425_v14, %v2425_v14  ;;  %v1712_v54 = vsel %vm839_vm3, %v2425_v14, 0.0  ;;  %v1766_v39 = vmul.f32 %v2425_v14, %v2425_v14  ;;  %v2427_v44 = vadd.f32 %v1428_v27, %v1251_v50 }
 0x226   : > { %1667 = vst.msk [vmem:[%s3685_s13 + $0x48] sm:$0xf] %vm1648_vm6, %v2148_v20  ;;  %v2358_v23 = vpop.f32.mrb[20].mxu1  ;;  %v1768_v53 = vmul.f32 %v2424_v37, %v2424_v37  ;;  %v1713_v9 = vadd.f32 %v1712_v54, %v1711_v56  ;;  %v1812_v35 = vadd.f32 %v1811_v17, %v1810_v40  ;;  %v2149_v32 = vpack.c.bf16 %v2426_v15, %v2426_v15 }
 0x227   : > { %1665 = vst.msk [vmem:[%s3685_s13 + $0x40] sm:$0xf] %vm1648_vm6, %v2146_v13  ;;  %v1813_v59 = vsel %vm839_vm3, %v1766_v39, 0.0  ;;  %v1264_v22 = vpop.f32.mrb[21].mxu1  ;;  %v2147_v6 = vpack.c.bf16 %v2427_v44, %v2427_v44  ;;  %v1714_v57 = vsel %vm839_vm3, %v2427_v44, 0.0  ;;  %v1767_v60 = vmul.f32 %v2427_v44, %v2427_v44 }
 0x228   : > { %v2359_v41 = vpop.f32.mrb[22].mxu1  ;;  %v1814_v18 = vadd.f32 %v1813_v59, %v1812_v35  ;;  %1668 = vst.msk [vmem:[%s3685_s13 + $0x4c] sm:$0xf] %vm1648_vm6, %v2149_v32  ;;  %v1715_v29 = vadd.f32 %v1714_v57, %v1713_v9  ;;  %v1716_v55 = vsel %vm839_vm3, %v2424_v37, 0.0  ;;  %v1769_v52 = vmul.f32 %v2426_v15, %v2426_v15 }
 0x229   : > { %v1267_v10 = vpop.f32.mrb[23].mxu1  ;;  %v2394_v2 = vpop.f32.mrb[20].mxu0  ;;  %1666 = vst.msk [vmem:[%s3685_s13 + $0x44] sm:$0xf] %vm1648_vm6, %v2147_v6  ;;  %v1815_v36 = vsel %vm839_vm3, %v1767_v60, 0.0  ;;  %v1817_v16 = vsel %vm839_vm3, %v1768_v53, 0.0 }
 0x22a   : > { %v2428_v51 = vadd.f32 %v2394_v2, %v2358_v23  ;;  %v1441_v21 = vpop.f32.mrb[21].mxu0  ;;  %v1717_v45 = vadd.f32 %v1716_v55, %v1715_v29  ;;  %v1816_v46 = vadd.f32 %v1815_v36, %v1814_v18  ;;  %v1718_v48 = vsel %vm839_vm3, %v2426_v15, 0.0 }
 0x22b   : > { %v2429_v24 = vadd.f32 %v1441_v21, %v1264_v22  ;;  %v2395_v26 = vpop.f32.mrb[22].mxu0  ;;  %v1819_v0 = vsel %vm839_vm3, %v1769_v52, 0.0 }
 0x22c   : > { %v2152_v7 = vpack.c.bf16 %v2428_v51, %v2428_v51  ;;  %v1444_v3 = vpop.f32.mrb[23].mxu0  ;;  %v1818_v63 = vadd.f32 %v1817_v16, %v1816_v46  ;;  %v1719_v5 = vadd.f32 %v1718_v48, %v1717_v45  ;;  %v2430_v49 = vadd.f32 %v2395_v26, %v2359_v41 }
 0x22d   : > { %v2150_v4 = vpack.c.bf16 %v2429_v24, %v2429_v24  ;;  %v1720_v30 = vsel %vm839_vm3, %v2429_v24, 0.0  ;;  %v1770_v47 = vmul.f32 %v2429_v24, %v2429_v24  ;;  %v2431_v58 = vadd.f32 %v1444_v3, %v1267_v10 }
 0x22e   : > { %1671 = vst.msk [vmem:[%s3685_s13 + $0x58] sm:$0xf] %vm1648_vm6, %v2152_v7  ;;  %v2362_v42 = vpop.f32.mrb[24].mxu1  ;;  %v1772_v50 = vmul.f32 %v2428_v51, %v2428_v51  ;;  %v1721_v31 = vadd.f32 %v1720_v30, %v1719_v5  ;;  %v1820_v33 = vadd.f32 %v1819_v0, %v1818_v63  ;;  %v2153_v62 = vpack.c.bf16 %v2430_v49, %v2430_v49 }
 0x22f   : > { %1669 = vst.msk [vmem:[%s3685_s13 + $0x50] sm:$0xf] %vm1648_vm6, %v2150_v4  ;;  %v1821_v1 = vsel %vm839_vm3, %v1770_v47, 0.0  ;;  %v1280_v43 = vpop.f32.mrb[25].mxu1  ;;  %v2151_v25 = vpack.c.bf16 %v2431_v58, %v2431_v58  ;;  %v1722_v28 = vsel %vm839_vm3, %v2431_v58, 0.0  ;;  %v1771_v19 = vmul.f32 %v2431_v58, %v2431_v58 }
 0x230   : > { %v2363_v37 = vpop.f32.mrb[26].mxu1  ;;  %v1822_v8 = vadd.f32 %v1821_v1, %v1820_v33  ;;  %1672 = vst.msk [vmem:[%s3685_s13 + $0x5c] sm:$0xf] %vm1648_vm6, %v2153_v62  ;;  %v1723_v61 = vadd.f32 %v1722_v28, %v1721_v31  ;;  %v1724_v20 = vsel %vm839_vm3, %v2428_v51, 0.0  ;;  %v1773_v27 = vmul.f32 %v2430_v49, %v2430_v49 }
 0x231   : > { %v1283_v11 = vpop.f32.mrb[27].mxu1  ;;  %v2398_v14 = vpop.f32.mrb[24].mxu0  ;;  %1670 = vst.msk [vmem:[%s3685_s13 + $0x54] sm:$0xf] %vm1648_vm6, %v2151_v25  ;;  %v1823_v12 = vsel %vm839_vm3, %v1771_v19, 0.0  ;;  %v1825_v39 = vsel %vm839_vm3, %v1772_v50, 0.0 }
 0x232   : > { %v2432_v38 = vadd.f32 %v2398_v14, %v2362_v42  ;;  %v1457_v34 = vpop.f32.mrb[25].mxu0  ;;  %v1725_v40 = vadd.f32 %v1724_v20, %v1723_v61  ;;  %v1824_v56 = vadd.f32 %v1823_v12, %v1822_v8  ;;  %v1726_v23 = vsel %vm839_vm3, %v2430_v49, 0.0 }
 0x233   : > { %v2433_v13 = vadd.f32 %v1457_v34, %v1280_v43  ;;  %v2399_v54 = vpop.f32.mrb[26].mxu0  ;;  %v1827_v6 = vsel %vm839_vm3, %v1773_v27, 0.0 }
 0x234   : > { %v2156_v15 = vpack.c.bf16 %v2432_v38, %v2432_v38  ;;  %v1460_v44 = vpop.f32.mrb[27].mxu0  ;;  %v1826_v53 = vadd.f32 %v1825_v39, %v1824_v56  ;;  %v1727_v9 = vadd.f32 %v1726_v23, %v1725_v40  ;;  %v2434_v35 = vadd.f32 %v2399_v54, %v2363_v37 }
 0x235   : > { %v2154_v17 = vpack.c.bf16 %v2433_v13, %v2433_v13  ;;  %v1728_v59 = vsel %vm839_vm3, %v2433_v13, 0.0  ;;  %v1774_v22 = vmul.f32 %v2433_v13, %v2433_v13  ;;  %v2435_v32 = vadd.f32 %v1460_v44, %v1283_v11 }
 0x236   : > { %1675 = vst.msk [vmem:[%s3685_s13 + $0x68] sm:$0xf] %vm1648_vm6, %v2156_v15  ;;  %v2366_v41 = vpop.f32.mrb[28].mxu1  ;;  %v1776_v10 = vmul.f32 %v2432_v38, %v2432_v38  ;;  %v1729_v2 = vadd.f32 %v1728_v59, %v1727_v9  ;;  %v1828_v18 = vadd.f32 %v1827_v6, %v1826_v53  ;;  %v2157_v29 = vpack.c.bf16 %v2434_v35, %v2434_v35 }
 0x237   : > { %1673 = vst.msk [vmem:[%s3685_s13 + $0x60] sm:$0xf] %vm1648_vm6, %v2154_v17  ;;  %v1829_v57 = vsel %vm839_vm3, %v1774_v22, 0.0  ;;  %v1296_v60 = vpop.f32.mrb[29].mxu1  ;;  %v2155_v21 = vpack.c.bf16 %v2435_v32, %v2435_v32  ;;  %v1730_v55 = vsel %vm839_vm3, %v2435_v32, 0.0  ;;  %v1775_v52 = vmul.f32 %v2435_v32, %v2435_v32 }
 0x238   : > { %v2367_v51 = vpop.f32.mrb[30].mxu1  ;;  %v1830_v26 = vadd.f32 %v1829_v57, %v1828_v18  ;;  %1676 = vst.msk [vmem:[%s3685_s13 + $0x6c] sm:$0xf] %vm1648_vm6, %v2157_v29  ;;  %v1731_v16 = vadd.f32 %v1730_v55, %v1729_v2  ;;  %v1732_v7 = vsel %vm839_vm3, %v2432_v38, 0.0  ;;  %v1777_v3 = vmul.f32 %v2434_v35, %v2434_v35 }
 0x239   : > { %v1299_v36 = vpop.f32.mrb[31].mxu1  ;;  %v2402_v24 = vpop.f32.mrb[28].mxu0  ;;  %1674 = vst.msk [vmem:[%s3685_s13 + $0x64] sm:$0xf] %vm1648_vm6, %v2155_v21  ;;  %v1831_v48 = vsel %vm839_vm3, %v1775_v52, 0.0  ;;  %v1833_v47 = vsel %vm839_vm3, %v1776_v10, 0.0 }
 0x23a   : > { %v2436_v45 = vadd.f32 %v2402_v24, %v2366_v41  ;;  %v1473_v46 = vpop.f32.mrb[29].mxu0  ;;  %v1733_v63 = vadd.f32 %v1732_v7, %v1731_v16  ;;  %v1832_v5 = vadd.f32 %v1831_v48, %v1830_v26  ;;  %v1734_v42 = vsel %vm839_vm3, %v2434_v35, 0.0 }
 0x23b   : > { %v2437_v4 = vadd.f32 %v1473_v46, %v1296_v60  ;;  %v2403_v30 = vpop.f32.mrb[30].mxu0  ;;  %v1835_v37 = vsel %vm839_vm3, %v1777_v3, 0.0 }
 0x23c   : > { %v2160_v49 = vpack.c.bf16 %v2436_v45, %v2436_v45  ;;  %v1476_v58 = vpop.f32.mrb[31].mxu0  ;;  %v1834_v50 = vadd.f32 %v1833_v47, %v1832_v5  ;;  %v1735_v31 = vadd.f32 %v1734_v42, %v1733_v63  ;;  %v2438_v33 = vadd.f32 %v2403_v30, %v2367_v51 }
 0x23d   : > { %v2158_v0 = vpack.c.bf16 %v2437_v4, %v2437_v4  ;;  %v1736_v1 = vsel %vm839_vm3, %v2437_v4, 0.0  ;;  %v1778_v43 = vmul.f32 %v2437_v4, %v2437_v4  ;;  %v2439_v62 = vadd.f32 %v1476_v58, %v1299_v36 }
 0x23e   : > { %1679 = vst.msk [vmem:[%s3685_s13 + $0x78] sm:$0xf] %vm1648_vm6, %v2160_v49  ;;  %v1737_v28 = vadd.f32 %v1736_v1, %v1735_v31  ;;  %v1836_v19 = vadd.f32 %v1835_v37, %v1834_v50  ;;  %v2161_v11 = vpack.c.bf16 %v2438_v33, %v2438_v33  ;;  %v1780_v14 = vmul.f32 %v2436_v45, %v2436_v45 }
 0x23f   : > { %1677 = vst.msk [vmem:[%s3685_s13 + $0x70] sm:$0xf] %vm1648_vm6, %v2158_v0  ;;  %v1837_v25 = vsel %vm839_vm3, %v1778_v43, 0.0  ;;  %v2159_v8 = vpack.c.bf16 %v2439_v62, %v2439_v62  ;;  %v1738_v61 = vsel %vm839_vm3, %v2439_v62, 0.0  ;;  %v1779_v38 = vmul.f32 %v2439_v62, %v2439_v62 }
 0x240   : > { %v1838_v34 = vadd.f32 %v1837_v25, %v1836_v19  ;;  %1680 = vst.msk [vmem:[%s3685_s13 + $0x7c] sm:$0xf] %vm1648_vm6, %v2161_v11  ;;  %v1739_v20 = vadd.f32 %v1738_v61, %v1737_v28  ;;  %v1740_v27 = vsel %vm839_vm3, %v2436_v45, 0.0  ;;  %v1781_v12 = vmul.f32 %v2438_v33, %v2438_v33 }
 0x241   : > { %1678 = vst.msk [vmem:[%s3685_s13 + $0x74] sm:$0xf] %vm1648_vm6, %v2159_v8  ;;  %v1839_v13 = vsel %vm839_vm3, %v1779_v38, 0.0 }
 0x242   : > { %v1741_v54 = vadd.f32 %v1740_v27, %v1739_v20  ;;  %v1840_v39 = vadd.f32 %v1839_v13, %v1838_v34 }
 0x243   : > { %2698 = shalt.err (!%p2695_p13)
}
 0x244   : > { %s2699_s9 = scalar_lea.hbm %s3818_s10, 2048  ;;  %s2703_s26 = scalar_lea.hbm %s3910_s4, 4096 }
 0x245   : > { %p2700_p0 = scmp.ne.s32.totalorder %s3818_s10, %s2699_s9  ;;  %p2704_p9 = scmp.lt.u32.totalorder %s3818_s10, %s3910_s4 }
 0x246   : > { %p2705_p12 = scmp.lt.u32.totalorder %s2703_s26, %s2699_s9  ;;  %p2707_p1 = scmp.lt.u32.totalorder %s2699_s9, %s3818_s10 }
 0x247   : > { %p2701_p5 = pnand %p2700_p0, %p2982_p6 }
 0x248   : > { %p2706_p2 = por %p2705_p12, %p2704_p9 }
 0x249   : > { %p2702_p11 = pneg %p2701_p5 }
 0x24a   : > { %p2708_p4 = por %p2707_p1, %p2706_p2 }
 0x24c   : > { %p2709_p8 = pnand %p2708_p4, %p2702_p11 }
 0x24e   : > { %2712 = shalt.err (!%p2709_p8)
}
 0x24f   : > { %s2803_s30 = smov 64   ;;  %s2804_s28 = smov 4   ;;  %v1841_v40 = vsel %vm839_vm3, %v1780_v14, 0.0  ;;  %v1742_v56 = vsel %vm839_vm3, %v2438_v33, 0.0  ;;  %v1843_v23 = vsel %vm839_vm3, %v1781_v12, 0.0  ;;  %vm1852_vm7 = vcmask 58368  }
 0x250   : > { %2490 = dma.vmem_to_hbm [thread:$0]  (%p2982_p6), %s3820_s11, 2048, %s3818_s10, %s1855_s29, %s2803_s30, %s2803_s30, %s2804_s28   ;;  %v1743_v15 = vadd.f32 %v1742_v56, %v1741_v54  ;;  %v1842_v44 = vadd.f32 %v1841_v40, %v1840_v39 }
 0x251   : > { %s2035_s12 = sshll.u32 %s3033_s17, 1  ;;  %s2126_s11 = sshll.u32 %s2857_s22, 5 }
 0x252   : > { %v1744_v17 = vrot.slane %v1743_v15, 4  ;;  %v1844_v59 = vadd.f32 %v1843_v23, %v1842_v44  ;;  %s293_s10 = scalar_lea.vmem [#allocation11], %s2035_s12  ;;  %s3861_s8 = scalar_lea.hbm %s3911_s5, %s2126_s11 }
 0x253   : > { %s1889_s29 = sshll.u32 %s293_s10, 4  ;;  %s1860_s9 = scalar_lea.sflag [#allocation12], %s3033_s17  ;;  %s3863_s29 = int_to_ptr.vmem [resolvable:$true] %s1889_s29 }
 0x254   : > { %v1745_v22 = vadd.f32 %v1744_v17, %v1743_v15  ;;  %v1845_v53 = vrot.slane %v1844_v59, 4  ;;  %s2713_s22 = scalar_lea.vmem %s3863_s29, 32  ;;  %s2805_s15 = smov [#allocation11]  }
 0x255   : > { %p2714_p3 = scmp.ne.s32.totalorder %s3863_s29, %s2713_s22  ;;  %s2717_s24 = sshll.u32 %s2805_s15, 4  ;;  %s2718_s24 = int_to_ptr.vmem [resolvable:$false] %s2717_s24 }
 0x256   : > { %v1746_v9 = vrot.slane %v1745_v22, 2  ;;  %v1846_v35 = vadd.f32 %v1845_v53, %v1844_v59  ;;  %s2719_s26 = scalar_lea.vmem %s2718_s24, 64  ;;  %p2720_p13 = scmp.lt.s32.totalorder %s3863_s29, %s2718_s24 }
 0x257   : > { %p2715_p7 = pnand %p2714_p3, %p2982_p6  ;;  %p2721_p0 = scmp.lt.s32.totalorder %s2719_s26, %s2713_s22 }
 0x258   : > { %v1747_v32 = vadd.f32 %v1746_v9, %v1745_v22  ;;  %v1847_v41 = vrot.slane %v1846_v35, 2 }
 0x259   : > { %p2716_p10 = pneg %p2715_p7  ;;  %p2722_p5 = por %p2721_p0, %p2720_p13 }
 0x25a   : > { %v1748_v6 = vrot.slane %v1747_v32, 1  ;;  %v1848_v57 = vadd.f32 %v1847_v41, %v1846_v35 }
 0x25b   : > { %p2723_p11 = pnand %p2722_p5, %p2716_p10 }
 0x25c   : > { %v1849_v60 = vrot.slane %v1848_v57, 1  ;;  %v1749_v10 = vadd.f32 %v1748_v6, %v1747_v32 }
 0x25e   : > { %v1850_v2 = vadd.f32 %v1849_v60, %v1848_v57 }
 0x260   : > { %v1851_v18 = vsel %vm501_vm2, %v1749_v10, %v1850_v2 }
 0x261   : > { %1853 = vst.msk [vmem:[%s293_s10] sm:$0x3] %vm1852_vm7, %v1851_v18 }
 0x262   : > { %2726 = shalt.err (!%p2723_p11)
}
 0x263   : > { %s2727_s17 = scalar_lea.hbm %s3861_s8, 32  ;;  %s2731_s30 = scalar_lea.hbm %s3911_s5, 64 }
 0x264   : > { %p2728_p9 = scmp.ne.s32.totalorder %s3861_s8, %s2727_s17  ;;  %p2732_p1 = scmp.lt.u32.totalorder %s3861_s8, %s3911_s5 }
 0x265   : > { %p2733_p4 = scmp.lt.u32.totalorder %s2731_s30, %s2727_s17  ;;  %p2735_p3 = scmp.lt.u32.totalorder %s2727_s17, %s3861_s8 }
 0x266   : > { %p2729_p12 = pnand %p2728_p9, %p2982_p6 }
 0x267   : > { %p2734_p8 = por %p2733_p4, %p2732_p1 }
 0x268   : > { %p2730_p2 = pneg %p2729_p12 }
 0x269   : > { %p2736_p7 = por %p2735_p3, %p2734_p8 }
 0x26b   : > { %p2737_p10 = pnand %p2736_p7, %p2730_p2 }
 0x26d   : > { %2740 = shalt.err (!%p2737_p10)
}
 0x26e   : > { %2491 = dma.vmem_to_hbm [thread:$0]  (%p2982_p6), %s3863_s29, 32, %s3861_s8, %s1860_s9  }
 0x26f PF: > { %s1901_s11 = sand.u32 1, %s2779_s18   ;;  %p3929_p13 = scmp.ne.s32.totalorder %s3916_s25, 0 }
 0x270   : > { %p3930_p0 = scmp.ge.s32.totalorder %s2791_s21, 2  ;;  %s1902_s10 = scalar_lea.sflag [#allocation4], %s1901_s11 }
 0x272   : > { %p2509_p5 = pnand %p3930_p0, %p3929_p13 }
 0x274   : > { %2770 = dma.done.wait (!%p2509_p5), %s1902_s10, 2048  }
 0x275   : > { %2772 = vsyncadd (!%p2509_p5), %s1902_s10, 4294965248  ;;  %s1911_s23 = scalar_lea.sflag [#allocation12], %s1901_s11 }
 0x276   : > { %2774 = dma.done.wait (!%p2509_p5), %s1911_s23, 32  }
 0x277   : > { %2776 = vsyncadd (!%p2509_p5), %s1911_s23, 4294967264  ;;  %p24_p6 = scmp.ge.s32.totalorder %s2968_s16, 4   ;;  %s3931_s18 = smov %s2783_s19 }
 0x278   : > { %s3932_s19 = smov %s2787_s20  ;;  %s3933_s20 = smov %s2978_s27 }
 0x279   : > { %s3934_s21 = smov %s2968_s16  ;;  %26 = sbr.rel (!%p24_p6) target bundleno = 9 (0x9), region = 112 }
 0x280   :  { %1916 = vsyncpa [#allocation3], 1 }
 0x281   :  { %1918 = vsyncpa [#allocation3 + $0x1], 1 }
 0x282   :  { %1919 = vsyncpa [#allocation6], 1 }
 0x283   :  { %1920 = vsyncpa [#allocation9], 1 }
 0x284   :  { %1921 = vsyncpa [#allocation4], 1 }
 0x285   :  { %1923 = vsyncpa [#allocation4 + $0x1], 1 }
 0x286   :  { %1924 = vsyncpa [#allocation12], 1 }
 0x287   :  { %1926 = vsyncpa [#allocation12 + $0x1], 1 }

// kernel: bottleneck_identity_forward.6
= control target key start
LH: loop header
LB: loop body
LE: loop exit
PB: predicated region body
PF: predicated region fallthrough
CT: control target
= control target key end

     0   :  { %11 = vsyncpa [#allocation3], 0  ;;  %s2828_s0 = inlined_call_operand.hbm [shape: bf16[512,8], index: 0, kind: input, shape index: {}]   ;;  %s2829_s1 = inlined_call_operand.hbm [shape: f32[1,8], index: 1, kind: input, shape index: {}]   ;;  %s2830_s2 = inlined_call_operand.hbm [shape: f32[1,8], index: 2, kind: input, shape index: {}]   ;;  %s2831_s3 = inlined_call_operand.hbm [shape: bf16[8,4], index: 3, kind: input, shape index: {}]   ;;  %s2832_s4 = inlined_call_operand.hbm [shape: bf16[512,4], index: 4, kind: output, shape index: {0}]   ;;  %s2833_s5 = inlined_call_operand.hbm [shape: f32[1,2,4], index: 5, kind: output, shape index: {1}]  }
   0x1   :  { %12 = vsyncpa [#allocation6], 0 }
   0x2   :  { %13 = vsyncpa [#allocation9], 0 }
   0x3   :  { %14 = vsyncpa [#allocation4], 0 }
   0x4   :  { %15 = vsyncpa [#allocation12], 0  ;;  %s2091_s18 = smov [#allocation5]   ;;  %s2092_s20 = smov [#allocation2]  }
   0x5   :  { %s34_s19 = sshll.u32 %s2091_s18, 4  ;;  %s21_s21 = sshll.u32 %s2092_s20, 4  ;;  %s35_s19 = int_to_ptr.vmem [resolvable:$true] %s34_s19  ;;  %s2129_s21 = int_to_ptr.vmem [resolvable:$true] %s21_s21 }
   0x6   :  { %s1949_s24 = scalar_lea.hbm %s2829_s1, 16 }
   0x7   :  { %p1950_p0 = scmp.ne.s32.totalorder %s2829_s1, %s1949_s24  ;;  %p1953_p1 = scmp.lt.u32.totalorder %s1949_s24, %s2829_s1 }
   0x9   :  { %p1955_p2 = pnand %p1953_p1, %p1950_p0 }
   0xb   :  { %1958 = shalt.err (!%p1955_p2)
}
   0xc   :  { %s1959_s29 = scalar_lea.vmem %s35_s19, 16  ;;  %s1963_s30 = scalar_lea.vmem %s35_s19, 32 }
   0xd   :  { %p1960_p3 = scmp.ne.s32.totalorder %s35_s19, %s1959_s29  ;;  %p1964_p4 = scmp.lt.s32.totalorder %s35_s19, %s35_s19 }
   0xe   :  { %p1965_p5 = scmp.lt.s32.totalorder %s1963_s30, %s1959_s29 }
  0x10   :  { %p1966_p6 = por %p1965_p5, %p1964_p4 }
  0x12   :  { %p1967_p7 = pnand %p1966_p6, %p1960_p3 }
  0x14   :  { %1970 = shalt.err (!%p1967_p7)
}
  0x15   :  { %37 = dma.hbm_to_vmem [thread:$0]  %s2829_s1, 16, %s35_s19, [#allocation6]  }
  0x16   :  { %s1971_s10 = scalar_lea.hbm %s2828_s0, 4096 }
  0x17   :  { %p1972_p8 = scmp.ne.s32.totalorder %s2828_s0, %s1971_s10  ;;  %p1975_p9 = scmp.lt.u32.totalorder %s1971_s10, %s2828_s0 }
  0x19   :  { %p1977_p10 = pnand %p1975_p9, %p1972_p8 }
  0x1b   :  { %1980 = shalt.err (!%p1977_p10)
}
  0x1c   :  { %s1981_s15 = scalar_lea.vmem %s2129_s21, 4096  ;;  %p1986_p12 = scmp.lt.s32.totalorder %s2129_s21, %s2129_s21 }
  0x1d   :  { %p1982_p11 = scmp.ne.s32.totalorder %s2129_s21, %s1981_s15  ;;  %p1987_p13 = scmp.lt.s32.totalorder %s1981_s15, %s1981_s15 }
  0x1f   :  { %p1988_p0 = por %p1987_p13, %p1986_p12 }
  0x21   :  { %p1989_p1 = pnand %p1988_p0, %p1982_p11 }
  0x23   :  { %1992 = shalt.err (!%p1989_p1)
}
  0x24   :  { %s2093_s1 = smov 64   ;;  %s2094_s16 = smov 4  }
  0x25   :  { %27 = dma.hbm_to_vmem [thread:$0]  %s2828_s0, 4096, %s2129_s21, [#allocation3], %s2093_s1, %s2093_s1, %s2094_s16  }
  0x26   :  { %s2095_s19 = smov [#allocation7]   ;;  %s2096_s22 = smov [#allocation8]  }
  0x27   :  { %s44_s20 = sshll.u32 %s2095_s19, 4  ;;  %s54_s23 = sshll.u32 %s2096_s22, 4  ;;  %s45_s20 = int_to_ptr.vmem [resolvable:$true] %s44_s20  ;;  %s55_s23 = int_to_ptr.vmem [resolvable:$true] %s54_s23 }
  0x28   :  { %s1993_s26 = scalar_lea.hbm %s2830_s2, 16 }
  0x29   :  { %p1994_p2 = scmp.ne.s32.totalorder %s2830_s2, %s1993_s26  ;;  %p1997_p3 = scmp.lt.u32.totalorder %s1993_s26, %s2830_s2 }
  0x2b   :  { %p1999_p4 = pnand %p1997_p3, %p1994_p2 }
  0x2d   :  { %2002 = shalt.err (!%p1999_p4)
}
  0x2e   :  { %s2003_s0 = scalar_lea.vmem %s45_s20, 16  ;;  %s2007_s21 = scalar_lea.vmem %s45_s20, 32 }
  0x2f   :  { %p2004_p5 = scmp.ne.s32.totalorder %s45_s20, %s2003_s0  ;;  %p2008_p6 = scmp.lt.s32.totalorder %s45_s20, %s45_s20 }
  0x30   :  { %p2009_p7 = scmp.lt.s32.totalorder %s2007_s21, %s2003_s0 }
  0x32   :  { %p2010_p8 = por %p2009_p7, %p2008_p6 }
  0x34   :  { %p2011_p9 = pnand %p2010_p8, %p2004_p5 }
  0x36   :  { %2014 = shalt.err (!%p2011_p9)
}
  0x37   :  { %47 = dma.hbm_to_vmem [thread:$0]  %s2830_s2, 16, %s45_s20, [#allocation6]  }
  0x38   :  { %s2015_s10 = scalar_lea.hbm %s2831_s3, 64 }
  0x39   :  { %p2016_p10 = scmp.ne.s32.totalorder %s2831_s3, %s2015_s10  ;;  %p2019_p11 = scmp.lt.u32.totalorder %s2015_s10, %s2831_s3 }
  0x3b   :  { %p2021_p12 = pnand %p2019_p11, %p2016_p10 }
  0x3d   :  { %2024 = shalt.err (!%p2021_p12)
}
  0x3e   :  { %s2025_s15 = scalar_lea.vmem %s55_s23, 64  ;;  %p2030_p0 = scmp.lt.s32.totalorder %s55_s23, %s55_s23 }
  0x3f   :  { %p2026_p13 = scmp.ne.s32.totalorder %s55_s23, %s2025_s15  ;;  %p2031_p1 = scmp.lt.s32.totalorder %s2025_s15, %s2025_s15 }
  0x41   :  { %p2032_p2 = por %p2031_p1, %p2030_p0 }
  0x43   :  { %p2033_p3 = pnand %p2032_p2, %p2026_p13 }
  0x45   :  { %2036 = shalt.err (!%p2033_p3)
}
  0x46   :  { %57 = dma.hbm_to_vmem [thread:$0]  %s2831_s3, 64, %s55_s23, [#allocation9]  }
  0x47   :  { %2081 = dma.done.wait [#allocation3], 4096  }
  0x48   :  { %2082 = vsyncadd [#allocation3], 4294963200 }
  0x49   :  { %2083 = dma.done.wait [#allocation6], 32  }
  0x4a   :  { %2084 = vsyncadd [#allocation6], 4294967264 }
  0x4b   :  { %2085 = dma.done.wait [#allocation9], 64  }
  0x4c   :  { %2086 = vsyncadd [#allocation9], 4294967232  ;;  %vm535_vm0 = vcmask 1043456   ;;  %v437_v0 = vld [vmem:[#allocation8] sm:$0xf]  ;;  %vm438_vm1 = vcmask 64512  }
  0x4d   :  { %v1680_v1 = vld [vmem:[#allocation2] sm:$0xff]   ;;  %1939 = vmatprep.subr.msk.bf16.mxu0 %vm535_vm0, %v437_v0  ;;  %v537_v3 = vsel %vm535_vm0, %v437_v0, 0  ;;  %v1807_v6 = vld [vmem:[#allocation2 + $0x8] sm:$0xff]   ;;  %v1808_v7 = vld [vmem:[#allocation2 + $0x10] sm:$0xff]   ;;  %1940 = vmatprep.subr.msk.bf16.mxu1 %vm535_vm0, %v437_v0  ;;  %vm1084_vm2 = vcmask 27648   ;;  %vm1149_vm3 = vcmask 31744  }
  0x4e   :  { %v2187_v2 = vld [vmem:[#allocation5] ss:$0 sm:$0xff]  ;;  %v1681_v4 = vunpack.c.l.bf16 %v1680_v1  ;;  %v1682_v5 = vunpack.c.h.bf16 %v1680_v1  ;;  %1872 = vmatpush3.bf16.msra.mxu0 %v537_v3  ;;  %v2189_v8 = vld [vmem:[#allocation7] ss:$0 sm:$0xff]  ;;  %v1685_v9 = vunpack.c.l.bf16 %v1807_v6  ;;  %v1686_v10 = vunpack.c.h.bf16 %v1807_v6  ;;  %v1809_v13 = vld [vmem:[#allocation2 + $0x18] sm:$0xff]   ;;  %1938 = vmatpush3.bf16.msra.mxu1 %v537_v3  ;;  %s2097_s3 = smov [#allocation10]  }
  0x4f   :  { %v1689_v11 = vunpack.c.l.bf16 %v1808_v7  ;;  %v1690_v12 = vunpack.c.h.bf16 %v1808_v7  ;;  %v1693_v16 = vunpack.c.l.bf16 %v1809_v13  ;;  %v1694_v17 = vunpack.c.h.bf16 %v1809_v13  ;;  %v1810_v30 = vld [vmem:[#allocation2 + $0x20] sm:$0xff]   ;;  %v1811_v35 = vld [vmem:[#allocation2 + $0x28] sm:$0xff]   ;;  %v1812_v40 = vld [vmem:[#allocation2 + $0x30] sm:$0xff]   ;;  %s1489_s18 = sshll.u32 %s2097_s3, 4  ;;  %s1490_s18 = int_to_ptr.vmem [resolvable:$true] %s1489_s18 }
  0x50   :  { %v206_v14 = vmul.f32 %v1681_v4, %v2187_v2  ;;  %v207_v15 = vmul.f32 %v1682_v5, %v2187_v2  ;;  %v208_v18 = vmul.f32 %v1685_v9, %v2187_v2  ;;  %v209_v19 = vmul.f32 %v1686_v10, %v2187_v2  ;;  %v1813_v51 = vld [vmem:[#allocation2 + $0x38] sm:$0xff]   ;;  %v1814_v63 = vld [vmem:[#allocation2 + $0x40] sm:$0xff]   ;;  %v1815_v9 = vld [vmem:[#allocation2 + $0x48] sm:$0xff]   ;;  %s2037_s19 = scalar_lea.vmem %s1490_s18, 4096  ;;  %p2042_p5 = scmp.lt.s32.totalorder %s1490_s18, %s1490_s18 }
  0x51   :  { %v210_v20 = vmul.f32 %v1689_v11, %v2187_v2  ;;  %v211_v21 = vmul.f32 %v1690_v12, %v2187_v2  ;;  %v212_v24 = vmul.f32 %v1693_v16, %v2187_v2  ;;  %v213_v25 = vmul.f32 %v1694_v17, %v2187_v2  ;;  %v1816_v11 = vld [vmem:[#allocation2 + $0x50] sm:$0xff]   ;;  %p2038_p4 = scmp.ne.s32.totalorder %s1490_s18, %s2037_s19  ;;  %p2043_p6 = scmp.lt.s32.totalorder %s2037_s19, %s2037_s19 }
  0x52   :  { %v277_v22 = vadd.f32 %v2189_v8, %v206_v14  ;;  %v278_v23 = vadd.f32 %v2189_v8, %v207_v15  ;;  %v279_v26 = vadd.f32 %v2189_v8, %v208_v18  ;;  %v280_v27 = vadd.f32 %v2189_v8, %v209_v19 }
  0x53   :  { %v281_v28 = vadd.f32 %v2189_v8, %v210_v20  ;;  %v282_v29 = vadd.f32 %v2189_v8, %v211_v21  ;;  %v283_v33 = vadd.f32 %v2189_v8, %v212_v24  ;;  %v284_v34 = vadd.f32 %v2189_v8, %v213_v25  ;;  %v1817_v20 = vld [vmem:[#allocation2 + $0x58] sm:$0xff]   ;;  %p2044_p7 = por %p2043_p6, %p2042_p5 }
  0x54   :  { %v341_v31 = vmax.f32 %v277_v22, 0.0  ;;  %v342_v32 = vmax.f32 %v278_v23, 0.0  ;;  %v343_v36 = vmax.f32 %v279_v26, 0.0  ;;  %v344_v37 = vmax.f32 %v280_v27, 0.0 }
  0x55   :  { %v345_v38 = vmax.f32 %v281_v28, 0.0  ;;  %v346_v39 = vmax.f32 %v282_v29, 0.0  ;;  %v1697_v42 = vunpack.c.l.bf16 %v1810_v30  ;;  %v1698_v45 = vunpack.c.h.bf16 %v1810_v30  ;;  %p2045_p8 = pnand %p2044_p7, %p2038_p4 }
  0x56   :  { %v405_v41 = vpack.c.bf16 %v342_v32, %v341_v31  ;;  %v406_v43 = vpack.c.bf16 %v344_v37, %v343_v36  ;;  %v1701_v46 = vunpack.c.l.bf16 %v1811_v35  ;;  %v347_v47 = vmax.f32 %v283_v33, 0.0  ;;  %v1818_v31 = vld [vmem:[#allocation2 + $0x60] sm:$0xff]  }
  0x57   :  { %v407_v44 = vpack.c.bf16 %v346_v39, %v345_v38  ;;  %v214_v48 = vmul.f32 %v1697_v42, %v2187_v2  ;;  %v1702_v49 = vunpack.c.h.bf16 %v1811_v35  ;;  %v1705_v50 = vunpack.c.l.bf16 %v1812_v40 }
  0x58   :  { %1873 = vmatprep.mubr.msk.bf16.mxu0 %vm438_vm1, %v405_v41  ;;  %v348_v52 = vmax.f32 %v284_v34, 0.0  ;;  %v215_v53 = vmul.f32 %v1698_v45, %v2187_v2  ;;  %v216_v54 = vmul.f32 %v1701_v46, %v2187_v2  ;;  %v1706_v55 = vunpack.c.h.bf16 %v1812_v40 }
  0x59   :  { %1874 = vmatmul.mubr.msk.bf16.vlgmr.msra.gmra.mrb[0].mxu0 %vm438_vm1, %v406_v43  ;;  %v285_v56 = vadd.f32 %v2189_v8, %v214_v48  ;;  %v217_v57 = vmul.f32 %v1702_v49, %v2187_v2  ;;  %v218_v58 = vmul.f32 %v1705_v50, %v2187_v2  ;;  %v1709_v61 = vunpack.c.l.bf16 %v1813_v51 }
  0x5a   :  { %1877 = vmatprep.mubr.msk.bf16.mxu0 %vm438_vm1, %v407_v44  ;;  %v286_v59 = vadd.f32 %v2189_v8, %v215_v53  ;;  %v219_v60 = vmul.f32 %v1706_v55, %v2187_v2  ;;  %v1710_v62 = vunpack.c.h.bf16 %v1813_v51  ;;  %v287_v1 = vadd.f32 %v2189_v8, %v216_v54  ;;  %v1819_v44 = vld [vmem:[#allocation2 + $0x68] sm:$0xff]  }
  0x5b   :  { %v349_v0 = vmax.f32 %v285_v56, 0.0  ;;  %v288_v3 = vadd.f32 %v2189_v8, %v217_v57  ;;  %v289_v4 = vadd.f32 %v2189_v8, %v218_v58  ;;  %v408_v5 = vpack.c.bf16 %v348_v52, %v347_v47  ;;  %v1820_v56 = vld [vmem:[#allocation2 + $0x70] sm:$0xff]  }
  0x5c   :  { %v350_v6 = vmax.f32 %v286_v59, 0.0  ;;  %v290_v7 = vadd.f32 %v2189_v8, %v219_v60  ;;  %v1713_v10 = vunpack.c.l.bf16 %v1814_v63  ;;  %v220_v13 = vmul.f32 %v1709_v61, %v2187_v2 }
  0x5d   :  { %v221_v14 = vmul.f32 %v1710_v62, %v2187_v2  ;;  %v1714_v15 = vunpack.c.h.bf16 %v1814_v63  ;;  %v351_v16 = vmax.f32 %v287_v1, 0.0  ;;  %v352_v17 = vmax.f32 %v288_v3, 0.0  ;;  %v2249_v1 = vld [vmem:[#allocation2 + $0x78] sm:$0xff]   ;;  %v1822_v3 = vld [vmem:[#allocation2 + $0x80] sm:$0xff]  }
  0x5e   :  { %v409_v12 = vpack.c.bf16 %v350_v6, %v349_v0  ;;  %v353_v18 = vmax.f32 %v289_v4, 0.0  ;;  %v1717_v19 = vunpack.c.l.bf16 %v1815_v9  ;;  %v354_v21 = vmax.f32 %v290_v7, 0.0 }
  0x5f   :  { %v222_v22 = vmul.f32 %v1713_v10, %v2187_v2  ;;  %v1718_v23 = vunpack.c.h.bf16 %v1815_v9  ;;  %v1721_v24 = vunpack.c.l.bf16 %v1816_v11  ;;  %v223_v25 = vmul.f32 %v1714_v15, %v2187_v2 }
  0x60   :  { %v224_v26 = vmul.f32 %v1717_v19, %v2187_v2  ;;  %v1722_v27 = vunpack.c.h.bf16 %v1816_v11  ;;  %v1725_v30 = vunpack.c.l.bf16 %v1817_v20  ;;  %v291_v32 = vadd.f32 %v2189_v8, %v220_v13  ;;  %v1823_v19 = vld [vmem:[#allocation2 + $0x88] sm:$0xff]  }
  0x61   :  { %1878 = vmatmul.mubr.msk.bf16.gmra.mrb[4].mxu0 %vm438_vm1, %v408_v5  ;;  %v225_v28 = vmul.f32 %v1718_v23, %v2187_v2  ;;  %v226_v29 = vmul.f32 %v1721_v24, %v2187_v2  ;;  %v292_v33 = vadd.f32 %v2189_v8, %v221_v14  ;;  %v1726_v35 = vunpack.c.h.bf16 %v1817_v20  ;;  %v1824_v24 = vld [vmem:[#allocation2 + $0x90] sm:$0xff]  }
  0x62   :  { %1881 = vmatprep.mubr.msk.bf16.mxu0 %vm438_vm1, %v409_v12  ;;  %v227_v34 = vmul.f32 %v1722_v27, %v2187_v2  ;;  %v410_v36 = vpack.c.bf16 %v352_v17, %v351_v16  ;;  %v411_v37 = vpack.c.bf16 %v354_v21, %v353_v18  ;;  %v293_v38 = vadd.f32 %v2189_v8, %v222_v22 }
  0x63   :  { %v228_v39 = vmul.f32 %v1725_v30, %v2187_v2  ;;  %v294_v40 = vadd.f32 %v2189_v8, %v223_v25  ;;  %v295_v41 = vadd.f32 %v2189_v8, %v224_v26  ;;  %v229_v42 = vmul.f32 %v1726_v35, %v2187_v2 }
  0x64   :  { %v1729_v43 = vunpack.c.l.bf16 %v1818_v31  ;;  %v296_v45 = vadd.f32 %v2189_v8, %v225_v28  ;;  %v297_v46 = vadd.f32 %v2189_v8, %v226_v29  ;;  %v298_v47 = vadd.f32 %v2189_v8, %v227_v34 }
  0x65   :  { %v299_v48 = vadd.f32 %v2189_v8, %v228_v39  ;;  %v300_v49 = vadd.f32 %v2189_v8, %v229_v42  ;;  %v1730_v50 = vunpack.c.h.bf16 %v1818_v31  ;;  %v355_v52 = vmax.f32 %v291_v32, 0.0 }
  0x66   :  { %v230_v51 = vmul.f32 %v1729_v43, %v2187_v2  ;;  %v356_v53 = vmax.f32 %v292_v33, 0.0  ;;  %v1733_v54 = vunpack.c.l.bf16 %v1819_v44  ;;  %v1734_v55 = vunpack.c.h.bf16 %v1819_v44  ;;  %v1825_v33 = vld [vmem:[#allocation2 + $0x98] sm:$0xff]  }
  0x67   :  { %v357_v57 = vmax.f32 %v293_v38, 0.0  ;;  %v358_v58 = vmax.f32 %v294_v40, 0.0  ;;  %v359_v59 = vmax.f32 %v295_v41, 0.0  ;;  %v231_v60 = vmul.f32 %v1730_v50, %v2187_v2 }
  0x68   :  { %v360_v61 = vmax.f32 %v296_v45, 0.0  ;;  %v361_v62 = vmax.f32 %v297_v46, 0.0  ;;  %v362_v63 = vmax.f32 %v298_v47, 0.0  ;;  %v232_v0 = vmul.f32 %v1733_v54, %v2187_v2  ;;  %v1826_v46 = vld [vmem:[#allocation2 + $0xa0] sm:$0xff]  }
  0x69   :  { %1882 = vmatmul.mubr.msk.bf16.gmra.mrb[8].mxu0 %vm438_vm1, %v410_v36  ;;  %v363_v4 = vmax.f32 %v299_v48, 0.0  ;;  %v364_v5 = vmax.f32 %v300_v49, 0.0  ;;  %v2252_v6 = vadd.f32 %v2189_v8, %v230_v51  ;;  %v1737_v7 = vunpack.c.l.bf16 %v1820_v56 }
  0x6a   :  { %1885 = vmatprep.mubr.msk.bf16.mxu0 %vm438_vm1, %v411_v37  ;;  %v412_v9 = vpack.c.bf16 %v356_v53, %v355_v52  ;;  %v2255_v10 = vadd.f32 %v2189_v8, %v231_v60  ;;  %v233_v11 = vmul.f32 %v1734_v55, %v2187_v2  ;;  %v1738_v12 = vunpack.c.h.bf16 %v1820_v56  ;;  %v1827_v55 = vld [vmem:[#allocation2 + $0xa8] sm:$0xff]  }
  0x6b   :  { %v413_v13 = vpack.c.bf16 %v358_v58, %v357_v57  ;;  %v1741_v14 = vunpack.c.l.bf16 %v2249_v1  ;;  %v1745_v15 = vunpack.c.l.bf16 %v1822_v3  ;;  %v414_v16 = vpack.c.bf16 %v360_v61, %v359_v59 }
  0x6c   :  { %v415_v17 = vpack.c.bf16 %v362_v63, %v361_v62  ;;  %v2260_v18 = vadd.f32 %v2189_v8, %v232_v0  ;;  %v2262_v20 = vpack.c.bf16 %v364_v5, %v363_v4  ;;  %v365_v21 = vmax.f32 %v2252_v6, 0.0 }
  0x6d   :  { %v234_v22 = vmul.f32 %v1737_v7, %v2187_v2  ;;  %v1746_v23 = vunpack.c.h.bf16 %v1822_v3  ;;  %v366_v25 = vmax.f32 %v2255_v10, 0.0  ;;  %v2269_v26 = vadd.f32 %v2189_v8, %v233_v11  ;;  %v1828_v7 = vld [vmem:[#allocation2 + $0xb0] sm:$0xff]  }
  0x6e   :  { %v235_v27 = vmul.f32 %v1738_v12, %v2187_v2  ;;  %v238_v28 = vmul.f32 %v1745_v15, %v2187_v2  ;;  %v1742_v29 = vunpack.c.h.bf16 %v2249_v1  ;;  %v2276_v30 = vmul.f32 %v1741_v14, %v2187_v2 }
  0x6f   :  { %v239_v31 = vmul.f32 %v1746_v23, %v2187_v2  ;;  %v1749_v32 = vunpack.c.l.bf16 %v1823_v19  ;;  %v367_v34 = vmax.f32 %v2260_v18, 0.0  ;;  %v1750_v36 = vunpack.c.h.bf16 %v1823_v19 }
  0x70   :  { %v309_v35 = vadd.f32 %v2189_v8, %v238_v28  ;;  %v1753_v37 = vunpack.c.l.bf16 %v1824_v24  ;;  %v2282_v38 = vadd.f32 %v2189_v8, %v234_v22  ;;  %v1754_v41 = vunpack.c.h.bf16 %v1824_v24  ;;  %v1829_v24 = vld [vmem:[#allocation2 + $0xb8] sm:$0xff]  }
  0x71   :  { %1886 = vmatmul.mubr.msk.bf16.gmra.mrb[12].mxu0 %vm438_vm1, %v412_v9  ;;  %v310_v39 = vadd.f32 %v2189_v8, %v239_v31  ;;  %v240_v40 = vmul.f32 %v1749_v32, %v2187_v2  ;;  %v241_v43 = vmul.f32 %v1750_v36, %v2187_v2  ;;  %v1757_v45 = vunpack.c.l.bf16 %v1825_v33 }
  0x72   :  { %1889 = vmatprep.mubr.msk.bf16.mxu0 %vm438_vm1, %v413_v13  ;;  %v373_v42 = vmax.f32 %v309_v35, 0.0  ;;  %v242_v44 = vmul.f32 %v1753_v37, %v2187_v2  ;;  %v2289_v47 = vadd.f32 %v2189_v8, %v235_v27  ;;  %v243_v50 = vmul.f32 %v1754_v41, %v2187_v2 }
  0x73   :  { %v374_v48 = vmax.f32 %v310_v39, 0.0  ;;  %v311_v49 = vadd.f32 %v2189_v8, %v240_v40  ;;  %v312_v51 = vadd.f32 %v2189_v8, %v241_v43  ;;  %v1758_v53 = vunpack.c.h.bf16 %v1825_v33  ;;  %v1830_v39 = vld [vmem:[#allocation2 + $0xc0] sm:$0xff]  }
  0x74   :  { %v313_v52 = vadd.f32 %v2189_v8, %v242_v44  ;;  %v244_v54 = vmul.f32 %v1757_v45, %v2187_v2  ;;  %v314_v58 = vadd.f32 %v2189_v8, %v243_v50  ;;  %v1761_v59 = vunpack.c.l.bf16 %v1826_v46 }
  0x75   :  { %v421_v56 = vpack.c.bf16 %v374_v48, %v373_v42  ;;  %v375_v57 = vmax.f32 %v311_v49, 0.0  ;;  %v376_v60 = vmax.f32 %v312_v51, 0.0  ;;  %v245_v62 = vmul.f32 %v1758_v53, %v2187_v2 }
  0x76   :  { %v377_v61 = vmax.f32 %v313_v52, 0.0  ;;  %v315_v63 = vadd.f32 %v2189_v8, %v244_v54  ;;  %v378_v0 = vmax.f32 %v314_v58, 0.0  ;;  %v1762_v3 = vunpack.c.h.bf16 %v1826_v46  ;;  %v1831_v52 = vld [vmem:[#allocation2 + $0xc8] sm:$0xff]  }
  0x77   :  { %1905 = vmatprep.mubr.msk.bf16.mxu1 %vm438_vm1, %v421_v56  ;;  %v246_v4 = vmul.f32 %v1761_v59, %v2187_v2  ;;  %v1765_v5 = vunpack.c.l.bf16 %v1827_v55  ;;  %v422_v9 = vpack.c.bf16 %v376_v60, %v375_v57  ;;  %v316_v10 = vadd.f32 %v2189_v8, %v245_v62  ;;  %v1832_v56 = vld [vmem:[#allocation2 + $0xd0] sm:$0xff]  }
  0x78   :  { %v379_v11 = vmax.f32 %v315_v63, 0.0  ;;  %v1766_v12 = vunpack.c.h.bf16 %v1827_v55  ;;  %v423_v13 = vpack.c.bf16 %v378_v0, %v377_v61  ;;  %v247_v14 = vmul.f32 %v1762_v3, %v2187_v2 }
  0x79   :  { %1890 = vmatmul.mubr.msk.bf16.gmra.mrb[16].mxu0 %vm438_vm1, %v414_v16  ;;  %v317_v15 = vadd.f32 %v2189_v8, %v246_v4  ;;  %v248_v16 = vmul.f32 %v1765_v5, %v2187_v2  ;;  %1906 = vmatmul.mubr.msk.bf16.vlgmr.msra.gmra.mrb[0].mxu1 %vm438_vm1, %v422_v9  ;;  %v1769_v22 = vunpack.c.l.bf16 %v1828_v7  ;;  %v1770_v23 = vunpack.c.h.bf16 %v1828_v7 }
  0x7a   :  { %1893 = vmatprep.mubr.msk.bf16.mxu0 %vm438_vm1, %v415_v17  ;;  %v380_v17 = vmax.f32 %v316_v10, 0.0  ;;  %v249_v19 = vmul.f32 %v1766_v12, %v2187_v2  ;;  %v417_v27 = vpack.c.bf16 %v366_v25, %v365_v21  ;;  %v368_v28 = vmax.f32 %v2269_v26, 0.0  ;;  %1909 = vmatprep.mubr.msk.bf16.mxu1 %vm438_vm1, %v423_v13 }
  0x7b   :  { %v318_v31 = vadd.f32 %v2189_v8, %v247_v14  ;;  %v381_v32 = vmax.f32 %v317_v15, 0.0  ;;  %v369_v33 = vmax.f32 %v2282_v38, 0.0  ;;  %v237_v35 = vmul.f32 %v1742_v29, %v2187_v2  ;;  %v1833_v14 = vld [vmem:[#allocation2 + $0xd8] sm:$0xff]  }
  0x7c   :  { %v250_v36 = vmul.f32 %v1769_v22, %v2187_v2  ;;  %v251_v37 = vmul.f32 %v1770_v23, %v2187_v2  ;;  %v370_v6 = vmax.f32 %v2289_v47, 0.0  ;;  %v1773_v25 = vunpack.c.l.bf16 %v1829_v24 }
  0x7d   :  { %v382_v21 = vmax.f32 %v318_v31, 0.0  ;;  %v1774_v26 = vunpack.c.h.bf16 %v1829_v24  ;;  %v424_v40 = vpack.c.bf16 %v380_v17, %v379_v11  ;;  %v319_v38 = vadd.f32 %v2189_v8, %v248_v16  ;;  %v1834_v17 = vld [vmem:[#allocation2 + $0xe0] sm:$0xff]  }
  0x7e   :  { %v320_v41 = vadd.f32 %v2189_v8, %v249_v19  ;;  %v321_v1 = vadd.f32 %v2189_v8, %v250_v36  ;;  %v322_v42 = vadd.f32 %v2189_v8, %v251_v37  ;;  %v1777_v43 = vunpack.c.l.bf16 %v1830_v39 }
  0x7f   :  { %v425_v29 = vpack.c.bf16 %v382_v21, %v381_v32  ;;  %v1778_v44 = vunpack.c.h.bf16 %v1830_v39  ;;  %v307_v45 = vadd.f32 %v2189_v8, %v2276_v30  ;;  %v308_v46 = vadd.f32 %v2189_v8, %v237_v35 }
  0x80   :  { %v253_v47 = vmul.f32 %v1774_v26, %v2187_v2  ;;  %v418_v48 = vpack.c.bf16 %v368_v28, %v367_v34  ;;  %v419_v49 = vpack.c.bf16 %v370_v6, %v369_v33  ;;  %v383_v50 = vmax.f32 %v319_v38, 0.0  ;;  %v1835_v26 = vld [vmem:[#allocation2 + $0xe8] sm:$0xff]  }
  0x81   :  { %1894 = vmatmul.mubr.msk.bf16.gmra.mrb[20].mxu0 %vm438_vm1, %v2262_v20  ;;  %v252_v20 = vmul.f32 %v1773_v25, %v2187_v2  ;;  %1910 = vmatmul.mubr.msk.bf16.gmra.mrb[4].mxu1 %vm438_vm1, %v424_v40  ;;  %v384_v51 = vmax.f32 %v320_v41, 0.0  ;;  %v385_v53 = vmax.f32 %v321_v1, 0.0  ;;  %v386_v54 = vmax.f32 %v322_v42, 0.0  ;;  %v1836_v41 = vld [vmem:[#allocation2 + $0xf0] sm:$0xff]  }
  0x82   :  { %1897 = vmatprep.mubr.msk.bf16.mxu0 %vm438_vm1, %v417_v27  ;;  %1913 = vmatprep.mubr.msk.bf16.mxu1 %vm438_vm1, %v425_v29  ;;  %v254_v30 = vmul.f32 %v1777_v43, %v2187_v2  ;;  %v255_v55 = vmul.f32 %v1778_v44, %v2187_v2  ;;  %v371_v57 = vmax.f32 %v307_v45, 0.0  ;;  %v372_v58 = vmax.f32 %v308_v46, 0.0 }
  0x83   :  { %v323_v18 = vadd.f32 %v2189_v8, %v252_v20  ;;  %v324_v34 = vadd.f32 %v2189_v8, %v253_v47  ;;  %v1781_v59 = vunpack.c.l.bf16 %v1831_v52  ;;  %v426_v60 = vpack.c.bf16 %v384_v51, %v383_v50 }
  0x84   :  { %v1782_v61 = vunpack.c.h.bf16 %v1831_v52  ;;  %v1785_v62 = vunpack.c.l.bf16 %v1832_v56  ;;  %v1786_v63 = vunpack.c.h.bf16 %v1832_v56  ;;  %v427_v0 = vpack.c.bf16 %v386_v54, %v385_v53  ;;  %v1837_v56 = vld [vmem:[#allocation2 + $0xf8] sm:$0xff]  }
  0x85   :  { %v325_v3 = vadd.f32 %v2189_v8, %v254_v30  ;;  %v326_v4 = vadd.f32 %v2189_v8, %v255_v55  ;;  %v387_v5 = vmax.f32 %v323_v18, 0.0  ;;  %v388_v7 = vmax.f32 %v324_v34, 0.0 }
  0x86   :  { %v256_v9 = vmul.f32 %v1781_v59, %v2187_v2  ;;  %v420_v10 = vpack.c.bf16 %v372_v58, %v371_v57  ;;  %v257_v11 = vmul.f32 %v1782_v61, %v2187_v2  ;;  %v258_v12 = vmul.f32 %v1785_v62, %v2187_v2 }
  0x87   :  { %v259_v13 = vmul.f32 %v1786_v63, %v2187_v2  ;;  %v389_v15 = vmax.f32 %v325_v3, 0.0  ;;  %v390_v16 = vmax.f32 %v326_v4, 0.0  ;;  %v428_v19 = vpack.c.bf16 %v388_v7, %v387_v5 }
  0x88   :  { %v327_v22 = vadd.f32 %v2189_v8, %v256_v9  ;;  %v1789_v23 = vunpack.c.l.bf16 %v1833_v14  ;;  %v328_v24 = vadd.f32 %v2189_v8, %v257_v11  ;;  %v329_v27 = vadd.f32 %v2189_v8, %v258_v12 }
  0x89   :  { %1898 = vmatmul.mubr.msk.bf16.gmra.mrb[24].mxu0 %vm438_vm1, %v418_v48  ;;  %1914 = vmatmul.mubr.msk.bf16.gmra.mrb[8].mxu1 %vm438_vm1, %v426_v60  ;;  %v330_v28 = vadd.f32 %v2189_v8, %v259_v13  ;;  %v1790_v31 = vunpack.c.h.bf16 %v1833_v14  ;;  %v429_v32 = vpack.c.bf16 %v390_v16, %v389_v15  ;;  %v1793_v33 = vunpack.c.l.bf16 %v1834_v17 }
  0x8a   :  { %1901 = vmatprep.mubr.msk.bf16.mxu0 %vm438_vm1, %v419_v49  ;;  %1917 = vmatprep.mubr.msk.bf16.mxu1 %vm438_vm1, %v427_v0  ;;  %v1794_v35 = vunpack.c.h.bf16 %v1834_v17  ;;  %v391_v36 = vmax.f32 %v327_v22, 0.0  ;;  %v260_v37 = vmul.f32 %v1789_v23, %v2187_v2  ;;  %v392_v39 = vmax.f32 %v328_v24, 0.0 }
  0x8b   :  { %v393_v6 = vmax.f32 %v329_v27, 0.0  ;;  %v394_v21 = vmax.f32 %v330_v28, 0.0  ;;  %v261_v25 = vmul.f32 %v1790_v31, %v2187_v2  ;;  %v262_v40 = vmul.f32 %v1793_v33, %v2187_v2 }
  0x8c   :  { %v263_v38 = vmul.f32 %v1794_v35, %v2187_v2  ;;  %v331_v1 = vadd.f32 %v2189_v8, %v260_v37  ;;  %v1797_v29 = vunpack.c.l.bf16 %v1835_v26  ;;  %v430_v42 = vpack.c.bf16 %v392_v39, %v391_v36 }
  0x8d   :  { %v431_v43 = vpack.c.bf16 %v394_v21, %v393_v6  ;;  %v332_v44 = vadd.f32 %v2189_v8, %v261_v25  ;;  %v1798_v45 = vunpack.c.h.bf16 %v1835_v26  ;;  %v333_v46 = vadd.f32 %v2189_v8, %v262_v40 }
  0x8e   :  { %v334_v20 = vadd.f32 %v2189_v8, %v263_v38  ;;  %v1801_v47 = vunpack.c.l.bf16 %v1836_v41  ;;  %v1802_v48 = vunpack.c.h.bf16 %v1836_v41  ;;  %v264_v49 = vmul.f32 %v1797_v29, %v2187_v2 }
  0x8f   :  { %v395_v50 = vmax.f32 %v331_v1, 0.0  ;;  %v396_v51 = vmax.f32 %v332_v44, 0.0  ;;  %v265_v52 = vmul.f32 %v1798_v45, %v2187_v2  ;;  %v397_v53 = vmax.f32 %v333_v46, 0.0 }
  0x90   :  { %v398_v54 = vmax.f32 %v334_v20, 0.0  ;;  %v266_v30 = vmul.f32 %v1801_v47, %v2187_v2  ;;  %v267_v55 = vmul.f32 %v1802_v48, %v2187_v2  ;;  %v335_v57 = vadd.f32 %v2189_v8, %v264_v49 }
  0x91   :  { %1902 = vmatmul.mubr.msk.bf16.gmra.mrb[28].mxu0 %vm438_vm1, %v420_v10  ;;  %1918 = vmatmul.mubr.msk.bf16.gmra.mrb[12].mxu1 %vm438_vm1, %v428_v19  ;;  %v432_v58 = vpack.c.bf16 %v396_v51, %v395_v50  ;;  %v336_v18 = vadd.f32 %v2189_v8, %v265_v52  ;;  %v1805_v34 = vunpack.c.l.bf16 %v1837_v56  ;;  %v1806_v59 = vunpack.c.h.bf16 %v1837_v56 }
  0x92   :  { %1921 = vmatprep.mubr.msk.bf16.mxu1 %vm438_vm1, %v429_v32  ;;  %v433_v60 = vpack.c.bf16 %v398_v54, %v397_v53  ;;  %v337_v61 = vadd.f32 %v2189_v8, %v266_v30  ;;  %v338_v62 = vadd.f32 %v2189_v8, %v267_v55  ;;  %v399_v63 = vmax.f32 %v335_v57, 0.0 }
  0x93   :  { %v400_v0 = vmax.f32 %v336_v18, 0.0  ;;  %v268_v3 = vmul.f32 %v1805_v34, %v2187_v2  ;;  %v269_v4 = vmul.f32 %v1806_v59, %v2187_v2 }
  0x94   :  { %v401_v5 = vmax.f32 %v337_v61, 0.0  ;;  %v402_v7 = vmax.f32 %v338_v62, 0.0 }
  0x95   :  { %v434_v9 = vpack.c.bf16 %v400_v0, %v399_v63  ;;  %v339_v10 = vadd.f32 %v2189_v8, %v268_v3  ;;  %v340_v11 = vadd.f32 %v2189_v8, %v269_v4 }
  0x96   :  { %v435_v12 = vpack.c.bf16 %v402_v7, %v401_v5 }
  0x97   :  { %v403_v13 = vmax.f32 %v339_v10, 0.0  ;;  %v404_v14 = vmax.f32 %v340_v11, 0.0 }
  0x99   :  { %1922 = vmatmul.mubr.msk.bf16.gmra.mrb[16].mxu1 %vm438_vm1, %v430_v42  ;;  %v436_v15 = vpack.c.bf16 %v404_v14, %v403_v13 }
  0x9a   :  { %1925 = vmatprep.mubr.msk.bf16.mxu1 %vm438_vm1, %v431_v43 }
  0xa1   :  { %1926 = vmatmul.mubr.msk.bf16.gmra.mrb[20].mxu1 %vm438_vm1, %v432_v58 }
  0xa2   :  { %1929 = vmatprep.mubr.msk.bf16.mxu1 %vm438_vm1, %v433_v60 }
  0xa9   :  { %1930 = vmatmul.mubr.msk.bf16.gmra.mrb[24].mxu1 %vm438_vm1, %v434_v9 }
  0xaa   :  { %1933 = vmatprep.mubr.msk.bf16.mxu1 %vm438_vm1, %v435_v12 }
  0xb1   :  { %1934 = vmatmul.mubr.msk.bf16.gmra.mrb[28].mxu1 %vm438_vm1, %v436_v15 }
 0x12c   :  { %v1875_v2 = vpop.f32.mrb[0].mxu0 }
 0x12d   :  { %v1617_v16 = vpack.c.bf16 %v1875_v2, %v1875_v2  ;;  %v573_v17 = vpop.f32.mrb[1].mxu0  ;;  %v1285_v8 = vmul.f32 %v1875_v2, %v1875_v2  ;;  %v1153_v37 = vsel %vm1149_vm3, %v1875_v2, 0.0 }
 0x12e   :  { %v1615_v19 = vpack.c.bf16 %v573_v17, %v573_v17  ;;  %v1283_v22 = vmul.f32 %v573_v17, %v573_v17  ;;  %v1876_v23 = vpop.f32.mrb[2].mxu0  ;;  %v1150_v28 = vsel %vm1149_vm3, %v573_v17, 0.0 }
 0x12f   :  { %1087 = vst.msk [vmem:[#allocation10 + $0x8] sm:$0xf] %vm1084_vm2, %v1617_v16  ;;  %v1618_v24 = vpack.c.bf16 %v1876_v23, %v1876_v23  ;;  %v576_v27 = vpop.f32.mrb[3].mxu0  ;;  %v1286_v35 = vmul.f32 %v1876_v23, %v1876_v23  ;;  %v1350_v26 = vsel %vm1149_vm3, %v1285_v8, 0.0  ;;  %v1155_v38 = vsel %vm1149_vm3, %v1876_v23, 0.0 }
 0x130   :  { %1085 = vst.msk [vmem:[#allocation10] sm:$0xf] %vm1084_vm2, %v1615_v19  ;;  %v1616_v31 = vpack.c.bf16 %v576_v27, %v576_v27  ;;  %v1151_v32 = vsel %vm1149_vm3, %v576_v27, 0.0  ;;  %v1284_v33 = vmul.f32 %v576_v27, %v576_v27  ;;  %v1347_v39 = vsel %vm1149_vm3, %v1283_v22, 0.0 }
 0x131   :  { %1088 = vst.msk [vmem:[#allocation10 + $0xc] sm:$0xf] %vm1084_vm2, %v1618_v24  ;;  %v1152_v36 = vadd.f32 %v1151_v32, %v1150_v28  ;;  %v1352_v41 = vsel %vm1149_vm3, %v1286_v35, 0.0 }
 0x132   :  { %1086 = vst.msk [vmem:[#allocation10 + $0x4] sm:$0xf] %vm1084_vm2, %v1616_v31  ;;  %v1348_v6 = vsel %vm1149_vm3, %v1284_v33, 0.0 }
 0x133   :  { %v1154_v21 = vadd.f32 %v1153_v37, %v1152_v36  ;;  %v1349_v25 = vadd.f32 %v1348_v6, %v1347_v39 }
 0x134   :  { %v1879_v40 = vpop.f32.mrb[4].mxu0 }
 0x135   :  { %v1351_v1 = vadd.f32 %v1350_v26, %v1349_v25  ;;  %v1621_v29 = vpack.c.bf16 %v1879_v40, %v1879_v40  ;;  %v589_v42 = vpop.f32.mrb[5].mxu0  ;;  %v1156_v44 = vadd.f32 %v1155_v38, %v1154_v21  ;;  %v1289_v53 = vmul.f32 %v1879_v40, %v1879_v40 }
 0x136   :  { %v1619_v43 = vpack.c.bf16 %v589_v42, %v589_v42  ;;  %v1157_v45 = vsel %vm1149_vm3, %v589_v42, 0.0  ;;  %v1287_v46 = vmul.f32 %v589_v42, %v589_v42  ;;  %v1880_v20 = vpop.f32.mrb[6].mxu0  ;;  %v1161_v57 = vsel %vm1149_vm3, %v1879_v40, 0.0 }
 0x137   :  { %1091 = vst.msk [vmem:[#allocation10 + $0x18] sm:$0xf] %vm1084_vm2, %v1621_v29  ;;  %v1353_v47 = vadd.f32 %v1352_v41, %v1351_v1  ;;  %v1622_v48 = vpack.c.bf16 %v1880_v20, %v1880_v20  ;;  %v592_v49 = vpop.f32.mrb[7].mxu0  ;;  %v1158_v50 = vadd.f32 %v1157_v45, %v1156_v44  ;;  %v1290_v58 = vmul.f32 %v1880_v20, %v1880_v20 }
 0x138   :  { %1089 = vst.msk [vmem:[#allocation10 + $0x10] sm:$0xf] %vm1084_vm2, %v1619_v43  ;;  %v1354_v51 = vsel %vm1149_vm3, %v1287_v46, 0.0  ;;  %v1620_v52 = vpack.c.bf16 %v592_v49, %v592_v49  ;;  %v1159_v30 = vsel %vm1149_vm3, %v592_v49, 0.0  ;;  %v1288_v55 = vmul.f32 %v592_v49, %v592_v49 }
 0x139   :  { %v1355_v54 = vadd.f32 %v1354_v51, %v1353_v47  ;;  %1092 = vst.msk [vmem:[#allocation10 + $0x1c] sm:$0xf] %vm1084_vm2, %v1622_v48  ;;  %v1160_v56 = vadd.f32 %v1159_v30, %v1158_v50  ;;  %v1358_v61 = vsel %vm1149_vm3, %v1289_v53, 0.0  ;;  %v1163_v62 = vsel %vm1149_vm3, %v1880_v20, 0.0 }
 0x13a   :  { %1090 = vst.msk [vmem:[#allocation10 + $0x14] sm:$0xf] %vm1084_vm2, %v1620_v52  ;;  %v1356_v18 = vsel %vm1149_vm3, %v1288_v55, 0.0  ;;  %v1360_v10 = vsel %vm1149_vm3, %v1290_v58, 0.0 }
 0x13b   :  { %v1162_v34 = vadd.f32 %v1161_v57, %v1160_v56  ;;  %v1357_v59 = vadd.f32 %v1356_v18, %v1355_v54 }
 0x13c   :  { %v1883_v60 = vpop.f32.mrb[8].mxu0 }
 0x13d   :  { %v1625_v63 = vpack.c.bf16 %v1883_v60, %v1883_v60  ;;  %v605_v0 = vpop.f32.mrb[9].mxu0  ;;  %v1359_v3 = vadd.f32 %v1358_v61, %v1357_v59  ;;  %v1164_v5 = vadd.f32 %v1163_v62, %v1162_v34  ;;  %v1293_v16 = vmul.f32 %v1883_v60, %v1883_v60 }
 0x13e   :  { %v1623_v4 = vpack.c.bf16 %v605_v0, %v605_v0  ;;  %v1165_v7 = vsel %vm1149_vm3, %v605_v0, 0.0  ;;  %v1884_v9 = vpop.f32.mrb[10].mxu0  ;;  %v1291_v11 = vmul.f32 %v605_v0, %v605_v0  ;;  %v1169_v24 = vsel %vm1149_vm3, %v1883_v60, 0.0 }
 0x13f   :  { %1095 = vst.msk [vmem:[#allocation10 + $0x28] sm:$0xf] %vm1084_vm2, %v1625_v63  ;;  %v1626_v12 = vpack.c.bf16 %v1884_v9, %v1884_v9  ;;  %v608_v13 = vpop.f32.mrb[11].mxu0  ;;  %v1166_v14 = vadd.f32 %v1165_v7, %v1164_v5  ;;  %v1361_v15 = vadd.f32 %v1360_v10, %v1359_v3  ;;  %v1294_v27 = vmul.f32 %v1884_v9, %v1884_v9 }
 0x140   :  { %1093 = vst.msk [vmem:[#allocation10 + $0x20] sm:$0xf] %vm1084_vm2, %v1623_v4  ;;  %v1624_v2 = vpack.c.bf16 %v608_v13, %v608_v13  ;;  %v1362_v17 = vsel %vm1149_vm3, %v1291_v11, 0.0  ;;  %v1167_v19 = vsel %vm1149_vm3, %v608_v13, 0.0  ;;  %v1292_v22 = vmul.f32 %v608_v13, %v608_v13 }
 0x141   :  { %1096 = vst.msk [vmem:[#allocation10 + $0x2c] sm:$0xf] %vm1084_vm2, %v1626_v12  ;;  %v1363_v23 = vadd.f32 %v1362_v17, %v1361_v15  ;;  %v1168_v8 = vadd.f32 %v1167_v19, %v1166_v14  ;;  %v1366_v35 = vsel %vm1149_vm3, %v1293_v16, 0.0  ;;  %v1171_v36 = vsel %vm1149_vm3, %v1884_v9, 0.0 }
 0x142   :  { %1094 = vst.msk [vmem:[#allocation10 + $0x24] sm:$0xf] %vm1084_vm2, %v1624_v2  ;;  %v1364_v28 = vsel %vm1149_vm3, %v1292_v22, 0.0  ;;  %v1368_v38 = vsel %vm1149_vm3, %v1294_v27, 0.0 }
 0x143   :  { %v1170_v31 = vadd.f32 %v1169_v24, %v1168_v8  ;;  %v1365_v32 = vadd.f32 %v1364_v28, %v1363_v23 }
 0x144   :  { %v1887_v33 = vpop.f32.mrb[12].mxu0 }
 0x145   :  { %v1629_v37 = vpack.c.bf16 %v1887_v33, %v1887_v33  ;;  %v621_v39 = vpop.f32.mrb[13].mxu0  ;;  %v1367_v6 = vadd.f32 %v1366_v35, %v1365_v32  ;;  %v1172_v25 = vadd.f32 %v1171_v36, %v1170_v31  ;;  %v1297_v45 = vmul.f32 %v1887_v33, %v1887_v33 }
 0x146   :  { %v1627_v21 = vpack.c.bf16 %v621_v39, %v621_v39  ;;  %v1173_v26 = vsel %vm1149_vm3, %v621_v39, 0.0  ;;  %v1888_v40 = vpop.f32.mrb[14].mxu0  ;;  %v1295_v41 = vmul.f32 %v621_v39, %v621_v39  ;;  %v1177_v50 = vsel %vm1149_vm3, %v1887_v33, 0.0 }
 0x147   :  { %1099 = vst.msk [vmem:[#allocation10 + $0x38] sm:$0xf] %vm1084_vm2, %v1629_v37  ;;  %v1630_v1 = vpack.c.bf16 %v1888_v40, %v1888_v40  ;;  %v624_v29 = vpop.f32.mrb[15].mxu0  ;;  %v1174_v42 = vadd.f32 %v1173_v26, %v1172_v25  ;;  %v1369_v43 = vadd.f32 %v1368_v38, %v1367_v6  ;;  %v1298_v51 = vmul.f32 %v1888_v40, %v1888_v40 }
 0x148   :  { %1097 = vst.msk [vmem:[#allocation10 + $0x30] sm:$0xf] %vm1084_vm2, %v1627_v21  ;;  %v1628_v44 = vpack.c.bf16 %v624_v29, %v624_v29  ;;  %v1370_v46 = vsel %vm1149_vm3, %v1295_v41, 0.0  ;;  %v1175_v20 = vsel %vm1149_vm3, %v624_v29, 0.0  ;;  %v1296_v47 = vmul.f32 %v624_v29, %v624_v29 }
 0x149   :  { %1100 = vst.msk [vmem:[#allocation10 + $0x3c] sm:$0xf] %vm1084_vm2, %v1630_v1  ;;  %v1371_v48 = vadd.f32 %v1370_v46, %v1369_v43  ;;  %v1176_v49 = vadd.f32 %v1175_v20, %v1174_v42  ;;  %v1374_v55 = vsel %vm1149_vm3, %v1297_v45, 0.0  ;;  %v1179_v56 = vsel %vm1149_vm3, %v1888_v40, 0.0 }
 0x14a   :  { %1098 = vst.msk [vmem:[#allocation10 + $0x34] sm:$0xf] %vm1084_vm2, %v1628_v44  ;;  %v1372_v52 = vsel %vm1149_vm3, %v1296_v47, 0.0  ;;  %v1376_v62 = vsel %vm1149_vm3, %v1298_v51, 0.0 }
 0x14b   :  { %v1178_v53 = vadd.f32 %v1177_v50, %v1176_v49  ;;  %v1373_v54 = vadd.f32 %v1372_v52, %v1371_v48 }
 0x14c   :  { %v1891_v30 = vpop.f32.mrb[16].mxu0  ;;  %v2436_v10 = vpop.f32.mrb[0].mxu1 }
 0x14d   :  { %v1633_v57 = vpack.c.bf16 %v1891_v30, %v1891_v30  ;;  %v637_v58 = vpop.f32.mrb[17].mxu0  ;;  %v1375_v18 = vadd.f32 %v1374_v55, %v1373_v54  ;;  %v1180_v59 = vadd.f32 %v1179_v56, %v1178_v53  ;;  %v1301_v4 = vmul.f32 %v1891_v30, %v1891_v30  ;;  %v2443_v15 = vpop.f32.mrb[1].mxu1 }
 0x14e   :  { %v1631_v34 = vpack.c.bf16 %v637_v58, %v637_v58  ;;  %v1181_v60 = vsel %vm1149_vm3, %v637_v58, 0.0  ;;  %v1892_v61 = vpop.f32.mrb[18].mxu0  ;;  %v1299_v63 = vmul.f32 %v637_v58, %v637_v58  ;;  %v1649_v14 = vpack.c.bf16 %v2436_v10, %v2436_v10  ;;  %v2446_v17 = vpop.f32.mrb[2].mxu1 }
 0x14f   :  { %1103 = vst.msk [vmem:[#allocation10 + $0x48] sm:$0xf] %vm1084_vm2, %v1633_v57  ;;  %v1634_v0 = vpack.c.bf16 %v1892_v61, %v1892_v61  ;;  %v640_v3 = vpop.f32.mrb[19].mxu0  ;;  %v1182_v5 = vadd.f32 %v1181_v60, %v1180_v59  ;;  %v1377_v7 = vadd.f32 %v1376_v62, %v1375_v18  ;;  %v1185_v19 = vsel %vm1149_vm3, %v1891_v30, 0.0  ;;  %v2453_v24 = vpop.f32.mrb[3].mxu1 }
 0x150   :  { %1101 = vst.msk [vmem:[#allocation10 + $0x40] sm:$0xf] %vm1084_vm2, %v1631_v34  ;;  %v1632_v9 = vpack.c.bf16 %v640_v3, %v640_v3  ;;  %v1378_v11 = vsel %vm1149_vm3, %v1299_v63, 0.0  ;;  %v1183_v12 = vsel %vm1149_vm3, %v640_v3, 0.0  ;;  %v1300_v13 = vmul.f32 %v640_v3, %v640_v3  ;;  %1119 = vst.msk [vmem:[#allocation10 + $0x88] sm:$0xf] %vm1084_vm2, %v1649_v14 }
 0x151   :  { %1104 = vst.msk [vmem:[#allocation10 + $0x4c] sm:$0xf] %vm1084_vm2, %v1634_v0  ;;  %v1379_v2 = vadd.f32 %v1378_v11, %v1377_v7  ;;  %v1184_v16 = vadd.f32 %v1183_v12, %v1182_v5  ;;  %v1302_v22 = vmul.f32 %v1892_v61, %v1892_v61  ;;  %v1647_v8 = vpack.c.bf16 %v2443_v15, %v2443_v15 }
 0x152   :  { %1102 = vst.msk [vmem:[#allocation10 + $0x44] sm:$0xf] %vm1084_vm2, %v1632_v9  ;;  %v1380_v23 = vsel %vm1149_vm3, %v1300_v13, 0.0  ;;  %v1650_v32 = vpack.c.bf16 %v2446_v17, %v2446_v17  ;;  %v1382_v33 = vsel %vm1149_vm3, %v1301_v4, 0.0  ;;  %v1187_v35 = vsel %vm1149_vm3, %v1892_v61, 0.0 }
 0x153   :  { %v1186_v27 = vadd.f32 %v1185_v19, %v1184_v16  ;;  %v1381_v28 = vadd.f32 %v1380_v23, %v1379_v2  ;;  %1117 = vst.msk [vmem:[#allocation10 + $0x80] sm:$0xf] %vm1084_vm2, %v1647_v8  ;;  %v1384_v40 = vsel %vm1149_vm3, %v1302_v22, 0.0  ;;  %v1648_v30 = vpack.c.bf16 %v2453_v24, %v2453_v24 }
 0x154   :  { %v1895_v31 = vpop.f32.mrb[20].mxu0  ;;  %1120 = vst.msk [vmem:[#allocation10 + $0x8c] sm:$0xf] %vm1084_vm2, %v1650_v32  ;;  %v2465_v44 = vpop.f32.mrb[4].mxu1 }
 0x155   :  { %v1637_v36 = vpack.c.bf16 %v1895_v31, %v1895_v31  ;;  %v653_v37 = vpop.f32.mrb[21].mxu0  ;;  %v1383_v39 = vadd.f32 %v1382_v33, %v1381_v28  ;;  %v1188_v21 = vadd.f32 %v1187_v35, %v1186_v27  ;;  %v1305_v45 = vmul.f32 %v1895_v31, %v1895_v31  ;;  %v2470_v48 = vpop.f32.mrb[5].mxu1  ;;  %1118 = vst.msk [vmem:[#allocation10 + $0x84] sm:$0xf] %vm1084_vm2, %v1648_v30 }
 0x156   :  { %v1635_v6 = vpack.c.bf16 %v653_v37, %v653_v37  ;;  %v1189_v25 = vsel %vm1149_vm3, %v653_v37, 0.0  ;;  %v1896_v26 = vpop.f32.mrb[22].mxu0  ;;  %v1303_v38 = vmul.f32 %v653_v37, %v653_v37  ;;  %v2473_v51 = vpop.f32.mrb[6].mxu1  ;;  %v1193_v52 = vsel %vm1149_vm3, %v1895_v31, 0.0 }
 0x157   :  { %1107 = vst.msk [vmem:[#allocation10 + $0x58] sm:$0xf] %vm1084_vm2, %v1637_v36  ;;  %v1638_v41 = vpack.c.bf16 %v1896_v26, %v1896_v26  ;;  %v656_v1 = vpop.f32.mrb[23].mxu0  ;;  %v1190_v29 = vadd.f32 %v1189_v25, %v1188_v21  ;;  %v1385_v42 = vadd.f32 %v1384_v40, %v1383_v39  ;;  %v1306_v53 = vmul.f32 %v1896_v26, %v1896_v26  ;;  %v2479_v55 = vpop.f32.mrb[7].mxu1 }
 0x158   :  { %1105 = vst.msk [vmem:[#allocation10 + $0x50] sm:$0xf] %vm1084_vm2, %v1635_v6  ;;  %v1636_v43 = vpack.c.bf16 %v656_v1, %v656_v1  ;;  %v1386_v46 = vsel %vm1149_vm3, %v1303_v38, 0.0  ;;  %v1191_v20 = vsel %vm1149_vm3, %v656_v1, 0.0  ;;  %v1304_v47 = vmul.f32 %v656_v1, %v656_v1 }
 0x159   :  { %1108 = vst.msk [vmem:[#allocation10 + $0x5c] sm:$0xf] %vm1084_vm2, %v1638_v41  ;;  %v1387_v49 = vadd.f32 %v1386_v46, %v1385_v42  ;;  %v1192_v50 = vadd.f32 %v1191_v20, %v1190_v29  ;;  %v1653_v18 = vpack.c.bf16 %v2465_v44, %v2465_v44  ;;  %v1390_v34 = vsel %vm1149_vm3, %v1305_v45, 0.0 }
 0x15a   :  { %1106 = vst.msk [vmem:[#allocation10 + $0x54] sm:$0xf] %vm1084_vm2, %v1636_v43  ;;  %v1388_v54 = vsel %vm1149_vm3, %v1304_v47, 0.0  ;;  %v1195_v59 = vsel %vm1149_vm3, %v1896_v26, 0.0  ;;  %v1392_v5 = vsel %vm1149_vm3, %v1306_v53, 0.0  ;;  %v1651_v36 = vpack.c.bf16 %v2470_v48, %v2470_v48 }
 0x15b   :  { %v1194_v56 = vadd.f32 %v1193_v52, %v1192_v50  ;;  %v1389_v57 = vadd.f32 %v1388_v54, %v1387_v49  ;;  %1123 = vst.msk [vmem:[#allocation10 + $0x98] sm:$0xf] %vm1084_vm2, %v1653_v18  ;;  %v1654_v25 = vpack.c.bf16 %v2473_v51, %v2473_v51 }
 0x15c   :  { %v1899_v58 = vpop.f32.mrb[24].mxu0  ;;  %v2491_v2 = vpop.f32.mrb[8].mxu1  ;;  %1121 = vst.msk [vmem:[#allocation10 + $0x90] sm:$0xf] %vm1084_vm2, %v1651_v36  ;;  %v1317_v36 = vmul.f32 %v2436_v10, %v2436_v10 }
 0x15d   :  { %v1641_v60 = vpack.c.bf16 %v1899_v58, %v1899_v58  ;;  %v669_v61 = vpop.f32.mrb[25].mxu0  ;;  %v1391_v62 = vadd.f32 %v1390_v34, %v1389_v57  ;;  %v1196_v0 = vadd.f32 %v1195_v59, %v1194_v56  ;;  %v1309_v16 = vmul.f32 %v1899_v58, %v1899_v58  ;;  %v2496_v8 = vpop.f32.mrb[9].mxu1  ;;  %1124 = vst.msk [vmem:[#allocation10 + $0x9c] sm:$0xf] %vm1084_vm2, %v1654_v25 }
 0x15e   :  { %v1639_v63 = vpack.c.bf16 %v669_v61, %v669_v61  ;;  %v1197_v3 = vsel %vm1149_vm3, %v669_v61, 0.0  ;;  %v1900_v4 = vpop.f32.mrb[26].mxu0  ;;  %v1307_v7 = vmul.f32 %v669_v61, %v669_v61  ;;  %v2499_v31 = vpop.f32.mrb[10].mxu1  ;;  %v1201_v32 = vsel %vm1149_vm3, %v1899_v58, 0.0 }
 0x15f   :  { %1111 = vst.msk [vmem:[#allocation10 + $0x68] sm:$0xf] %vm1084_vm2, %v1641_v60  ;;  %v1642_v9 = vpack.c.bf16 %v1900_v4, %v1900_v4  ;;  %v672_v11 = vpop.f32.mrb[27].mxu0  ;;  %v1198_v12 = vadd.f32 %v1197_v3, %v1196_v0  ;;  %v1393_v13 = vadd.f32 %v1392_v5, %v1391_v62  ;;  %v1310_v33 = vmul.f32 %v1900_v4, %v1900_v4  ;;  %v2505_v37 = vpop.f32.mrb[11].mxu1 }
 0x160   :  { %1109 = vst.msk [vmem:[#allocation10 + $0x60] sm:$0xf] %vm1084_vm2, %v1639_v63  ;;  %v1640_v14 = vpack.c.bf16 %v672_v11, %v672_v11  ;;  %v1394_v19 = vsel %vm1149_vm3, %v1307_v7, 0.0  ;;  %v1199_v22 = vsel %vm1149_vm3, %v672_v11, 0.0  ;;  %v1308_v23 = vmul.f32 %v672_v11, %v672_v11 }
 0x161   :  { %1112 = vst.msk [vmem:[#allocation10 + $0x6c] sm:$0xf] %vm1084_vm2, %v1642_v9  ;;  %v1395_v27 = vadd.f32 %v1394_v19, %v1393_v13  ;;  %v1200_v28 = vadd.f32 %v1199_v22, %v1198_v12  ;;  %v1398_v26 = vsel %vm1149_vm3, %v1309_v16, 0.0  ;;  %v1203_v40 = vsel %vm1149_vm3, %v1900_v4, 0.0 }
 0x162   :  { %1110 = vst.msk [vmem:[#allocation10 + $0x64] sm:$0xf] %vm1084_vm2, %v1640_v14  ;;  %v1396_v35 = vsel %vm1149_vm3, %v1308_v23, 0.0  ;;  %v1400_v46 = vsel %vm1149_vm3, %v1310_v33, 0.0  ;;  %v1315_v60 = vmul.f32 %v2443_v15, %v2443_v15  ;;  %v1652_v3 = vpack.c.bf16 %v2479_v55, %v2479_v55 }
 0x163   :  { %v1202_v39 = vadd.f32 %v1201_v32, %v1200_v28  ;;  %v1397_v6 = vadd.f32 %v1396_v35, %v1395_v27  ;;  %v1657_v9 = vpack.c.bf16 %v2491_v2, %v2491_v2  ;;  %v1213_v13 = vsel %vm1149_vm3, %v2443_v15, 0.0 }
 0x164   :  { %v1903_v21 = vpop.f32.mrb[28].mxu0  ;;  %v2517_v54 = vpop.f32.mrb[12].mxu1  ;;  %1122 = vst.msk [vmem:[#allocation10 + $0x94] sm:$0xf] %vm1084_vm2, %v1652_v3  ;;  %v1655_v14 = vpack.c.bf16 %v2496_v8, %v2496_v8  ;;  %v1410_v23 = vsel %vm1149_vm3, %v1315_v60, 0.0  ;;  %v1316_v27 = vmul.f32 %v2453_v24, %v2453_v24  ;;  %v1658_v15 = vpack.c.bf16 %v2499_v31, %v2499_v31 }
 0x165   :  { %v1645_v38 = vpack.c.bf16 %v1903_v21, %v1903_v21  ;;  %v685_v41 = vpop.f32.mrb[29].mxu0  ;;  %v1399_v1 = vadd.f32 %v1398_v26, %v1397_v6  ;;  %v1204_v42 = vadd.f32 %v1203_v40, %v1202_v39  ;;  %v1313_v30 = vmul.f32 %v1903_v21, %v1903_v21  ;;  %v2522_v18 = vpop.f32.mrb[13].mxu1  ;;  %1127 = vst.msk [vmem:[#allocation10 + $0xa8] sm:$0xf] %vm1084_vm2, %v1657_v9 }
 0x166   :  { %v1643_v29 = vpack.c.bf16 %v685_v41, %v685_v41  ;;  %v1205_v43 = vsel %vm1149_vm3, %v685_v41, 0.0  ;;  %v1904_v45 = vpop.f32.mrb[30].mxu0  ;;  %v1311_v20 = vmul.f32 %v685_v41, %v685_v41  ;;  %v2527_v61 = vpop.f32.mrb[14].mxu1  ;;  %v1209_v62 = vsel %vm1149_vm3, %v1903_v21, 0.0  ;;  %1125 = vst.msk [vmem:[#allocation10 + $0xa0] sm:$0xf] %vm1084_vm2, %v1655_v14 }
 0x167   :  { %1115 = vst.msk [vmem:[#allocation10 + $0x78] sm:$0xf] %vm1084_vm2, %v1645_v38  ;;  %v1646_v47 = vpack.c.bf16 %v1904_v45, %v1904_v45  ;;  %v688_v49 = vpop.f32.mrb[31].mxu0  ;;  %v1206_v50 = vadd.f32 %v1205_v43, %v1204_v42  ;;  %v1401_v52 = vadd.f32 %v1400_v46, %v1399_v1  ;;  %v1314_v63 = vmul.f32 %v1904_v45, %v1904_v45  ;;  %v2533_v4 = vpop.f32.mrb[15].mxu1 }
 0x168   :  { %1113 = vst.msk [vmem:[#allocation10 + $0x70] sm:$0xf] %vm1084_vm2, %v1643_v29  ;;  %v1644_v53 = vpack.c.bf16 %v688_v49, %v688_v49  ;;  %v1402_v56 = vsel %vm1149_vm3, %v1311_v20, 0.0  ;;  %v1207_v57 = vsel %vm1149_vm3, %v688_v49, 0.0  ;;  %v1312_v58 = vmul.f32 %v688_v49, %v688_v49  ;;  %1128 = vst.msk [vmem:[#allocation10 + $0xac] sm:$0xf] %vm1084_vm2, %v1658_v15 }
 0x169   :  { %1116 = vst.msk [vmem:[#allocation10 + $0x7c] sm:$0xf] %vm1084_vm2, %v1646_v47  ;;  %v1403_v34 = vadd.f32 %v1402_v56, %v1401_v52  ;;  %v1208_v59 = vadd.f32 %v1207_v57, %v1206_v50  ;;  %v1406_v11 = vsel %vm1149_vm3, %v1313_v30, 0.0  ;;  %v1211_v12 = vsel %vm1149_vm3, %v1904_v45, 0.0 }
 0x16a   :  { %1114 = vst.msk [vmem:[#allocation10 + $0x74] sm:$0xf] %vm1084_vm2, %v1644_v53  ;;  %v1404_v0 = vsel %vm1149_vm3, %v1312_v58, 0.0  ;;  %v1408_v22 = vsel %vm1149_vm3, %v1314_v63, 0.0  ;;  %v1656_v33 = vpack.c.bf16 %v2505_v37, %v2505_v37  ;;  %v1215_v39 = vsel %vm1149_vm3, %v2453_v24, 0.0 }
 0x16b   :  { %v1210_v5 = vadd.f32 %v1209_v62, %v1208_v59  ;;  %v1405_v7 = vadd.f32 %v1404_v0, %v1403_v34  ;;  %v1661_v6 = vpack.c.bf16 %v2517_v54, %v2517_v54  ;;  %v1217_v25 = vsel %vm1149_vm3, %v2436_v10, 0.0 }
 0x16c   :  { %v2554_v35 = vpop.f32.mrb[16].mxu1  ;;  %1126 = vst.msk [vmem:[#allocation10 + $0xa4] sm:$0xf] %vm1084_vm2, %v1656_v33  ;;  %v1318_v41 = vmul.f32 %v2446_v17, %v2446_v17  ;;  %v1412_v24 = vsel %vm1149_vm3, %v1316_v27, 0.0  ;;  %v1319_v1 = vmul.f32 %v2470_v48, %v2470_v48  ;;  %v1659_v29 = vpack.c.bf16 %v2522_v18, %v2522_v18 }
 0x16d   :  { %v1407_v16 = vadd.f32 %v1406_v11, %v1405_v7  ;;  %v1212_v19 = vadd.f32 %v1211_v12, %v1210_v5  ;;  %v2563_v21 = vpop.f32.mrb[17].mxu1  ;;  %1131 = vst.msk [vmem:[#allocation10 + $0xb8] sm:$0xf] %vm1084_vm2, %v1661_v6  ;;  %v1662_v45 = vpack.c.bf16 %v2527_v61, %v2527_v61  ;;  %v1414_v46 = vsel %vm1149_vm3, %v1317_v36, 0.0 }
 0x16e   :  { %v2568_v38 = vpop.f32.mrb[18].mxu1  ;;  %v1219_v20 = vsel %vm1149_vm3, %v2446_v17, 0.0  ;;  %v1221_v47 = vsel %vm1149_vm3, %v2470_v48, 0.0  ;;  %1129 = vst.msk [vmem:[#allocation10 + $0xb0] sm:$0xf] %vm1084_vm2, %v1659_v29  ;;  %v1660_v49 = vpack.c.bf16 %v2533_v4, %v2533_v4  ;;  %v1416_v53 = vsel %vm1149_vm3, %v1318_v41, 0.0 }
 0x16f   :  { %v1214_v28 = vadd.f32 %v1213_v13, %v1212_v19  ;;  %v1409_v32 = vadd.f32 %v1408_v22, %v1407_v16  ;;  %v2578_v10 = vpop.f32.mrb[19].mxu1  ;;  %1132 = vst.msk [vmem:[#allocation10 + $0xbc] sm:$0xf] %vm1084_vm2, %v1662_v45  ;;  %v1418_v30 = vsel %vm1149_vm3, %v1319_v1, 0.0  ;;  %v1320_v56 = vmul.f32 %v2479_v55, %v2479_v55 }
 0x170   :  { %1130 = vst.msk [vmem:[#allocation10 + $0xb4] sm:$0xf] %vm1084_vm2, %v1660_v49  ;;  %v1665_v17 = vpack.c.bf16 %v2554_v35, %v2554_v35  ;;  %v1663_v58 = vpack.c.bf16 %v2563_v21, %v2563_v21  ;;  %v1321_v59 = vmul.f32 %v2465_v44, %v2465_v44  ;;  %v1223_v60 = vsel %vm1149_vm3, %v2479_v55, 0.0 }
 0x171   :  { %v1411_v26 = vadd.f32 %v1410_v23, %v1409_v32  ;;  %v1216_v40 = vadd.f32 %v1215_v39, %v1214_v28  ;;  %v1666_v62 = vpack.c.bf16 %v2568_v38, %v2568_v38  ;;  %v1225_v0 = vsel %vm1149_vm3, %v2465_v44, 0.0 }
 0x172   :  { %1135 = vst.msk [vmem:[#allocation10 + $0xc8] sm:$0xf] %vm1084_vm2, %v1665_v17  ;;  %1133 = vst.msk [vmem:[#allocation10 + $0xc0] sm:$0xf] %vm1084_vm2, %v1663_v58  ;;  %v1322_v9 = vmul.f32 %v2473_v51, %v2473_v51  ;;  %v1420_v55 = vsel %vm1149_vm3, %v1320_v56, 0.0  ;;  %v1323_v11 = vmul.f32 %v2496_v8, %v2496_v8  ;;  %v1664_v12 = vpack.c.bf16 %v2578_v10, %v2578_v10 }
 0x173   :  { %v1218_v42 = vadd.f32 %v1217_v25, %v1216_v40  ;;  %v1413_v43 = vadd.f32 %v1412_v24, %v1411_v26  ;;  %1136 = vst.msk [vmem:[#allocation10 + $0xcc] sm:$0xf] %vm1084_vm2, %v1666_v62  ;;  %v1422_v19 = vsel %vm1149_vm3, %v1321_v59, 0.0  ;;  %v1227_v22 = vsel %vm1149_vm3, %v2473_v51, 0.0 }
 0x174   :  { %v2600_v34 = vpop.f32.mrb[20].mxu1  ;;  %v1229_v23 = vsel %vm1149_vm3, %v2496_v8, 0.0  ;;  %1134 = vst.msk [vmem:[#allocation10 + $0xc4] sm:$0xf] %vm1084_vm2, %v1664_v12  ;;  %v1424_v32 = vsel %vm1149_vm3, %v1322_v9, 0.0  ;;  %v1426_v33 = vsel %vm1149_vm3, %v1323_v11, 0.0  ;;  %v1324_v36 = vmul.f32 %v2505_v37, %v2505_v37 }
 0x175   :  { %v1415_v50 = vadd.f32 %v1414_v46, %v1413_v43  ;;  %v1220_v52 = vadd.f32 %v1219_v20, %v1218_v42  ;;  %v2609_v63 = vpop.f32.mrb[21].mxu1  ;;  %v1669_v16 = vpack.c.bf16 %v2600_v34, %v2600_v34  ;;  %v1325_v26 = vmul.f32 %v2491_v2, %v2491_v2 }
 0x176   :  { %v2614_v7 = vpop.f32.mrb[22].mxu1  ;;  %v1667_v27 = vpack.c.bf16 %v2609_v63, %v2609_v63  ;;  %v1231_v40 = vsel %vm1149_vm3, %v2505_v37, 0.0  ;;  %v1233_v1 = vsel %vm1149_vm3, %v2491_v2, 0.0  ;;  %v1326_v45 = vmul.f32 %v2499_v31, %v2499_v31 }
 0x177   :  { %v1222_v48 = vadd.f32 %v1221_v47, %v1220_v52  ;;  %v1417_v57 = vadd.f32 %v1416_v53, %v1415_v50  ;;  %v2624_v44 = vpop.f32.mrb[23].mxu1  ;;  %1139 = vst.msk [vmem:[#allocation10 + $0xd8] sm:$0xf] %vm1084_vm2, %v1669_v16  ;;  %v1670_v51 = vpack.c.bf16 %v2614_v7, %v2614_v7  ;;  %v1428_v37 = vsel %vm1149_vm3, %v1324_v36, 0.0 }
 0x178   :  { %1137 = vst.msk [vmem:[#allocation10 + $0xd0] sm:$0xf] %vm1084_vm2, %v1667_v27  ;;  %v1668_v6 = vpack.c.bf16 %v2624_v44, %v2624_v44  ;;  %v1327_v46 = vmul.f32 %v2522_v18, %v2522_v18  ;;  %v1430_v52 = vsel %vm1149_vm3, %v1325_v26, 0.0  ;;  %v1235_v53 = vsel %vm1149_vm3, %v2499_v31, 0.0 }
 0x179   :  { %v1419_v3 = vadd.f32 %v1418_v30, %v1417_v57  ;;  %v1224_v5 = vadd.f32 %v1223_v60, %v1222_v48  ;;  %1140 = vst.msk [vmem:[#allocation10 + $0xdc] sm:$0xf] %vm1084_vm2, %v1670_v51  ;;  %v1237_v30 = vsel %vm1149_vm3, %v2522_v18, 0.0  ;;  %v1432_v57 = vsel %vm1149_vm3, %v1326_v45, 0.0 }
 0x17a   :  { %1138 = vst.msk [vmem:[#allocation10 + $0xd4] sm:$0xf] %vm1084_vm2, %v1668_v6  ;;  %v1434_v58 = vsel %vm1149_vm3, %v1327_v46, 0.0  ;;  %v1328_v59 = vmul.f32 %v2533_v4, %v2533_v4  ;;  %v1329_v62 = vmul.f32 %v2517_v54, %v2517_v54  ;;  %v1241_v9 = vsel %vm1149_vm3, %v2517_v54, 0.0 }
 0x17b   :  { %v1226_v13 = vadd.f32 %v1225_v0, %v1224_v5  ;;  %v1421_v14 = vadd.f32 %v1420_v55, %v1419_v3  ;;  %v1239_v0 = vsel %vm1149_vm3, %v2533_v4, 0.0  ;;  %v1330_v4 = vmul.f32 %v2527_v61, %v2527_v61 }
 0x17c   :  { %v2646_v25 = vpop.f32.mrb[24].mxu1  ;;  %v1331_v16 = vmul.f32 %v2563_v21, %v2563_v21 }
 0x17d   :  { %v1423_v15 = vadd.f32 %v1422_v19, %v1421_v14  ;;  %v1228_v28 = vadd.f32 %v1227_v22, %v1226_v13  ;;  %v1673_v41 = vpack.c.bf16 %v2646_v25, %v2646_v25  ;;  %v2655_v24 = vpop.f32.mrb[25].mxu1  ;;  %v1436_v14 = vsel %vm1149_vm3, %v1328_v59, 0.0 }
 0x17e   :  { %v2660_v43 = vpop.f32.mrb[26].mxu1  ;;  %v1671_v20 = vpack.c.bf16 %v2655_v24, %v2655_v24  ;;  %v1440_v51 = vsel %vm1149_vm3, %v1330_v4, 0.0 }
 0x17f   :  { %v1230_v8 = vadd.f32 %v1229_v23, %v1228_v28  ;;  %v1425_v39 = vadd.f32 %v1424_v32, %v1423_v15  ;;  %1143 = vst.msk [vmem:[#allocation10 + $0xe8] sm:$0xf] %vm1084_vm2, %v1673_v41  ;;  %v2670_v2 = vpop.f32.mrb[27].mxu1  ;;  %v1674_v50 = vpack.c.bf16 %v2660_v43, %v2660_v43  ;;  %v1438_v15 = vsel %vm1149_vm3, %v1329_v62, 0.0 }
 0x180   :  { %1141 = vst.msk [vmem:[#allocation10 + $0xe0] sm:$0xf] %vm1084_vm2, %v1671_v20  ;;  %v1672_v56 = vpack.c.bf16 %v2670_v2, %v2670_v2  ;;  %v1243_v28 = vsel %vm1149_vm3, %v2527_v61, 0.0  ;;  %v1245_v32 = vsel %vm1149_vm3, %v2563_v21, 0.0 }
 0x181   :  { %v1427_v29 = vadd.f32 %v1426_v33, %v1425_v39  ;;  %v1232_v42 = vadd.f32 %v1231_v40, %v1230_v8  ;;  %1144 = vst.msk [vmem:[#allocation10 + $0xec] sm:$0xf] %vm1084_vm2, %v1674_v50  ;;  %v1442_v8 = vsel %vm1149_vm3, %v1331_v16, 0.0  ;;  %v1332_v39 = vmul.f32 %v2578_v10, %v2578_v10 }
 0x182   :  { %1142 = vst.msk [vmem:[#allocation10 + $0xe4] sm:$0xf] %vm1084_vm2, %v1672_v56 }
 0x183   :  { %v1234_v47 = vadd.f32 %v1233_v1, %v1232_v42  ;;  %v1429_v49 = vadd.f32 %v1428_v37, %v1427_v29 }
 0x184   :  { %v2688_v60 = vpop.f32.mrb[28].mxu1 }
 0x185   :  { %v1431_v17 = vadd.f32 %v1430_v52, %v1429_v49  ;;  %v1236_v48 = vadd.f32 %v1235_v53, %v1234_v47  ;;  %v1677_v3 = vpack.c.bf16 %v2688_v60, %v2688_v60  ;;  %v2696_v5 = vpop.f32.mrb[29].mxu1 }
 0x186   :  { %v1675_v12 = vpack.c.bf16 %v2696_v5, %v2696_v5  ;;  %v2702_v13 = vpop.f32.mrb[30].mxu1 }
 0x187   :  { %v1238_v31 = vadd.f32 %v1237_v30, %v1236_v48  ;;  %v1433_v18 = vadd.f32 %v1432_v57, %v1431_v17  ;;  %1147 = vst.msk [vmem:[#allocation10 + $0xf8] sm:$0xf] %vm1084_vm2, %v1677_v3  ;;  %v1678_v54 = vpack.c.bf16 %v2702_v13, %v2702_v13  ;;  %v2712_v19 = vpop.f32.mrb[31].mxu1 }
 0x188   :  { %1145 = vst.msk [vmem:[#allocation10 + $0xf0] sm:$0xf] %vm1084_vm2, %v1675_v12  ;;  %v1676_v27 = vpack.c.bf16 %v2712_v19, %v2712_v19 }
 0x189   :  { %v1435_v55 = vadd.f32 %v1434_v58, %v1433_v18  ;;  %v1240_v11 = vadd.f32 %v1239_v0, %v1238_v31  ;;  %1148 = vst.msk [vmem:[#allocation10 + $0xfc] sm:$0xf] %vm1084_vm2, %v1678_v54 }
 0x18a   :  { %1146 = vst.msk [vmem:[#allocation10 + $0xf4] sm:$0xf] %vm1084_vm2, %v1676_v27 }
 0x18b   :  { %v1242_v22 = vadd.f32 %v1241_v9, %v1240_v11  ;;  %v1437_v23 = vadd.f32 %v1436_v14, %v1435_v55 }
 0x18d   :  { %v1439_v33 = vadd.f32 %v1438_v15, %v1437_v23  ;;  %v1244_v36 = vadd.f32 %v1243_v28, %v1242_v22 }
 0x18e   :  { %2048 = shalt.err (!%p2045_p8)
}
 0x18f   :  { %s2049_s23 = scalar_lea.hbm %s2832_s4, 4096 }
 0x190   :  { %p2050_p9 = scmp.ne.s32.totalorder %s2832_s4, %s2049_s23  ;;  %p2053_p10 = scmp.lt.u32.totalorder %s2049_s23, %s2832_s4 }
 0x192   :  { %p2055_p11 = pnand %p2053_p10, %p2050_p9 }
 0x194   :  { %2058 = shalt.err (!%p2055_p11)
}
 0x195   :  { %1495 = dma.vmem_to_hbm [thread:$0]  %s1490_s18, 4096, %s2832_s4, [#allocation4], %s2093_s1, %s2093_s1, %s2094_s16   ;;  %v1246_v61 = vadd.f32 %v1245_v32, %v1244_v36  ;;  %v1441_v21 = vadd.f32 %v1440_v51, %v1439_v33  ;;  %v1333_v6 = vmul.f32 %v2554_v35, %v2554_v35  ;;  %v1247_v26 = vsel %vm1149_vm3, %v2578_v10, 0.0 }
 0x196   :  { %v1249_v1 = vsel %vm1149_vm3, %v2554_v35, 0.0  ;;  %v1334_v29 = vmul.f32 %v2568_v38, %v2568_v38  ;;  %v1444_v42 = vsel %vm1149_vm3, %v1332_v39, 0.0  ;;  %v1335_v45 = vmul.f32 %v2609_v63, %v2609_v63  ;;  %s2098_s4 = smov [#allocation11]  }
 0x197   :  { %v1443_v40 = vadd.f32 %v1442_v8, %v1441_v21  ;;  %v1248_v41 = vadd.f32 %v1247_v26, %v1246_v61  ;;  %v1446_v20 = vsel %vm1149_vm3, %v1333_v6, 0.0  ;;  %v1251_v10 = vsel %vm1149_vm3, %v2568_v38, 0.0  ;;  %s1502_s1 = sshll.u32 %s2098_s4, 4  ;;  %s1503_s1 = int_to_ptr.vmem [resolvable:$true] %s1502_s1 }
 0x198   :  { %v1253_v47 = vsel %vm1149_vm3, %v2609_v63, 0.0  ;;  %v1448_v50 = vsel %vm1149_vm3, %v1334_v29, 0.0  ;;  %v1450_v52 = vsel %vm1149_vm3, %v1335_v45, 0.0  ;;  %v1336_v53 = vmul.f32 %v2624_v44, %v2624_v44  ;;  %s2059_s16 = scalar_lea.vmem %s1503_s1, 32  ;;  %p2064_p13 = scmp.lt.s32.totalorder %s1503_s1, %s1503_s1 }
 0x199   :  { %v1250_v37 = vadd.f32 %v1249_v1, %v1248_v41  ;;  %v1445_v46 = vadd.f32 %v1444_v42, %v1443_v40  ;;  %v1337_v17 = vmul.f32 %v2600_v34, %v2600_v34  ;;  %v1255_v38 = vsel %vm1149_vm3, %v2624_v44, 0.0  ;;  %p2060_p12 = scmp.ne.s32.totalorder %s1503_s1, %s2059_s16  ;;  %p2065_p0 = scmp.lt.s32.totalorder %s2059_s16, %s2059_s16 }
 0x19a   :  { %v1257_v63 = vsel %vm1149_vm3, %v2600_v34, 0.0  ;;  %v1338_v58 = vmul.f32 %v2614_v7, %v2614_v7  ;;  %v1452_v59 = vsel %vm1149_vm3, %v1336_v53, 0.0  ;;  %v1339_v31 = vmul.f32 %v2655_v24, %v2655_v24 }
 0x19b   :  { %v1447_v49 = vadd.f32 %v1446_v20, %v1445_v46  ;;  %v1252_v35 = vadd.f32 %v1251_v10, %v1250_v37  ;;  %v1454_v0 = vsel %vm1149_vm3, %v1337_v17, 0.0  ;;  %v1259_v44 = vsel %vm1149_vm3, %v2614_v7, 0.0  ;;  %p2066_p1 = por %p2065_p0, %p2064_p13 }
 0x19c   :  { %v1261_v3 = vsel %vm1149_vm3, %v2655_v24, 0.0  ;;  %v1456_v55 = vsel %vm1149_vm3, %v1338_v58, 0.0  ;;  %v1458_v11 = vsel %vm1149_vm3, %v1339_v31, 0.0  ;;  %v1340_v12 = vmul.f32 %v2670_v2, %v2670_v2 }
 0x19d   :  { %v1254_v30 = vadd.f32 %v1253_v47, %v1252_v35  ;;  %v1449_v56 = vadd.f32 %v1448_v50, %v1447_v49  ;;  %v1341_v16 = vmul.f32 %v2646_v25, %v2646_v25  ;;  %v1263_v7 = vsel %vm1149_vm3, %v2670_v2, 0.0  ;;  %p2067_p2 = pnand %p2066_p1, %p2060_p12 }
 0x19e   :  { %v1265_v24 = vsel %vm1149_vm3, %v2646_v25, 0.0  ;;  %v1342_v23 = vmul.f32 %v2660_v43, %v2660_v43  ;;  %v1460_v27 = vsel %vm1149_vm3, %v1340_v12, 0.0  ;;  %v1343_v15 = vmul.f32 %v2696_v5, %v2696_v5 }
 0x19f   :  { %v1451_v48 = vadd.f32 %v1450_v52, %v1449_v56  ;;  %v1256_v57 = vadd.f32 %v1255_v38, %v1254_v30  ;;  %v1462_v33 = vsel %vm1149_vm3, %v1341_v16, 0.0  ;;  %v1267_v2 = vsel %vm1149_vm3, %v2660_v43, 0.0 }
 0x1a0   :  { %v1269_v36 = vsel %vm1149_vm3, %v2696_v5, 0.0  ;;  %v1464_v8 = vsel %vm1149_vm3, %v1342_v23, 0.0  ;;  %v1466_v39 = vsel %vm1149_vm3, %v1343_v15, 0.0  ;;  %v1344_v61 = vmul.f32 %v2712_v19, %v2712_v19 }
 0x1a1   :  { %v1258_v18 = vadd.f32 %v1257_v63, %v1256_v57  ;;  %v1453_v62 = vadd.f32 %v1452_v59, %v1451_v48  ;;  %v1345_v26 = vmul.f32 %v2688_v60, %v2688_v60  ;;  %v1271_v43 = vsel %vm1149_vm3, %v2712_v19, 0.0 }
 0x1a2   :  { %v1273_v5 = vsel %vm1149_vm3, %v2688_v60, 0.0  ;;  %v1346_v1 = vmul.f32 %v2702_v13, %v2702_v13  ;;  %v1468_v29 = vsel %vm1149_vm3, %v1344_v61, 0.0  ;;  %v1275_v46 = vsel %vm1149_vm3, %v2702_v13, 0.0 }
 0x1a3   :  { %v1455_v9 = vadd.f32 %v1454_v0, %v1453_v62  ;;  %v1260_v34 = vadd.f32 %v1259_v44, %v1258_v18  ;;  %v1470_v37 = vsel %vm1149_vm3, %v1345_v26, 0.0  ;;  %vm1480_vm4 = vcmask 1040384  }
 0x1a4   :  { %v1472_v19 = vsel %vm1149_vm3, %v1346_v1, 0.0  ;;  %vm1482_vm5 = vcmask 25600  }
 0x1a5   :  { %v1262_v4 = vadd.f32 %v1261_v3, %v1260_v34  ;;  %v1457_v14 = vadd.f32 %v1456_v55, %v1455_v9 }
 0x1a7   :  { %v1459_v54 = vadd.f32 %v1458_v11, %v1457_v14  ;;  %v1264_v22 = vadd.f32 %v1263_v7, %v1262_v4 }
 0x1a9   :  { %v1266_v28 = vadd.f32 %v1265_v24, %v1264_v22  ;;  %v1461_v32 = vadd.f32 %v1460_v27, %v1459_v54 }
 0x1ab   :  { %v1463_v51 = vadd.f32 %v1462_v33, %v1461_v32  ;;  %v1268_v25 = vadd.f32 %v1267_v2, %v1266_v28 }
 0x1ad   :  { %v1270_v21 = vadd.f32 %v1269_v36, %v1268_v25  ;;  %v1465_v6 = vadd.f32 %v1464_v8, %v1463_v51 }
 0x1af   :  { %v1467_v40 = vadd.f32 %v1466_v39, %v1465_v6  ;;  %v1272_v41 = vadd.f32 %v1271_v43, %v1270_v21 }
 0x1b1   :  { %v1274_v42 = vadd.f32 %v1273_v5, %v1272_v41  ;;  %v1469_v45 = vadd.f32 %v1468_v29, %v1467_v40 }
 0x1b3   :  { %v1276_v20 = vadd.f32 %v1275_v46, %v1274_v42  ;;  %v1471_v10 = vadd.f32 %v1470_v37, %v1469_v45 }
 0x1b5   :  { %v1277_v47 = vrot.slane %v1276_v20, 4  ;;  %v1473_v49 = vadd.f32 %v1472_v19, %v1471_v10 }
 0x1b7   :  { %v1278_v35 = vadd.f32 %v1277_v47, %v1276_v20  ;;  %v1474_v60 = vrot.slane %v1473_v49, 4 }
 0x1b9   :  { %v1279_v50 = vrot.slane %v1278_v35, 2  ;;  %v1475_v52 = vadd.f32 %v1474_v60, %v1473_v49 }
 0x1bb   :  { %v1280_v53 = vadd.f32 %v1279_v50, %v1278_v35  ;;  %v1476_v30 = vrot.slane %v1475_v52, 2 }
 0x1bd   :  { %v1281_v56 = vrot.slane %v1280_v53, 1  ;;  %v1477_v17 = vadd.f32 %v1476_v30, %v1475_v52 }
 0x1bf   :  { %v1478_v38 = vrot.slane %v1477_v17, 1  ;;  %v1282_v48 = vadd.f32 %v1281_v56, %v1280_v53 }
 0x1c1   :  { %v1479_v13 = vadd.f32 %v1478_v38, %v1477_v17 }
 0x1c3   :  { %v1481_v57 = vsel %vm1480_vm4, %v1282_v48, %v1479_v13 }
 0x1c4   :  { %1483 = vst.msk [vmem:[#allocation11] sm:$0x3] %vm1482_vm5, %v1481_v57 }
 0x1c5   :  { %2070 = shalt.err (!%p2067_p2)
}
 0x1c6   :  { %s2071_s21 = scalar_lea.hbm %s2833_s5, 32 }
 0x1c7   :  { %p2072_p3 = scmp.ne.s32.totalorder %s2833_s5, %s2071_s21  ;;  %p2075_p4 = scmp.lt.u32.totalorder %s2071_s21, %s2833_s5 }
 0x1c9   :  { %p2077_p5 = pnand %p2075_p4, %p2072_p3 }
 0x1cb   :  { %2080 = shalt.err (!%p2077_p5)
}
 0x1cc   :  { %1505 = dma.vmem_to_hbm [thread:$0]  %s1503_s1, 32, %s2833_s5, [#allocation12]  }
 0x1cd   :  { %2087 = dma.done.wait [#allocation4], 4096  }
 0x1ce   :  { %2088 = vsyncadd [#allocation4], 4294963200 }
 0x1cf   :  { %2089 = dma.done.wait [#allocation12], 32  }
 0x1d0   :  { %2090 = vsyncadd [#allocation12], 4294967264 }
 0x1d1   :  { %1512 = vsyncpa [#allocation3], 1 }
 0x1d2   :  { %1513 = vsyncpa [#allocation6], 1 }
 0x1d3   :  { %1514 = vsyncpa [#allocation9], 1 }
 0x1d4   :  { %1515 = vsyncpa [#allocation4], 1 }
 0x1d5   :  { %1516 = vsyncpa [#allocation12], 1 }

</bundles_post_ra>
